<compile_context>
chip_gen: v5e
topology: v5e:2x2
jax: 0.10.0
libtpu: 0.0.40
codegen_flags: <defaults>
</compile_context>

<pallas_src>
import jax
import jax.numpy as jnp
from jax.experimental import pallas as pl
from jax.experimental.pallas import tpu as pltpu


def _round_up(x, m):
    return ((x + m - 1) // m) * m


def _prep_gate_weight(w, h, hp, in_dim, in_dim_p, dtype):
    """[3h, in_dim] -> [in_dim_p, 3hp]; each r/z/n block zero-padded to hp."""
    w3 = w.reshape(3, h, in_dim)
    w3 = jnp.pad(w3, ((0, 0), (0, hp - h), (0, in_dim_p - in_dim)))
    return jnp.transpose(w3.reshape(3 * hp, in_dim_p), (1, 0)).astype(dtype)


def _prep_gate_bias(b, h, hp):
    return jnp.pad(b.reshape(3, h), ((0, 0), (0, hp - h))).reshape(3 * hp)


def _make_kernel(frames, hp, n_layers, compute_dtype, frames_unrolled):
    g3 = 3 * hp

    def kernel(*refs):
        x_ref = refs[0]
        layer_refs = [refs[1 + 4 * n: 5 + 4 * n] for n in range(n_layers)]
        base = 1 + 4 * n_layers
        pw_ref, pb_ref, out_ref = refs[base], refs[base + 1], refs[base + 2]
        gi_ref = refs[base + 3]                     # VMEM [frames, bb, 3hp]
        seq_ref = refs[base + 4] if n_layers > 1 else None   # VMEM [frames, bb, hp]

        bb = x_ref.shape[1]
        h = jnp.zeros((bb, hp), jnp.float32)

        for n in range(n_layers):
            wih_t_ref, whh_t_ref, bgi_ref, bhn_ref = layer_refs[n]

            # ---- (1) input transform for ALL timesteps: one big MXU matmul ----
            inp = x_ref[...] if n == 0 else seq_ref[...]        # [frames, bb, in]
            inp2d = inp.reshape(frames * bb, inp.shape[-1]).astype(compute_dtype)
            gi_all = jnp.dot(inp2d, wih_t_ref[...],
                             preferred_element_type=jnp.float32) + bgi_ref[...]
            gi_ref[...] = gi_all.reshape(frames, bb, g3)

            # ---- (2) recurrence: only the small [bb,hp]@[hp,3hp] matmul is serial ----
            bhn = jnp.broadcast_to(bhn_ref[...], (bb, hp))      # hoisted broadcast
            write_seq = n + 1 < n_layers                        # last layer: no stores

            def step(l, h_prev):
                gi = gi_ref[l]                                  # [bb, 3hp]
                gh = jnp.dot(h_prev.astype(compute_dtype), whh_t_ref[...],
                             preferred_element_type=jnp.float32)
                r = jax.nn.sigmoid(gi[:, 0:hp] + gh[:, 0:hp])
                z = jax.nn.sigmoid(gi[:, hp:2 * hp] + gh[:, hp:2 * hp])
                c = jnp.tanh(gi[:, 2 * hp:] + r * (gh[:, 2 * hp:] + bhn))
                h_new = (1.0 - z) * c + z * h_prev
                if write_seq:
                    seq_ref[l] = h_new
                return h_new

            h = jnp.zeros((bb, hp), jnp.float32)
            if frames_unrolled:
                for l in range(frames):
                    h = step(l, h)
            else:
                h = jax.lax.fori_loop(0, frames, step, h, unroll=2)

        # ---- (3) last frame -> projection -> L2 normalize (eps guarded) ----
        proj = jnp.dot(h.astype(compute_dtype), pw_ref[...],
                       preferred_element_type=jnp.float32) + pb_ref[...]
        ssq = jnp.sum(proj * proj, axis=-1, keepdims=True)
        out_ref[...] = proj * jax.lax.rsqrt(jnp.maximum(ssq, 1e-12))

    return kernel


def speaker_embedder_forward(x, layer_params, proj_w, proj_b, *,
                             weight_dtype=jnp.float32,
                             batch_block=None, unroll_frames=16):
    """x: [batch, frames, n_mels] f32. layer_params: list of (wih, whh, bih, bhh)."""
    x = jnp.asarray(x, jnp.float32)
    B, F, n_mels = x.shape
    H = layer_params[0][1].shape[1]
    L = len(layer_params)
    fc = proj_w.shape[0]

    hp = _round_up(H, 128)                 # lane-aligned gate width (zero padded)
    b8 = _round_up(B, 8)                   # sublane-aligned batch
    if batch_block is None:
        batch_block = 8 if b8 <= 8 else _round_up(pl.cdiv(b8, 2), 8)
    bb = min(_round_up(batch_block, 8), b8)
    bp = _round_up(b8, bb)
    n_blocks = bp // bb

    # time-major, batch padded to bp (padded rows sliced off at the end)
    x_tm = jnp.pad(jnp.transpose(x, (1, 0, 2)), ((0, 0), (0, bp - B), (0, 0)))

    inputs = [x_tm]
    for n, (wih, whh, bih, bhh) in enumerate(layer_params):
        in_dim = n_mels if n == 0 else H
        in_dim_p = n_mels if n == 0 else hp
        wih_t = _prep_gate_weight(jnp.asarray(wih, jnp.float32), H, hp,
                                  in_dim, in_dim_p, weight_dtype)
        whh_t = _prep_gate_weight(jnp.asarray(whh, jnp.float32), H, hp,
                                  H, hp, weight_dtype)
        bih_p = _prep_gate_bias(jnp.asarray(bih, jnp.float32), H, hp)
        bhh_p = _prep_gate_bias(jnp.asarray(bhh, jnp.float32), H, hp)
        # fold b_ih (all gates) + b_hh (r,z gates) into the batched input transform
        bias_gi = (bih_p + jnp.concatenate(
            [bhh_p[:2 * hp], jnp.zeros((hp,), jnp.float32)])).reshape(1, 3 * hp)
        bias_hn = bhh_p[2 * hp:].reshape(1, hp)     # b_hh of the candidate gate
        inputs += [wih_t, whh_t, bias_gi, bias_hn]

    pw_t = jnp.pad(jnp.asarray(proj_w, jnp.float32),
                   ((0, 0), (0, hp - H))).T.astype(weight_dtype)   # [hp, fc]
    pb = jnp.asarray(proj_b, jnp.float32).reshape(1, fc)
    inputs += [pw_t, pb]

    in_specs = [pl.BlockSpec((F, bb, n_mels), lambda i: (0, i, 0))]
    in_specs += [pl.BlockSpec(a.shape, lambda i: (0, 0)) for a in inputs[1:]]
    out_spec = pl.BlockSpec((bb, fc), lambda i: (i, 0))

    scratch = [pltpu.VMEM((F, bb, 3 * hp), jnp.float32)]
    if L > 1:
        scratch.append(pltpu.VMEM((F, bb, hp), jnp.float32))

    # VMEM budget: double-buffered x block + params + scratch + headroom
    need = 2 * F * bb * n_mels * 4 + 2 * bb * fc * 4
    need += sum(int(a.size) * a.dtype.itemsize for a in inputs[1:])
    need += F * bb * 3 * hp * 4 + (F * bb * hp * 4 if L > 1 else 0)
    vmem_limit = int(min(max(2 * need, 32 * 2 ** 20), 64 * 2 ** 20))

    kernel = _make_kernel(F, hp, L, weight_dtype,
                          frames_unrolled=(F <= unroll_frames))

    out = pl.pallas_call(
        kernel,
        out_shape=jax.ShapeDtypeStruct((bp, fc), jnp.float32),
        grid=(n_blocks,),
        in_specs=in_specs,
        out_specs=out_spec,
        scratch_shapes=scratch,
        compiler_params=pltpu.CompilerParams(
            dimension_semantics=("parallel",),     # batch blocks independent (v7x megacore)
            vmem_limit_bytes=vmem_limit),
    )(*inputs)
    return out[:B]


def ref_forward(x, layer_params, proj_w, proj_b):
    """Pure-JAX reference (dropout as identity), f32."""
    B, L, _ = x.shape
    H = layer_params[0][1].shape[1]
    seq = x
    for (wih, whh, bih, bhh) in layer_params:
        h_prev = jnp.zeros((B, H), jnp.float32)
        outs = []
        for l in range(L):
            gi = seq[:, l, :] @ wih.T + bih
            gh = h_prev @ whh.T + bhh
            r = jax.nn.sigmoid(gi[:, :H] + gh[:, :H])
            z = jax.nn.sigmoid(gi[:, H:2 * H] + gh[:, H:2 * H])
            c = jnp.tanh(gi[:, 2 * H:] + r * gh[:, 2 * H:])
            h = (1.0 - z) * c + z * h_prev
            outs.append(h)
            h_prev = h
        seq = jnp.stack(outs, axis=1)
    proj = seq[:, -1, :] @ proj_w.T + proj_b
    return proj / jnp.linalg.norm(proj, axis=-1, keepdims=True)


if __name__ == "__main__":
    n_mels, n_hid, n_layers, fc_dim = 16, 32, 2, 16

    key = jax.random.PRNGKey(0)
    kp, kx1, kx2 = jax.random.split(key, 3)

    pkeys = jax.random.split(kp, 4 * n_layers + 2)
    layer_params = []
    i = 0
    for n in range(n_layers):
        in_size = n_mels if n == 0 else n_hid
        wih = 0.1 * jax.random.normal(pkeys[i], (3 * n_hid, in_size), jnp.float32); i += 1
        whh = 0.1 * jax.random.normal(pkeys[i], (3 * n_hid, n_hid), jnp.float32); i += 1
        bih = 0.1 * jax.random.normal(pkeys[i], (3 * n_hid,), jnp.float32); i += 1
        bhh = 0.1 * jax.random.normal(pkeys[i], (3 * n_hid,), jnp.float32); i += 1
        layer_params.append((wih, whh, bih, bhh))
    # LineEar is zero-initialized in the module; use random values so the L2
    # normalization is well-defined in the test (kernel also eps-guards it).
    proj_w = 0.1 * jax.random.normal(pkeys[i], (fc_dim, n_hid), jnp.float32); i += 1
    proj_b = 0.1 * jax.random.normal(pkeys[i], (fc_dim,), jnp.float32); i += 1

    # config 1: small batch/frames -> fully unrolled frame loop, single batch block
    x1 = jax.random.normal(kx1, (2, 8, n_mels), jnp.float32)
    out1 = jax.block_until_ready(
        speaker_embedder_forward(x1, layer_params, proj_w, proj_b))
    ref1 = ref_forward(x1, layer_params, proj_w, proj_b)
    assert out1.shape == (2, fc_dim)
    assert jnp.allclose(out1, ref1, atol=1e-3, rtol=1e-3), (out1, ref1)
    assert jnp.allclose(jnp.linalg.norm(out1, axis=-1), 1.0, atol=1e-3)

    # config 2: longer sequence -> fori_loop path, 2 batch blocks + batch padding
    x2 = jax.random.normal(kx2, (10, 40, n_mels), jnp.float32)
    out2 = jax.block_until_ready(
        speaker_embedder_forward(x2, layer_params, proj_w, proj_b))
    ref2 = ref_forward(x2, layer_params, proj_w, proj_b)
    assert out2.shape == (10, fc_dim)
    assert jnp.allclose(out2, ref2, atol=1e-3, rtol=1e-3), (out2, ref2)

    # config 3: bfloat16 weights on the MXU (f32 accumulation), looser tolerance
    out3 = jax.block_until_ready(
        speaker_embedder_forward(x1, layer_params, proj_w, proj_b,
                                 weight_dtype=jnp.bfloat16))
    assert jnp.allclose(out3, ref1, atol=5e-2, rtol=5e-2), (out3, ref1)

    print("KERNEL_OK")
</pallas_src>

<mosaic_0001>
module attributes {stable_mosaic.version = 11 : i64} {
  func.func @kernel(%arg0: i32, %arg1: memref<8x8x16xf32, #tpu.memory_space<vmem>>, %arg2: memref<16x384xf32, #tpu.memory_space<vmem>>, %arg3: memref<128x384xf32, #tpu.memory_space<vmem>>, %arg4: memref<1x384xf32, #tpu.memory_space<vmem>>, %arg5: memref<1x128xf32, #tpu.memory_space<vmem>>, %arg6: memref<128x384xf32, #tpu.memory_space<vmem>>, %arg7: memref<128x384xf32, #tpu.memory_space<vmem>>, %arg8: memref<1x384xf32, #tpu.memory_space<vmem>>, %arg9: memref<1x128xf32, #tpu.memory_space<vmem>>, %arg10: memref<128x16xf32, #tpu.memory_space<vmem>>, %arg11: memref<1x16xf32, #tpu.memory_space<vmem>>, %arg12: memref<8x16xf32, #tpu.memory_space<vmem>>, %arg13: memref<8x8x384xf32, #tpu.memory_space<vmem>>, %arg14: memref<8x8x128xf32, #tpu.memory_space<vmem>>) attributes {dimension_semantics = [#tpu.dimension_semantics<parallel>], iteration_bounds = array<i64: 1>, scalar_prefetch = 0 : i64, scratch_operands = 2 : i64, tpu.core_type = #tpu.core_type<tc>, window_params = [{transform_indices = @transform_0, window_bounds = array<i64: 8, 8, 16>}, {pipeline_mode = #tpu.pipeline_mode<synchronous>, transform_indices = @transform_1, window_bounds = array<i64: 16, 384>}, {pipeline_mode = #tpu.pipeline_mode<synchronous>, transform_indices = @transform_2, window_bounds = array<i64: 128, 384>}, {pipeline_mode = #tpu.pipeline_mode<synchronous>, transform_indices = @transform_3, window_bounds = array<i64: 1, 384>}, {pipeline_mode = #tpu.pipeline_mode<synchronous>, transform_indices = @transform_4, window_bounds = array<i64: 1, 128>}, {pipeline_mode = #tpu.pipeline_mode<synchronous>, transform_indices = @transform_5, window_bounds = array<i64: 128, 384>}, {pipeline_mode = #tpu.pipeline_mode<synchronous>, transform_indices = @transform_6, window_bounds = array<i64: 128, 384>}, {pipeline_mode = #tpu.pipeline_mode<synchronous>, transform_indices = @transform_7, window_bounds = array<i64: 1, 384>}, {pipeline_mode = #tpu.pipeline_mode<synchronous>, transform_indices = @transform_8, window_bounds = array<i64: 1, 128>}, {pipeline_mode = #tpu.pipeline_mode<synchronous>, transform_indices = @transform_9, window_bounds = array<i64: 128, 16>}, {pipeline_mode = #tpu.pipeline_mode<synchronous>, transform_indices = @transform_10, window_bounds = array<i64: 1, 16>}, {transform_indices = @transform_11, window_bounds = array<i64: 8, 16>}]} {
    %c0 = arith.constant 0 : index
    %c0_0 = arith.constant 0 : index
    %c0_1 = arith.constant 0 : index
    %0 = vector.load %arg1[%c0, %c0_0, %c0_1] : memref<8x8x16xf32, #tpu.memory_space<vmem>>, vector<8x8x16xf32>
    %1 = vector.shape_cast %0 : vector<8x8x16xf32> to vector<64x16xf32>
    %c0_2 = arith.constant 0 : index
    %c0_3 = arith.constant 0 : index
    %2 = vector.load %arg2[%c0_2, %c0_3] : memref<16x384xf32, #tpu.memory_space<vmem>>, vector<16x384xf32>
    %cst = arith.constant dense<0.000000e+00> : vector<64x384xf32>
    %3 = tpu.matmul %1, %2, %cst {dimension_numbers = #tpu.dot_dimension_numbers<[1], [0], [0], [1], [0, 0, 1, 1], [], []>} : vector<64x16xf32>, vector<16x384xf32>, vector<64x384xf32> -> vector<64x384xf32>
    %c0_4 = arith.constant 0 : index
    %c0_5 = arith.constant 0 : index
    %4 = vector.load %arg4[%c0_4, %c0_5] : memref<1x384xf32, #tpu.memory_space<vmem>>, vector<1x384xf32>
    %5 = vector.broadcast %4 : vector<1x384xf32> to vector<64x384xf32>
    %6 = arith.addf %3, %5 : vector<64x384xf32>
    %7 = vector.shape_cast %6 : vector<64x384xf32> to vector<8x8x384xf32>
    %c0_6 = arith.constant 0 : index
    %c0_7 = arith.constant 0 : index
    %c0_8 = arith.constant 0 : index
    %8 = vector.load %arg13[%c0_6, %c0_7, %c0_8] : memref<8x8x384xf32, #tpu.memory_space<vmem>>, vector<8x8x384xf32>
    tpu.vector_store %arg13[%c0_6, %c0_7, %c0_8], %7 {strides = array<i32>} : memref<8x8x384xf32, #tpu.memory_space<vmem>>, vector<8x8x384xf32>,
    %c0_9 = arith.constant 0 : index
    %c0_10 = arith.constant 0 : index
    %9 = vector.load %arg5[%c0_9, %c0_10] : memref<1x128xf32, #tpu.memory_space<vmem>>, vector<1x128xf32>
    %10 = vector.shape_cast %9 : vector<1x128xf32> to vector<1x128xf32>
    %11 = vector.broadcast %10 : vector<1x128xf32> to vector<8x128xf32>
    %cst_11 = arith.constant 0.000000e+00 : f32
    %12 = vector.broadcast %cst_11 : f32 to vector<8x128xf32>
    %c0_12 = arith.constant 0 : index
    %c0_13 = arith.constant 0 : index
    %c0_14 = arith.constant 0 : index
    %13 = vector.load %arg13[%c0_12, %c0_13, %c0_14] : memref<8x8x384xf32, #tpu.memory_space<vmem>>, vector<1x8x384xf32>
    %14 = vector.shape_cast %13 : vector<1x8x384xf32> to vector<8x384xf32>
    %c0_15 = arith.constant 0 : index
    %c0_16 = arith.constant 0 : index
    %15 = vector.load %arg3[%c0_15, %c0_16] : memref<128x384xf32, #tpu.memory_space<vmem>>, vector<128x384xf32>
    %cst_17 = arith.constant dense<0.000000e+00> : vector<8x384xf32>
    %16 = tpu.matmul %12, %15, %cst_17 {dimension_numbers = #tpu.dot_dimension_numbers<[1], [0], [0], [1], [0, 0, 1, 1], [], []>} : vector<8x128xf32>, vector<128x384xf32>, vector<8x384xf32> -> vector<8x384xf32>
    %17 = vector.extract_strided_slice %14 {offsets = [0, 0], sizes = [8, 128], strides = [1, 1]} : vector<8x384xf32> to vector<8x128xf32>
    %18 = vector.extract_strided_slice %16 {offsets = [0, 0], sizes = [8, 128], strides = [1, 1]} : vector<8x384xf32> to vector<8x128xf32>
    %19 = arith.addf %17, %18 : vector<8x128xf32>
    %20 = arith.negf %19 : vector<8x128xf32>
    %21 = math.exp %20 : vector<8x128xf32>
    %cst_18 = arith.constant 1.000000e+00 : f32
    %22 = vector.broadcast %cst_18 : f32 to vector<8x128xf32>
    %23 = arith.addf %22, %21 : vector<8x128xf32>
    %24 = arith.divf %22, %23 : vector<8x128xf32>
    %25 = vector.extract_strided_slice %14 {offsets = [0, 128], sizes = [8, 128], strides = [1, 1]} : vector<8x384xf32> to vector<8x128xf32>
    %26 = vector.extract_strided_slice %16 {offsets = [0, 128], sizes = [8, 128], strides = [1, 1]} : vector<8x384xf32> to vector<8x128xf32>
    %27 = arith.addf %25, %26 : vector<8x128xf32>
    %28 = arith.negf %27 : vector<8x128xf32>
    %29 = math.exp %28 : vector<8x128xf32>
    %cst_19 = arith.constant 1.000000e+00 : f32
    %30 = vector.broadcast %cst_19 : f32 to vector<8x128xf32>
    %31 = arith.addf %30, %29 : vector<8x128xf32>
    %32 = arith.divf %30, %31 : vector<8x128xf32>
    %33 = vector.extract_strided_slice %14 {offsets = [0, 256], sizes = [8, 128], strides = [1, 1]} : vector<8x384xf32> to vector<8x128xf32>
    %34 = vector.extract_strided_slice %16 {offsets = [0, 256], sizes = [8, 128], strides = [1, 1]} : vector<8x384xf32> to vector<8x128xf32>
    %35 = arith.addf %34, %11 : vector<8x128xf32>
    %36 = arith.mulf %24, %35 : vector<8x128xf32>
    %37 = arith.addf %33, %36 : vector<8x128xf32>
    %38 = math.tanh %37 : vector<8x128xf32>
    %cst_20 = arith.constant 1.000000e+00 : f32
    %39 = vector.broadcast %cst_20 : f32 to vector<8x128xf32>
    %40 = arith.subf %39, %32 : vector<8x128xf32>
    %41 = arith.mulf %40, %38 : vector<8x128xf32>
    %42 = arith.mulf %32, %12 : vector<8x128xf32>
    %43 = arith.addf %41, %42 : vector<8x128xf32>
    %c0_21 = arith.constant 0 : index
    %c0_22 = arith.constant 0 : index
    %c0_23 = arith.constant 0 : index
    %44 = vector.load %arg14[%c0_21, %c0_22, %c0_23] : memref<8x8x128xf32, #tpu.memory_space<vmem>>, vector<1x8x128xf32>
    %45 = vector.shape_cast %44 : vector<1x8x128xf32> to vector<8x128xf32>
    %46 = vector.shape_cast %43 : vector<8x128xf32> to vector<1x8x128xf32>
    tpu.vector_store %arg14[%c0_21, %c0_22, %c0_23], %46 {strides = array<i32>} : memref<8x8x128xf32, #tpu.memory_space<vmem>>, vector<1x8x128xf32>,
    %c1 = arith.constant 1 : index
    %c0_24 = arith.constant 0 : index
    %c0_25 = arith.constant 0 : index
    %47 = vector.load %arg13[%c1, %c0_24, %c0_25] : memref<8x8x384xf32, #tpu.memory_space<vmem>>, vector<1x8x384xf32>
    %48 = vector.shape_cast %47 : vector<1x8x384xf32> to vector<8x384xf32>
    %c0_26 = arith.constant 0 : index
    %c0_27 = arith.constant 0 : index
    %49 = vector.load %arg3[%c0_26, %c0_27] : memref<128x384xf32, #tpu.memory_space<vmem>>, vector<128x384xf32>
    %cst_28 = arith.constant dense<0.000000e+00> : vector<8x384xf32>
    %50 = tpu.matmul %43, %49, %cst_28 {dimension_numbers = #tpu.dot_dimension_numbers<[1], [0], [0], [1], [0, 0, 1, 1], [], []>} : vector<8x128xf32>, vector<128x384xf32>, vector<8x384xf32> -> vector<8x384xf32>
    %51 = vector.extract_strided_slice %48 {offsets = [0, 0], sizes = [8, 128], strides = [1, 1]} : vector<8x384xf32> to vector<8x128xf32>
    %52 = vector.extract_strided_slice %50 {offsets = [0, 0], sizes = [8, 128], strides = [1, 1]} : vector<8x384xf32> to vector<8x128xf32>
    %53 = arith.addf %51, %52 : vector<8x128xf32>
    %54 = arith.negf %53 : vector<8x128xf32>
    %55 = math.exp %54 : vector<8x128xf32>
    %cst_29 = arith.constant 1.000000e+00 : f32
    %56 = vector.broadcast %cst_29 : f32 to vector<8x128xf32>
    %57 = arith.addf %56, %55 : vector<8x128xf32>
    %58 = arith.divf %56, %57 : vector<8x128xf32>
    %59 = vector.extract_strided_slice %48 {offsets = [0, 128], sizes = [8, 128], strides = [1, 1]} : vector<8x384xf32> to vector<8x128xf32>
    %60 = vector.extract_strided_slice %50 {offsets = [0, 128], sizes = [8, 128], strides = [1, 1]} : vector<8x384xf32> to vector<8x128xf32>
    %61 = arith.addf %59, %60 : vector<8x128xf32>
    %62 = arith.negf %61 : vector<8x128xf32>
    %63 = math.exp %62 : vector<8x128xf32>
    %cst_30 = arith.constant 1.000000e+00 : f32
    %64 = vector.broadcast %cst_30 : f32 to vector<8x128xf32>
    %65 = arith.addf %64, %63 : vector<8x128xf32>
    %66 = arith.divf %64, %65 : vector<8x128xf32>
    %67 = vector.extract_strided_slice %48 {offsets = [0, 256], sizes = [8, 128], strides = [1, 1]} : vector<8x384xf32> to vector<8x128xf32>
    %68 = vector.extract_strided_slice %50 {offsets = [0, 256], sizes = [8, 128], strides = [1, 1]} : vector<8x384xf32> to vector<8x128xf32>
    %69 = arith.addf %68, %11 : vector<8x128xf32>
    %70 = arith.mulf %58, %69 : vector<8x128xf32>
    %71 = arith.addf %67, %70 : vector<8x128xf32>
    %72 = math.tanh %71 : vector<8x128xf32>
    %cst_31 = arith.constant 1.000000e+00 : f32
    %73 = vector.broadcast %cst_31 : f32 to vector<8x128xf32>
    %74 = arith.subf %73, %66 : vector<8x128xf32>
    %75 = arith.mulf %74, %72 : vector<8x128xf32>
    %76 = arith.mulf %66, %43 : vector<8x128xf32>
    %77 = arith.addf %75, %76 : vector<8x128xf32>
    %c1_32 = arith.constant 1 : index
    %c0_33 = arith.constant 0 : index
    %c0_34 = arith.constant 0 : index
    %78 = vector.load %arg14[%c1_32, %c0_33, %c0_34] : memref<8x8x128xf32, #tpu.memory_space<vmem>>, vector<1x8x128xf32>
    %79 = vector.shape_cast %78 : vector<1x8x128xf32> to vector<8x128xf32>
    %80 = vector.shape_cast %77 : vector<8x128xf32> to vector<1x8x128xf32>
    tpu.vector_store %arg14[%c1_32, %c0_33, %c0_34], %80 {strides = array<i32>} : memref<8x8x128xf32, #tpu.memory_space<vmem>>, vector<1x8x128xf32>,
    %c2 = arith.constant 2 : index
    %c0_35 = arith.constant 0 : index
    %c0_36 = arith.constant 0 : index
    %81 = vector.load %arg13[%c2, %c0_35, %c0_36] : memref<8x8x384xf32, #tpu.memory_space<vmem>>, vector<1x8x384xf32>
    %82 = vector.shape_cast %81 : vector<1x8x384xf32> to vector<8x384xf32>
    %c0_37 = arith.constant 0 : index
    %c0_38 = arith.constant 0 : index
    %83 = vector.load %arg3[%c0_37, %c0_38] : memref<128x384xf32, #tpu.memory_space<vmem>>, vector<128x384xf32>
    %cst_39 = arith.constant dense<0.000000e+00> : vector<8x384xf32>
    %84 = tpu.matmul %77, %83, %cst_39 {dimension_numbers = #tpu.dot_dimension_numbers<[1], [0], [0], [1], [0, 0, 1, 1], [], []>} : vector<8x128xf32>, vector<128x384xf32>, vector<8x384xf32> -> vector<8x384xf32>
    %85 = vector.extract_strided_slice %82 {offsets = [0, 0], sizes = [8, 128], strides = [1, 1]} : vector<8x384xf32> to vector<8x128xf32>
    %86 = vector.extract_strided_slice %84 {offsets = [0, 0], sizes = [8, 128], strides = [1, 1]} : vector<8x384xf32> to vector<8x128xf32>
    %87 = arith.addf %85, %86 : vector<8x128xf32>
    %88 = arith.negf %87 : vector<8x128xf32>
    %89 = math.exp %88 : vector<8x128xf32>
    %cst_40 = arith.constant 1.000000e+00 : f32
    %90 = vector.broadcast %cst_40 : f32 to vector<8x128xf32>
    %91 = arith.addf %90, %89 : vector<8x128xf32>
    %92 = arith.divf %90, %91 : vector<8x128xf32>
    %93 = vector.extract_strided_slice %82 {offsets = [0, 128], sizes = [8, 128], strides = [1, 1]} : vector<8x384xf32> to vector<8x128xf32>
    %94 = vector.extract_strided_slice %84 {offsets = [0, 128], sizes = [8, 128], strides = [1, 1]} : vector<8x384xf32> to vector<8x128xf32>
    %95 = arith.addf %93, %94 : vector<8x128xf32>
    %96 = arith.negf %95 : vector<8x128xf32>
    %97 = math.exp %96 : vector<8x128xf32>
    %cst_41 = arith.constant 1.000000e+00 : f32
    %98 = vector.broadcast %cst_41 : f32 to vector<8x128xf32>
    %99 = arith.addf %98, %97 : vector<8x128xf32>
    %100 = arith.divf %98, %99 : vector<8x128xf32>
    %101 = vector.extract_strided_slice %82 {offsets = [0, 256], sizes = [8, 128], strides = [1, 1]} : vector<8x384xf32> to vector<8x128xf32>
    %102 = vector.extract_strided_slice %84 {offsets = [0, 256], sizes = [8, 128], strides = [1, 1]} : vector<8x384xf32> to vector<8x128xf32>
    %103 = arith.addf %102, %11 : vector<8x128xf32>
    %104 = arith.mulf %92, %103 : vector<8x128xf32>
    %105 = arith.addf %101, %104 : vector<8x128xf32>
    %106 = math.tanh %105 : vector<8x128xf32>
    %cst_42 = arith.constant 1.000000e+00 : f32
    %107 = vector.broadcast %cst_42 : f32 to vector<8x128xf32>
    %108 = arith.subf %107, %100 : vector<8x128xf32>
    %109 = arith.mulf %108, %106 : vector<8x128xf32>
    %110 = arith.mulf %100, %77 : vector<8x128xf32>
    %111 = arith.addf %109, %110 : vector<8x128xf32>
    %c2_43 = arith.constant 2 : index
    %c0_44 = arith.constant 0 : index
    %c0_45 = arith.constant 0 : index
    %112 = vector.load %arg14[%c2_43, %c0_44, %c0_45] : memref<8x8x128xf32, #tpu.memory_space<vmem>>, vector<1x8x128xf32>
    %113 = vector.shape_cast %112 : vector<1x8x128xf32> to vector<8x128xf32>
    %114 = vector.shape_cast %111 : vector<8x128xf32> to vector<1x8x128xf32>
    tpu.vector_store %arg14[%c2_43, %c0_44, %c0_45], %114 {strides = array<i32>} : memref<8x8x128xf32, #tpu.memory_space<vmem>>, vector<1x8x128xf32>,
    %c3 = arith.constant 3 : index
    %c0_46 = arith.constant 0 : index
    %c0_47 = arith.constant 0 : index
    %115 = vector.load %arg13[%c3, %c0_46, %c0_47] : memref<8x8x384xf32, #tpu.memory_space<vmem>>, vector<1x8x384xf32>
    %116 = vector.shape_cast %115 : vector<1x8x384xf32> to vector<8x384xf32>
    %c0_48 = arith.constant 0 : index
    %c0_49 = arith.constant 0 : index
    %117 = vector.load %arg3[%c0_48, %c0_49] : memref<128x384xf32, #tpu.memory_space<vmem>>, vector<128x384xf32>
    %cst_50 = arith.constant dense<0.000000e+00> : vector<8x384xf32>
    %118 = tpu.matmul %111, %117, %cst_50 {dimension_numbers = #tpu.dot_dimension_numbers<[1], [0], [0], [1], [0, 0, 1, 1], [], []>} : vector<8x128xf32>, vector<128x384xf32>, vector<8x384xf32> -> vector<8x384xf32>
    %119 = vector.extract_strided_slice %116 {offsets = [0, 0], sizes = [8, 128], strides = [1, 1]} : vector<8x384xf32> to vector<8x128xf32>
    %120 = vector.extract_strided_slice %118 {offsets = [0, 0], sizes = [8, 128], strides = [1, 1]} : vector<8x384xf32> to vector<8x128xf32>
    %121 = arith.addf %119, %120 : vector<8x128xf32>
    %122 = arith.negf %121 : vector<8x128xf32>
    %123 = math.exp %122 : vector<8x128xf32>
    %cst_51 = arith.constant 1.000000e+00 : f32
    %124 = vector.broadcast %cst_51 : f32 to vector<8x128xf32>
    %125 = arith.addf %124, %123 : vector<8x128xf32>
    %126 = arith.divf %124, %125 : vector<8x128xf32>
    %127 = vector.extract_strided_slice %116 {offsets = [0, 128], sizes = [8, 128], strides = [1, 1]} : vector<8x384xf32> to vector<8x128xf32>
    %128 = vector.extract_strided_slice %118 {offsets = [0, 128], sizes = [8, 128], strides = [1, 1]} : vector<8x384xf32> to vector<8x128xf32>
    %129 = arith.addf %127, %128 : vector<8x128xf32>
    %130 = arith.negf %129 : vector<8x128xf32>
    %131 = math.exp %130 : vector<8x128xf32>
    %cst_52 = arith.constant 1.000000e+00 : f32
    %132 = vector.broadcast %cst_52 : f32 to vector<8x128xf32>
    %133 = arith.addf %132, %131 : vector<8x128xf32>
    %134 = arith.divf %132, %133 : vector<8x128xf32>
    %135 = vector.extract_strided_slice %116 {offsets = [0, 256], sizes = [8, 128], strides = [1, 1]} : vector<8x384xf32> to vector<8x128xf32>
    %136 = vector.extract_strided_slice %118 {offsets = [0, 256], sizes = [8, 128], strides = [1, 1]} : vector<8x384xf32> to vector<8x128xf32>
    %137 = arith.addf %136, %11 : vector<8x128xf32>
    %138 = arith.mulf %126, %137 : vector<8x128xf32>
    %139 = arith.addf %135, %138 : vector<8x128xf32>
    %140 = math.tanh %139 : vector<8x128xf32>
    %cst_53 = arith.constant 1.000000e+00 : f32
    %141 = vector.broadcast %cst_53 : f32 to vector<8x128xf32>
    %142 = arith.subf %141, %134 : vector<8x128xf32>
    %143 = arith.mulf %142, %140 : vector<8x128xf32>
    %144 = arith.mulf %134, %111 : vector<8x128xf32>
    %145 = arith.addf %143, %144 : vector<8x128xf32>
    %c3_54 = arith.constant 3 : index
    %c0_55 = arith.constant 0 : index
    %c0_56 = arith.constant 0 : index
    %146 = vector.load %arg14[%c3_54, %c0_55, %c0_56] : memref<8x8x128xf32, #tpu.memory_space<vmem>>, vector<1x8x128xf32>
    %147 = vector.shape_cast %146 : vector<1x8x128xf32> to vector<8x128xf32>
    %148 = vector.shape_cast %145 : vector<8x128xf32> to vector<1x8x128xf32>
    tpu.vector_store %arg14[%c3_54, %c0_55, %c0_56], %148 {strides = array<i32>} : memref<8x8x128xf32, #tpu.memory_space<vmem>>, vector<1x8x128xf32>,
    %c4 = arith.constant 4 : index
    %c0_57 = arith.constant 0 : index
    %c0_58 = arith.constant 0 : index
    %149 = vector.load %arg13[%c4, %c0_57, %c0_58] : memref<8x8x384xf32, #tpu.memory_space<vmem>>, vector<1x8x384xf32>
    %150 = vector.shape_cast %149 : vector<1x8x384xf32> to vector<8x384xf32>
    %c0_59 = arith.constant 0 : index
    %c0_60 = arith.constant 0 : index
    %151 = vector.load %arg3[%c0_59, %c0_60] : memref<128x384xf32, #tpu.memory_space<vmem>>, vector<128x384xf32>
    %cst_61 = arith.constant dense<0.000000e+00> : vector<8x384xf32>
    %152 = tpu.matmul %145, %151, %cst_61 {dimension_numbers = #tpu.dot_dimension_numbers<[1], [0], [0], [1], [0, 0, 1, 1], [], []>} : vector<8x128xf32>, vector<128x384xf32>, vector<8x384xf32> -> vector<8x384xf32>
    %153 = vector.extract_strided_slice %150 {offsets = [0, 0], sizes = [8, 128], strides = [1, 1]} : vector<8x384xf32> to vector<8x128xf32>
    %154 = vector.extract_strided_slice %152 {offsets = [0, 0], sizes = [8, 128], strides = [1, 1]} : vector<8x384xf32> to vector<8x128xf32>
    %155 = arith.addf %153, %154 : vector<8x128xf32>
    %156 = arith.negf %155 : vector<8x128xf32>
    %157 = math.exp %156 : vector<8x128xf32>
    %cst_62 = arith.constant 1.000000e+00 : f32
    %158 = vector.broadcast %cst_62 : f32 to vector<8x128xf32>
    %159 = arith.addf %158, %157 : vector<8x128xf32>
    %160 = arith.divf %158, %159 : vector<8x128xf32>
    %161 = vector.extract_strided_slice %150 {offsets = [0, 128], sizes = [8, 128], strides = [1, 1]} : vector<8x384xf32> to vector<8x128xf32>
    %162 = vector.extract_strided_slice %152 {offsets = [0, 128], sizes = [8, 128], strides = [1, 1]} : vector<8x384xf32> to vector<8x128xf32>
    %163 = arith.addf %161, %162 : vector<8x128xf32>
    %164 = arith.negf %163 : vector<8x128xf32>
    %165 = math.exp %164 : vector<8x128xf32>
    %cst_63 = arith.constant 1.000000e+00 : f32
    %166 = vector.broadcast %cst_63 : f32 to vector<8x128xf32>
    %167 = arith.addf %166, %165 : vector<8x128xf32>
    %168 = arith.divf %166, %167 : vector<8x128xf32>
    %169 = vector.extract_strided_slice %150 {offsets = [0, 256], sizes = [8, 128], strides = [1, 1]} : vector<8x384xf32> to vector<8x128xf32>
    %170 = vector.extract_strided_slice %152 {offsets = [0, 256], sizes = [8, 128], strides = [1, 1]} : vector<8x384xf32> to vector<8x128xf32>
    %171 = arith.addf %170, %11 : vector<8x128xf32>
    %172 = arith.mulf %160, %171 : vector<8x128xf32>
    %173 = arith.addf %169, %172 : vector<8x128xf32>
    %174 = math.tanh %173 : vector<8x128xf32>
    %cst_64 = arith.constant 1.000000e+00 : f32
    %175 = vector.broadcast %cst_64 : f32 to vector<8x128xf32>
    %176 = arith.subf %175, %168 : vector<8x128xf32>
    %177 = arith.mulf %176, %174 : vector<8x128xf32>
    %178 = arith.mulf %168, %145 : vector<8x128xf32>
    %179 = arith.addf %177, %178 : vector<8x128xf32>
    %c4_65 = arith.constant 4 : index
    %c0_66 = arith.constant 0 : index
    %c0_67 = arith.constant 0 : index
    %180 = vector.load %arg14[%c4_65, %c0_66, %c0_67] : memref<8x8x128xf32, #tpu.memory_space<vmem>>, vector<1x8x128xf32>
    %181 = vector.shape_cast %180 : vector<1x8x128xf32> to vector<8x128xf32>
    %182 = vector.shape_cast %179 : vector<8x128xf32> to vector<1x8x128xf32>
    tpu.vector_store %arg14[%c4_65, %c0_66, %c0_67], %182 {strides = array<i32>} : memref<8x8x128xf32, #tpu.memory_space<vmem>>, vector<1x8x128xf32>,
    %c5 = arith.constant 5 : index
    %c0_68 = arith.constant 0 : index
    %c0_69 = arith.constant 0 : index
    %183 = vector.load %arg13[%c5, %c0_68, %c0_69] : memref<8x8x384xf32, #tpu.memory_space<vmem>>, vector<1x8x384xf32>
    %184 = vector.shape_cast %183 : vector<1x8x384xf32> to vector<8x384xf32>
    %c0_70 = arith.constant 0 : index
    %c0_71 = arith.constant 0 : index
    %185 = vector.load %arg3[%c0_70, %c0_71] : memref<128x384xf32, #tpu.memory_space<vmem>>, vector<128x384xf32>
    %cst_72 = arith.constant dense<0.000000e+00> : vector<8x384xf32>
    %186 = tpu.matmul %179, %185, %cst_72 {dimension_numbers = #tpu.dot_dimension_numbers<[1], [0], [0], [1], [0, 0, 1, 1], [], []>} : vector<8x128xf32>, vector<128x384xf32>, vector<8x384xf32> -> vector<8x384xf32>
    %187 = vector.extract_strided_slice %184 {offsets = [0, 0], sizes = [8, 128], strides = [1, 1]} : vector<8x384xf32> to vector<8x128xf32>
    %188 = vector.extract_strided_slice %186 {offsets = [0, 0], sizes = [8, 128], strides = [1, 1]} : vector<8x384xf32> to vector<8x128xf32>
    %189 = arith.addf %187, %188 : vector<8x128xf32>
    %190 = arith.negf %189 : vector<8x128xf32>
    %191 = math.exp %190 : vector<8x128xf32>
    %cst_73 = arith.constant 1.000000e+00 : f32
    %192 = vector.broadcast %cst_73 : f32 to vector<8x128xf32>
    %193 = arith.addf %192, %191 : vector<8x128xf32>
    %194 = arith.divf %192, %193 : vector<8x128xf32>
    %195 = vector.extract_strided_slice %184 {offsets = [0, 128], sizes = [8, 128], strides = [1, 1]} : vector<8x384xf32> to vector<8x128xf32>
    %196 = vector.extract_strided_slice %186 {offsets = [0, 128], sizes = [8, 128], strides = [1, 1]} : vector<8x384xf32> to vector<8x128xf32>
    %197 = arith.addf %195, %196 : vector<8x128xf32>
    %198 = arith.negf %197 : vector<8x128xf32>
    %199 = math.exp %198 : vector<8x128xf32>
    %cst_74 = arith.constant 1.000000e+00 : f32
    %200 = vector.broadcast %cst_74 : f32 to vector<8x128xf32>
    %201 = arith.addf %200, %199 : vector<8x128xf32>
    %202 = arith.divf %200, %201 : vector<8x128xf32>
    %203 = vector.extract_strided_slice %184 {offsets = [0, 256], sizes = [8, 128], strides = [1, 1]} : vector<8x384xf32> to vector<8x128xf32>
    %204 = vector.extract_strided_slice %186 {offsets = [0, 256], sizes = [8, 128], strides = [1, 1]} : vector<8x384xf32> to vector<8x128xf32>
    %205 = arith.addf %204, %11 : vector<8x128xf32>
    %206 = arith.mulf %194, %205 : vector<8x128xf32>
    %207 = arith.addf %203, %206 : vector<8x128xf32>
    %208 = math.tanh %207 : vector<8x128xf32>
    %cst_75 = arith.constant 1.000000e+00 : f32
    %209 = vector.broadcast %cst_75 : f32 to vector<8x128xf32>
    %210 = arith.subf %209, %202 : vector<8x128xf32>
    %211 = arith.mulf %210, %208 : vector<8x128xf32>
    %212 = arith.mulf %202, %179 : vector<8x128xf32>
    %213 = arith.addf %211, %212 : vector<8x128xf32>
    %c5_76 = arith.constant 5 : index
    %c0_77 = arith.constant 0 : index
    %c0_78 = arith.constant 0 : index
    %214 = vector.load %arg14[%c5_76, %c0_77, %c0_78] : memref<8x8x128xf32, #tpu.memory_space<vmem>>, vector<1x8x128xf32>
    %215 = vector.shape_cast %214 : vector<1x8x128xf32> to vector<8x128xf32>
    %216 = vector.shape_cast %213 : vector<8x128xf32> to vector<1x8x128xf32>
    tpu.vector_store %arg14[%c5_76, %c0_77, %c0_78], %216 {strides = array<i32>} : memref<8x8x128xf32, #tpu.memory_space<vmem>>, vector<1x8x128xf32>,
    %c6 = arith.constant 6 : index
    %c0_79 = arith.constant 0 : index
    %c0_80 = arith.constant 0 : index
    %217 = vector.load %arg13[%c6, %c0_79, %c0_80] : memref<8x8x384xf32, #tpu.memory_space<vmem>>, vector<1x8x384xf32>
    %218 = vector.shape_cast %217 : vector<1x8x384xf32> to vector<8x384xf32>
    %c0_81 = arith.constant 0 : index
    %c0_82 = arith.constant 0 : index
    %219 = vector.load %arg3[%c0_81, %c0_82] : memref<128x384xf32, #tpu.memory_space<vmem>>, vector<128x384xf32>
    %cst_83 = arith.constant dense<0.000000e+00> : vector<8x384xf32>
    %220 = tpu.matmul %213, %219, %cst_83 {dimension_numbers = #tpu.dot_dimension_numbers<[1], [0], [0], [1], [0, 0, 1, 1], [], []>} : vector<8x128xf32>, vector<128x384xf32>, vector<8x384xf32> -> vector<8x384xf32>
    %221 = vector.extract_strided_slice %218 {offsets = [0, 0], sizes = [8, 128], strides = [1, 1]} : vector<8x384xf32> to vector<8x128xf32>
    %222 = vector.extract_strided_slice %220 {offsets = [0, 0], sizes = [8, 128], strides = [1, 1]} : vector<8x384xf32> to vector<8x128xf32>
    %223 = arith.addf %221, %222 : vector<8x128xf32>
    %224 = arith.negf %223 : vector<8x128xf32>
    %225 = math.exp %224 : vector<8x128xf32>
    %cst_84 = arith.constant 1.000000e+00 : f32
    %226 = vector.broadcast %cst_84 : f32 to vector<8x128xf32>
    %227 = arith.addf %226, %225 : vector<8x128xf32>
    %228 = arith.divf %226, %227 : vector<8x128xf32>
    %229 = vector.extract_strided_slice %218 {offsets = [0, 128], sizes = [8, 128], strides = [1, 1]} : vector<8x384xf32> to vector<8x128xf32>
    %230 = vector.extract_strided_slice %220 {offsets = [0, 128], sizes = [8, 128], strides = [1, 1]} : vector<8x384xf32> to vector<8x128xf32>
    %231 = arith.addf %229, %230 : vector<8x128xf32>
    %232 = arith.negf %231 : vector<8x128xf32>
    %233 = math.exp %232 : vector<8x128xf32>
    %cst_85 = arith.constant 1.000000e+00 : f32
    %234 = vector.broadcast %cst_85 : f32 to vector<8x128xf32>
    %235 = arith.addf %234, %233 : vector<8x128xf32>
    %236 = arith.divf %234, %235 : vector<8x128xf32>
    %237 = vector.extract_strided_slice %218 {offsets = [0, 256], sizes = [8, 128], strides = [1, 1]} : vector<8x384xf32> to vector<8x128xf32>
    %238 = vector.extract_strided_slice %220 {offsets = [0, 256], sizes = [8, 128], strides = [1, 1]} : vector<8x384xf32> to vector<8x128xf32>
    %239 = arith.addf %238, %11 : vector<8x128xf32>
    %240 = arith.mulf %228, %239 : vector<8x128xf32>
    %241 = arith.addf %237, %240 : vector<8x128xf32>
    %242 = math.tanh %241 : vector<8x128xf32>
    %cst_86 = arith.constant 1.000000e+00 : f32
    %243 = vector.broadcast %cst_86 : f32 to vector<8x128xf32>
    %244 = arith.subf %243, %236 : vector<8x128xf32>
    %245 = arith.mulf %244, %242 : vector<8x128xf32>
    %246 = arith.mulf %236, %213 : vector<8x128xf32>
    %247 = arith.addf %245, %246 : vector<8x128xf32>
    %c6_87 = arith.constant 6 : index
    %c0_88 = arith.constant 0 : index
    %c0_89 = arith.constant 0 : index
    %248 = vector.load %arg14[%c6_87, %c0_88, %c0_89] : memref<8x8x128xf32, #tpu.memory_space<vmem>>, vector<1x8x128xf32>
    %249 = vector.shape_cast %248 : vector<1x8x128xf32> to vector<8x128xf32>
    %250 = vector.shape_cast %247 : vector<8x128xf32> to vector<1x8x128xf32>
    tpu.vector_store %arg14[%c6_87, %c0_88, %c0_89], %250 {strides = array<i32>} : memref<8x8x128xf32, #tpu.memory_space<vmem>>, vector<1x8x128xf32>,
    %c7 = arith.constant 7 : index
    %c0_90 = arith.constant 0 : index
    %c0_91 = arith.constant 0 : index
    %251 = vector.load %arg13[%c7, %c0_90, %c0_91] : memref<8x8x384xf32, #tpu.memory_space<vmem>>, vector<1x8x384xf32>
    %252 = vector.shape_cast %251 : vector<1x8x384xf32> to vector<8x384xf32>
    %c0_92 = arith.constant 0 : index
    %c0_93 = arith.constant 0 : index
    %253 = vector.load %arg3[%c0_92, %c0_93] : memref<128x384xf32, #tpu.memory_space<vmem>>, vector<128x384xf32>
    %cst_94 = arith.constant dense<0.000000e+00> : vector<8x384xf32>
    %254 = tpu.matmul %247, %253, %cst_94 {dimension_numbers = #tpu.dot_dimension_numbers<[1], [0], [0], [1], [0, 0, 1, 1], [], []>} : vector<8x128xf32>, vector<128x384xf32>, vector<8x384xf32> -> vector<8x384xf32>
    %255 = vector.extract_strided_slice %252 {offsets = [0, 0], sizes = [8, 128], strides = [1, 1]} : vector<8x384xf32> to vector<8x128xf32>
    %256 = vector.extract_strided_slice %254 {offsets = [0, 0], sizes = [8, 128], strides = [1, 1]} : vector<8x384xf32> to vector<8x128xf32>
    %257 = arith.addf %255, %256 : vector<8x128xf32>
    %258 = arith.negf %257 : vector<8x128xf32>
    %259 = math.exp %258 : vector<8x128xf32>
    %cst_95 = arith.constant 1.000000e+00 : f32
    %260 = vector.broadcast %cst_95 : f32 to vector<8x128xf32>
    %261 = arith.addf %260, %259 : vector<8x128xf32>
    %262 = arith.divf %260, %261 : vector<8x128xf32>
    %263 = vector.extract_strided_slice %252 {offsets = [0, 128], sizes = [8, 128], strides = [1, 1]} : vector<8x384xf32> to vector<8x128xf32>
    %264 = vector.extract_strided_slice %254 {offsets = [0, 128], sizes = [8, 128], strides = [1, 1]} : vector<8x384xf32> to vector<8x128xf32>
    %265 = arith.addf %263, %264 : vector<8x128xf32>
    %266 = arith.negf %265 : vector<8x128xf32>
    %267 = math.exp %266 : vector<8x128xf32>
    %cst_96 = arith.constant 1.000000e+00 : f32
    %268 = vector.broadcast %cst_96 : f32 to vector<8x128xf32>
    %269 = arith.addf %268, %267 : vector<8x128xf32>
    %270 = arith.divf %268, %269 : vector<8x128xf32>
    %271 = vector.extract_strided_slice %252 {offsets = [0, 256], sizes = [8, 128], strides = [1, 1]} : vector<8x384xf32> to vector<8x128xf32>
    %272 = vector.extract_strided_slice %254 {offsets = [0, 256], sizes = [8, 128], strides = [1, 1]} : vector<8x384xf32> to vector<8x128xf32>
    %273 = arith.addf %272, %11 : vector<8x128xf32>
    %274 = arith.mulf %262, %273 : vector<8x128xf32>
    %275 = arith.addf %271, %274 : vector<8x128xf32>
    %276 = math.tanh %275 : vector<8x128xf32>
    %cst_97 = arith.constant 1.000000e+00 : f32
    %277 = vector.broadcast %cst_97 : f32 to vector<8x128xf32>
    %278 = arith.subf %277, %270 : vector<8x128xf32>
    %279 = arith.mulf %278, %276 : vector<8x128xf32>
    %280 = arith.mulf %270, %247 : vector<8x128xf32>
    %281 = arith.addf %279, %280 : vector<8x128xf32>
    %c7_98 = arith.constant 7 : index
    %c0_99 = arith.constant 0 : index
    %c0_100 = arith.constant 0 : index
    %282 = vector.load %arg14[%c7_98, %c0_99, %c0_100] : memref<8x8x128xf32, #tpu.memory_space<vmem>>, vector<1x8x128xf32>
    %283 = vector.shape_cast %282 : vector<1x8x128xf32> to vector<8x128xf32>
    %284 = vector.shape_cast %281 : vector<8x128xf32> to vector<1x8x128xf32>
    tpu.vector_store %arg14[%c7_98, %c0_99, %c0_100], %284 {strides = array<i32>} : memref<8x8x128xf32, #tpu.memory_space<vmem>>, vector<1x8x128xf32>,
    %c0_101 = arith.constant 0 : index
    %c0_102 = arith.constant 0 : index
    %c0_103 = arith.constant 0 : index
    %285 = vector.load %arg14[%c0_101, %c0_102, %c0_103] : memref<8x8x128xf32, #tpu.memory_space<vmem>>, vector<8x8x128xf32>
    %286 = vector.shape_cast %285 : vector<8x8x128xf32> to vector<64x128xf32>
    %c0_104 = arith.constant 0 : index
    %c0_105 = arith.constant 0 : index
    %287 = vector.load %arg6[%c0_104, %c0_105] : memref<128x384xf32, #tpu.memory_space<vmem>>, vector<128x384xf32>
    %cst_106 = arith.constant dense<0.000000e+00> : vector<64x384xf32>
    %288 = tpu.matmul %286, %287, %cst_106 {dimension_numbers = #tpu.dot_dimension_numbers<[1], [0], [0], [1], [0, 0, 1, 1], [], []>} : vector<64x128xf32>, vector<128x384xf32>, vector<64x384xf32> -> vector<64x384xf32>
    %c0_107 = arith.constant 0 : index
    %c0_108 = arith.constant 0 : index
    %289 = vector.load %arg8[%c0_107, %c0_108] : memref<1x384xf32, #tpu.memory_space<vmem>>, vector<1x384xf32>
    %290 = vector.broadcast %289 : vector<1x384xf32> to vector<64x384xf32>
    %291 = arith.addf %288, %290 : vector<64x384xf32>
    %292 = vector.shape_cast %291 : vector<64x384xf32> to vector<8x8x384xf32>
    %c0_109 = arith.constant 0 : index
    %c0_110 = arith.constant 0 : index
    %c0_111 = arith.constant 0 : index
    %293 = vector.load %arg13[%c0_109, %c0_110, %c0_111] : memref<8x8x384xf32, #tpu.memory_space<vmem>>, vector<8x8x384xf32>
    tpu.vector_store %arg13[%c0_109, %c0_110, %c0_111], %292 {strides = array<i32>} : memref<8x8x384xf32, #tpu.memory_space<vmem>>, vector<8x8x384xf32>,
    %c0_112 = arith.constant 0 : index
    %c0_113 = arith.constant 0 : index
    %294 = vector.load %arg9[%c0_112, %c0_113] : memref<1x128xf32, #tpu.memory_space<vmem>>, vector<1x128xf32>
    %295 = vector.shape_cast %294 : vector<1x128xf32> to vector<1x128xf32>
    %296 = vector.broadcast %295 : vector<1x128xf32> to vector<8x128xf32>
    %cst_114 = arith.constant 0.000000e+00 : f32
    %297 = vector.broadcast %cst_114 : f32 to vector<8x128xf32>
    %c0_115 = arith.constant 0 : index
    %c0_116 = arith.constant 0 : index
    %c0_117 = arith.constant 0 : index
    %298 = vector.load %arg13[%c0_115, %c0_116, %c0_117] : memref<8x8x384xf32, #tpu.memory_space<vmem>>, vector<1x8x384xf32>
    %299 = vector.shape_cast %298 : vector<1x8x384xf32> to vector<8x384xf32>
    %c0_118 = arith.constant 0 : index
    %c0_119 = arith.constant 0 : index
    %300 = vector.load %arg7[%c0_118, %c0_119] : memref<128x384xf32, #tpu.memory_space<vmem>>, vector<128x384xf32>
    %cst_120 = arith.constant dense<0.000000e+00> : vector<8x384xf32>
    %301 = tpu.matmul %297, %300, %cst_120 {dimension_numbers = #tpu.dot_dimension_numbers<[1], [0], [0], [1], [0, 0, 1, 1], [], []>} : vector<8x128xf32>, vector<128x384xf32>, vector<8x384xf32> -> vector<8x384xf32>
    %302 = vector.extract_strided_slice %299 {offsets = [0, 0], sizes = [8, 128], strides = [1, 1]} : vector<8x384xf32> to vector<8x128xf32>
    %303 = vector.extract_strided_slice %301 {offsets = [0, 0], sizes = [8, 128], strides = [1, 1]} : vector<8x384xf32> to vector<8x128xf32>
    %304 = arith.addf %302, %303 : vector<8x128xf32>
    %305 = arith.negf %304 : vector<8x128xf32>
    %306 = math.exp %305 : vector<8x128xf32>
    %cst_121 = arith.constant 1.000000e+00 : f32
    %307 = vector.broadcast %cst_121 : f32 to vector<8x128xf32>
    %308 = arith.addf %307, %306 : vector<8x128xf32>
    %309 = arith.divf %307, %308 : vector<8x128xf32>
    %310 = vector.extract_strided_slice %299 {offsets = [0, 128], sizes = [8, 128], strides = [1, 1]} : vector<8x384xf32> to vector<8x128xf32>
    %311 = vector.extract_strided_slice %301 {offsets = [0, 128], sizes = [8, 128], strides = [1, 1]} : vector<8x384xf32> to vector<8x128xf32>
    %312 = arith.addf %310, %311 : vector<8x128xf32>
    %313 = arith.negf %312 : vector<8x128xf32>
    %314 = math.exp %313 : vector<8x128xf32>
    %cst_122 = arith.constant 1.000000e+00 : f32
    %315 = vector.broadcast %cst_122 : f32 to vector<8x128xf32>
    %316 = arith.addf %315, %314 : vector<8x128xf32>
    %317 = arith.divf %315, %316 : vector<8x128xf32>
    %318 = vector.extract_strided_slice %299 {offsets = [0, 256], sizes = [8, 128], strides = [1, 1]} : vector<8x384xf32> to vector<8x128xf32>
    %319 = vector.extract_strided_slice %301 {offsets = [0, 256], sizes = [8, 128], strides = [1, 1]} : vector<8x384xf32> to vector<8x128xf32>
    %320 = arith.addf %319, %296 : vector<8x128xf32>
    %321 = arith.mulf %309, %320 : vector<8x128xf32>
    %322 = arith.addf %318, %321 : vector<8x128xf32>
    %323 = math.tanh %322 : vector<8x128xf32>
    %cst_123 = arith.constant 1.000000e+00 : f32
    %324 = vector.broadcast %cst_123 : f32 to vector<8x128xf32>
    %325 = arith.subf %324, %317 : vector<8x128xf32>
    %326 = arith.mulf %325, %323 : vector<8x128xf32>
    %327 = arith.mulf %317, %297 : vector<8x128xf32>
    %328 = arith.addf %326, %327 : vector<8x128xf32>
    %c1_124 = arith.constant 1 : index
    %c0_125 = arith.constant 0 : index
    %c0_126 = arith.constant 0 : index
    %329 = vector.load %arg13[%c1_124, %c0_125, %c0_126] : memref<8x8x384xf32, #tpu.memory_space<vmem>>, vector<1x8x384xf32>
    %330 = vector.shape_cast %329 : vector<1x8x384xf32> to vector<8x384xf32>
    %c0_127 = arith.constant 0 : index
    %c0_128 = arith.constant 0 : index
    %331 = vector.load %arg7[%c0_127, %c0_128] : memref<128x384xf32, #tpu.memory_space<vmem>>, vector<128x384xf32>
    %cst_129 = arith.constant dense<0.000000e+00> : vector<8x384xf32>
    %332 = tpu.matmul %328, %331, %cst_129 {dimension_numbers = #tpu.dot_dimension_numbers<[1], [0], [0], [1], [0, 0, 1, 1], [], []>} : vector<8x128xf32>, vector<128x384xf32>, vector<8x384xf32> -> vector<8x384xf32>
    %333 = vector.extract_strided_slice %330 {offsets = [0, 0], sizes = [8, 128], strides = [1, 1]} : vector<8x384xf32> to vector<8x128xf32>
    %334 = vector.extract_strided_slice %332 {offsets = [0, 0], sizes = [8, 128], strides = [1, 1]} : vector<8x384xf32> to vector<8x128xf32>
    %335 = arith.addf %333, %334 : vector<8x128xf32>
    %336 = arith.negf %335 : vector<8x128xf32>
    %337 = math.exp %336 : vector<8x128xf32>
    %cst_130 = arith.constant 1.000000e+00 : f32
    %338 = vector.broadcast %cst_130 : f32 to vector<8x128xf32>
    %339 = arith.addf %338, %337 : vector<8x128xf32>
    %340 = arith.divf %338, %339 : vector<8x128xf32>
    %341 = vector.extract_strided_slice %330 {offsets = [0, 128], sizes = [8, 128], strides = [1, 1]} : vector<8x384xf32> to vector<8x128xf32>
    %342 = vector.extract_strided_slice %332 {offsets = [0, 128], sizes = [8, 128], strides = [1, 1]} : vector<8x384xf32> to vector<8x128xf32>
    %343 = arith.addf %341, %342 : vector<8x128xf32>
    %344 = arith.negf %343 : vector<8x128xf32>
    %345 = math.exp %344 : vector<8x128xf32>
    %cst_131 = arith.constant 1.000000e+00 : f32
    %346 = vector.broadcast %cst_131 : f32 to vector<8x128xf32>
    %347 = arith.addf %346, %345 : vector<8x128xf32>
    %348 = arith.divf %346, %347 : vector<8x128xf32>
    %349 = vector.extract_strided_slice %330 {offsets = [0, 256], sizes = [8, 128], strides = [1, 1]} : vector<8x384xf32> to vector<8x128xf32>
    %350 = vector.extract_strided_slice %332 {offsets = [0, 256], sizes = [8, 128], strides = [1, 1]} : vector<8x384xf32> to vector<8x128xf32>
    %351 = arith.addf %350, %296 : vector<8x128xf32>
    %352 = arith.mulf %340, %351 : vector<8x128xf32>
    %353 = arith.addf %349, %352 : vector<8x128xf32>
    %354 = math.tanh %353 : vector<8x128xf32>
    %cst_132 = arith.constant 1.000000e+00 : f32
    %355 = vector.broadcast %cst_132 : f32 to vector<8x128xf32>
    %356 = arith.subf %355, %348 : vector<8x128xf32>
    %357 = arith.mulf %356, %354 : vector<8x128xf32>
    %358 = arith.mulf %348, %328 : vector<8x128xf32>
    %359 = arith.addf %357, %358 : vector<8x128xf32>
    %c2_133 = arith.constant 2 : index
    %c0_134 = arith.constant 0 : index
    %c0_135 = arith.constant 0 : index
    %360 = vector.load %arg13[%c2_133, %c0_134, %c0_135] : memref<8x8x384xf32, #tpu.memory_space<vmem>>, vector<1x8x384xf32>
    %361 = vector.shape_cast %360 : vector<1x8x384xf32> to vector<8x384xf32>
    %c0_136 = arith.constant 0 : index
    %c0_137 = arith.constant 0 : index
    %362 = vector.load %arg7[%c0_136, %c0_137] : memref<128x384xf32, #tpu.memory_space<vmem>>, vector<128x384xf32>
    %cst_138 = arith.constant dense<0.000000e+00> : vector<8x384xf32>
    %363 = tpu.matmul %359, %362, %cst_138 {dimension_numbers = #tpu.dot_dimension_numbers<[1], [0], [0], [1], [0, 0, 1, 1], [], []>} : vector<8x128xf32>, vector<128x384xf32>, vector<8x384xf32> -> vector<8x384xf32>
    %364 = vector.extract_strided_slice %361 {offsets = [0, 0], sizes = [8, 128], strides = [1, 1]} : vector<8x384xf32> to vector<8x128xf32>
    %365 = vector.extract_strided_slice %363 {offsets = [0, 0], sizes = [8, 128], strides = [1, 1]} : vector<8x384xf32> to vector<8x128xf32>
    %366 = arith.addf %364, %365 : vector<8x128xf32>
    %367 = arith.negf %366 : vector<8x128xf32>
    %368 = math.exp %367 : vector<8x128xf32>
    %cst_139 = arith.constant 1.000000e+00 : f32
    %369 = vector.broadcast %cst_139 : f32 to vector<8x128xf32>
    %370 = arith.addf %369, %368 : vector<8x128xf32>
    %371 = arith.divf %369, %370 : vector<8x128xf32>
    %372 = vector.extract_strided_slice %361 {offsets = [0, 128], sizes = [8, 128], strides = [1, 1]} : vector<8x384xf32> to vector<8x128xf32>
    %373 = vector.extract_strided_slice %363 {offsets = [0, 128], sizes = [8, 128], strides = [1, 1]} : vector<8x384xf32> to vector<8x128xf32>
    %374 = arith.addf %372, %373 : vector<8x128xf32>
    %375 = arith.negf %374 : vector<8x128xf32>
    %376 = math.exp %375 : vector<8x128xf32>
    %cst_140 = arith.constant 1.000000e+00 : f32
    %377 = vector.broadcast %cst_140 : f32 to vector<8x128xf32>
    %378 = arith.addf %377, %376 : vector<8x128xf32>
    %379 = arith.divf %377, %378 : vector<8x128xf32>
    %380 = vector.extract_strided_slice %361 {offsets = [0, 256], sizes = [8, 128], strides = [1, 1]} : vector<8x384xf32> to vector<8x128xf32>
    %381 = vector.extract_strided_slice %363 {offsets = [0, 256], sizes = [8, 128], strides = [1, 1]} : vector<8x384xf32> to vector<8x128xf32>
    %382 = arith.addf %381, %296 : vector<8x128xf32>
    %383 = arith.mulf %371, %382 : vector<8x128xf32>
    %384 = arith.addf %380, %383 : vector<8x128xf32>
    %385 = math.tanh %384 : vector<8x128xf32>
    %cst_141 = arith.constant 1.000000e+00 : f32
    %386 = vector.broadcast %cst_141 : f32 to vector<8x128xf32>
    %387 = arith.subf %386, %379 : vector<8x128xf32>
    %388 = arith.mulf %387, %385 : vector<8x128xf32>
    %389 = arith.mulf %379, %359 : vector<8x128xf32>
    %390 = arith.addf %388, %389 : vector<8x128xf32>
    %c3_142 = arith.constant 3 : index
    %c0_143 = arith.constant 0 : index
    %c0_144 = arith.constant 0 : index
    %391 = vector.load %arg13[%c3_142, %c0_143, %c0_144] : memref<8x8x384xf32, #tpu.memory_space<vmem>>, vector<1x8x384xf32>
    %392 = vector.shape_cast %391 : vector<1x8x384xf32> to vector<8x384xf32>
    %c0_145 = arith.constant 0 : index
    %c0_146 = arith.constant 0 : index
    %393 = vector.load %arg7[%c0_145, %c0_146] : memref<128x384xf32, #tpu.memory_space<vmem>>, vector<128x384xf32>
    %cst_147 = arith.constant dense<0.000000e+00> : vector<8x384xf32>
    %394 = tpu.matmul %390, %393, %cst_147 {dimension_numbers = #tpu.dot_dimension_numbers<[1], [0], [0], [1], [0, 0, 1, 1], [], []>} : vector<8x128xf32>, vector<128x384xf32>, vector<8x384xf32> -> vector<8x384xf32>
    %395 = vector.extract_strided_slice %392 {offsets = [0, 0], sizes = [8, 128], strides = [1, 1]} : vector<8x384xf32> to vector<8x128xf32>
    %396 = vector.extract_strided_slice %394 {offsets = [0, 0], sizes = [8, 128], strides = [1, 1]} : vector<8x384xf32> to vector<8x128xf32>
    %397 = arith.addf %395, %396 : vector<8x128xf32>
    %398 = arith.negf %397 : vector<8x128xf32>
    %399 = math.exp %398 : vector<8x128xf32>
    %cst_148 = arith.constant 1.000000e+00 : f32
    %400 = vector.broadcast %cst_148 : f32 to vector<8x128xf32>
    %401 = arith.addf %400, %399 : vector<8x128xf32>
    %402 = arith.divf %400, %401 : vector<8x128xf32>
    %403 = vector.extract_strided_slice %392 {offsets = [0, 128], sizes = [8, 128], strides = [1, 1]} : vector<8x384xf32> to vector<8x128xf32>
    %404 = vector.extract_strided_slice %394 {offsets = [0, 128], sizes = [8, 128], strides = [1, 1]} : vector<8x384xf32> to vector<8x128xf32>
    %405 = arith.addf %403, %404 : vector<8x128xf32>
    %406 = arith.negf %405 : vector<8x128xf32>
    %407 = math.exp %406 : vector<8x128xf32>
    %cst_149 = arith.constant 1.000000e+00 : f32
    %408 = vector.broadcast %cst_149 : f32 to vector<8x128xf32>
    %409 = arith.addf %408, %407 : vector<8x128xf32>
    %410 = arith.divf %408, %409 : vector<8x128xf32>
    %411 = vector.extract_strided_slice %392 {offsets = [0, 256], sizes = [8, 128], strides = [1, 1]} : vector<8x384xf32> to vector<8x128xf32>
    %412 = vector.extract_strided_slice %394 {offsets = [0, 256], sizes = [8, 128], strides = [1, 1]} : vector<8x384xf32> to vector<8x128xf32>
    %413 = arith.addf %412, %296 : vector<8x128xf32>
    %414 = arith.mulf %402, %413 : vector<8x128xf32>
    %415 = arith.addf %411, %414 : vector<8x128xf32>
    %416 = math.tanh %415 : vector<8x128xf32>
    %cst_150 = arith.constant 1.000000e+00 : f32
    %417 = vector.broadcast %cst_150 : f32 to vector<8x128xf32>
    %418 = arith.subf %417, %410 : vector<8x128xf32>
    %419 = arith.mulf %418, %416 : vector<8x128xf32>
    %420 = arith.mulf %410, %390 : vector<8x128xf32>
    %421 = arith.addf %419, %420 : vector<8x128xf32>
    %c4_151 = arith.constant 4 : index
    %c0_152 = arith.constant 0 : index
    %c0_153 = arith.constant 0 : index
    %422 = vector.load %arg13[%c4_151, %c0_152, %c0_153] : memref<8x8x384xf32, #tpu.memory_space<vmem>>, vector<1x8x384xf32>
    %423 = vector.shape_cast %422 : vector<1x8x384xf32> to vector<8x384xf32>
    %c0_154 = arith.constant 0 : index
    %c0_155 = arith.constant 0 : index
    %424 = vector.load %arg7[%c0_154, %c0_155] : memref<128x384xf32, #tpu.memory_space<vmem>>, vector<128x384xf32>
    %cst_156 = arith.constant dense<0.000000e+00> : vector<8x384xf32>
    %425 = tpu.matmul %421, %424, %cst_156 {dimension_numbers = #tpu.dot_dimension_numbers<[1], [0], [0], [1], [0, 0, 1, 1], [], []>} : vector<8x128xf32>, vector<128x384xf32>, vector<8x384xf32> -> vector<8x384xf32>
    %426 = vector.extract_strided_slice %423 {offsets = [0, 0], sizes = [8, 128], strides = [1, 1]} : vector<8x384xf32> to vector<8x128xf32>
    %427 = vector.extract_strided_slice %425 {offsets = [0, 0], sizes = [8, 128], strides = [1, 1]} : vector<8x384xf32> to vector<8x128xf32>
    %428 = arith.addf %426, %427 : vector<8x128xf32>
    %429 = arith.negf %428 : vector<8x128xf32>
    %430 = math.exp %429 : vector<8x128xf32>
    %cst_157 = arith.constant 1.000000e+00 : f32
    %431 = vector.broadcast %cst_157 : f32 to vector<8x128xf32>
    %432 = arith.addf %431, %430 : vector<8x128xf32>
    %433 = arith.divf %431, %432 : vector<8x128xf32>
    %434 = vector.extract_strided_slice %423 {offsets = [0, 128], sizes = [8, 128], strides = [1, 1]} : vector<8x384xf32> to vector<8x128xf32>
    %435 = vector.extract_strided_slice %425 {offsets = [0, 128], sizes = [8, 128], strides = [1, 1]} : vector<8x384xf32> to vector<8x128xf32>
    %436 = arith.addf %434, %435 : vector<8x128xf32>
    %437 = arith.negf %436 : vector<8x128xf32>
    %438 = math.exp %437 : vector<8x128xf32>
    %cst_158 = arith.constant 1.000000e+00 : f32
    %439 = vector.broadcast %cst_158 : f32 to vector<8x128xf32>
    %440 = arith.addf %439, %438 : vector<8x128xf32>
    %441 = arith.divf %439, %440 : vector<8x128xf32>
    %442 = vector.extract_strided_slice %423 {offsets = [0, 256], sizes = [8, 128], strides = [1, 1]} : vector<8x384xf32> to vector<8x128xf32>
    %443 = vector.extract_strided_slice %425 {offsets = [0, 256], sizes = [8, 128], strides = [1, 1]} : vector<8x384xf32> to vector<8x128xf32>
    %444 = arith.addf %443, %296 : vector<8x128xf32>
    %445 = arith.mulf %433, %444 : vector<8x128xf32>
    %446 = arith.addf %442, %445 : vector<8x128xf32>
    %447 = math.tanh %446 : vector<8x128xf32>
    %cst_159 = arith.constant 1.000000e+00 : f32
    %448 = vector.broadcast %cst_159 : f32 to vector<8x128xf32>
    %449 = arith.subf %448, %441 : vector<8x128xf32>
    %450 = arith.mulf %449, %447 : vector<8x128xf32>
    %451 = arith.mulf %441, %421 : vector<8x128xf32>
    %452 = arith.addf %450, %451 : vector<8x128xf32>
    %c5_160 = arith.constant 5 : index
    %c0_161 = arith.constant 0 : index
    %c0_162 = arith.constant 0 : index
    %453 = vector.load %arg13[%c5_160, %c0_161, %c0_162] : memref<8x8x384xf32, #tpu.memory_space<vmem>>, vector<1x8x384xf32>
    %454 = vector.shape_cast %453 : vector<1x8x384xf32> to vector<8x384xf32>
    %c0_163 = arith.constant 0 : index
    %c0_164 = arith.constant 0 : index
    %455 = vector.load %arg7[%c0_163, %c0_164] : memref<128x384xf32, #tpu.memory_space<vmem>>, vector<128x384xf32>
    %cst_165 = arith.constant dense<0.000000e+00> : vector<8x384xf32>
    %456 = tpu.matmul %452, %455, %cst_165 {dimension_numbers = #tpu.dot_dimension_numbers<[1], [0], [0], [1], [0, 0, 1, 1], [], []>} : vector<8x128xf32>, vector<128x384xf32>, vector<8x384xf32> -> vector<8x384xf32>
    %457 = vector.extract_strided_slice %454 {offsets = [0, 0], sizes = [8, 128], strides = [1, 1]} : vector<8x384xf32> to vector<8x128xf32>
    %458 = vector.extract_strided_slice %456 {offsets = [0, 0], sizes = [8, 128], strides = [1, 1]} : vector<8x384xf32> to vector<8x128xf32>
    %459 = arith.addf %457, %458 : vector<8x128xf32>
    %460 = arith.negf %459 : vector<8x128xf32>
    %461 = math.exp %460 : vector<8x128xf32>
    %cst_166 = arith.constant 1.000000e+00 : f32
    %462 = vector.broadcast %cst_166 : f32 to vector<8x128xf32>
    %463 = arith.addf %462, %461 : vector<8x128xf32>
    %464 = arith.divf %462, %463 : vector<8x128xf32>
    %465 = vector.extract_strided_slice %454 {offsets = [0, 128], sizes = [8, 128], strides = [1, 1]} : vector<8x384xf32> to vector<8x128xf32>
    %466 = vector.extract_strided_slice %456 {offsets = [0, 128], sizes = [8, 128], strides = [1, 1]} : vector<8x384xf32> to vector<8x128xf32>
    %467 = arith.addf %465, %466 : vector<8x128xf32>
    %468 = arith.negf %467 : vector<8x128xf32>
    %469 = math.exp %468 : vector<8x128xf32>
    %cst_167 = arith.constant 1.000000e+00 : f32
    %470 = vector.broadcast %cst_167 : f32 to vector<8x128xf32>
    %471 = arith.addf %470, %469 : vector<8x128xf32>
    %472 = arith.divf %470, %471 : vector<8x128xf32>
    %473 = vector.extract_strided_slice %454 {offsets = [0, 256], sizes = [8, 128], strides = [1, 1]} : vector<8x384xf32> to vector<8x128xf32>
    %474 = vector.extract_strided_slice %456 {offsets = [0, 256], sizes = [8, 128], strides = [1, 1]} : vector<8x384xf32> to vector<8x128xf32>
    %475 = arith.addf %474, %296 : vector<8x128xf32>
    %476 = arith.mulf %464, %475 : vector<8x128xf32>
    %477 = arith.addf %473, %476 : vector<8x128xf32>
    %478 = math.tanh %477 : vector<8x128xf32>
    %cst_168 = arith.constant 1.000000e+00 : f32
    %479 = vector.broadcast %cst_168 : f32 to vector<8x128xf32>
    %480 = arith.subf %479, %472 : vector<8x128xf32>
    %481 = arith.mulf %480, %478 : vector<8x128xf32>
    %482 = arith.mulf %472, %452 : vector<8x128xf32>
    %483 = arith.addf %481, %482 : vector<8x128xf32>
    %c6_169 = arith.constant 6 : index
    %c0_170 = arith.constant 0 : index
    %c0_171 = arith.constant 0 : index
    %484 = vector.load %arg13[%c6_169, %c0_170, %c0_171] : memref<8x8x384xf32, #tpu.memory_space<vmem>>, vector<1x8x384xf32>
    %485 = vector.shape_cast %484 : vector<1x8x384xf32> to vector<8x384xf32>
    %c0_172 = arith.constant 0 : index
    %c0_173 = arith.constant 0 : index
    %486 = vector.load %arg7[%c0_172, %c0_173] : memref<128x384xf32, #tpu.memory_space<vmem>>, vector<128x384xf32>
    %cst_174 = arith.constant dense<0.000000e+00> : vector<8x384xf32>
    %487 = tpu.matmul %483, %486, %cst_174 {dimension_numbers = #tpu.dot_dimension_numbers<[1], [0], [0], [1], [0, 0, 1, 1], [], []>} : vector<8x128xf32>, vector<128x384xf32>, vector<8x384xf32> -> vector<8x384xf32>
    %488 = vector.extract_strided_slice %485 {offsets = [0, 0], sizes = [8, 128], strides = [1, 1]} : vector<8x384xf32> to vector<8x128xf32>
    %489 = vector.extract_strided_slice %487 {offsets = [0, 0], sizes = [8, 128], strides = [1, 1]} : vector<8x384xf32> to vector<8x128xf32>
    %490 = arith.addf %488, %489 : vector<8x128xf32>
    %491 = arith.negf %490 : vector<8x128xf32>
    %492 = math.exp %491 : vector<8x128xf32>
    %cst_175 = arith.constant 1.000000e+00 : f32
    %493 = vector.broadcast %cst_175 : f32 to vector<8x128xf32>
    %494 = arith.addf %493, %492 : vector<8x128xf32>
    %495 = arith.divf %493, %494 : vector<8x128xf32>
    %496 = vector.extract_strided_slice %485 {offsets = [0, 128], sizes = [8, 128], strides = [1, 1]} : vector<8x384xf32> to vector<8x128xf32>
    %497 = vector.extract_strided_slice %487 {offsets = [0, 128], sizes = [8, 128], strides = [1, 1]} : vector<8x384xf32> to vector<8x128xf32>
    %498 = arith.addf %496, %497 : vector<8x128xf32>
    %499 = arith.negf %498 : vector<8x128xf32>
    %500 = math.exp %499 : vector<8x128xf32>
    %cst_176 = arith.constant 1.000000e+00 : f32
    %501 = vector.broadcast %cst_176 : f32 to vector<8x128xf32>
    %502 = arith.addf %501, %500 : vector<8x128xf32>
    %503 = arith.divf %501, %502 : vector<8x128xf32>
    %504 = vector.extract_strided_slice %485 {offsets = [0, 256], sizes = [8, 128], strides = [1, 1]} : vector<8x384xf32> to vector<8x128xf32>
    %505 = vector.extract_strided_slice %487 {offsets = [0, 256], sizes = [8, 128], strides = [1, 1]} : vector<8x384xf32> to vector<8x128xf32>
    %506 = arith.addf %505, %296 : vector<8x128xf32>
    %507 = arith.mulf %495, %506 : vector<8x128xf32>
    %508 = arith.addf %504, %507 : vector<8x128xf32>
    %509 = math.tanh %508 : vector<8x128xf32>
    %cst_177 = arith.constant 1.000000e+00 : f32
    %510 = vector.broadcast %cst_177 : f32 to vector<8x128xf32>
    %511 = arith.subf %510, %503 : vector<8x128xf32>
    %512 = arith.mulf %511, %509 : vector<8x128xf32>
    %513 = arith.mulf %503, %483 : vector<8x128xf32>
    %514 = arith.addf %512, %513 : vector<8x128xf32>
    %c7_178 = arith.constant 7 : index
    %c0_179 = arith.constant 0 : index
    %c0_180 = arith.constant 0 : index
    %515 = vector.load %arg13[%c7_178, %c0_179, %c0_180] : memref<8x8x384xf32, #tpu.memory_space<vmem>>, vector<1x8x384xf32>
    %516 = vector.shape_cast %515 : vector<1x8x384xf32> to vector<8x384xf32>
    %c0_181 = arith.constant 0 : index
    %c0_182 = arith.constant 0 : index
    %517 = vector.load %arg7[%c0_181, %c0_182] : memref<128x384xf32, #tpu.memory_space<vmem>>, vector<128x384xf32>
    %cst_183 = arith.constant dense<0.000000e+00> : vector<8x384xf32>
    %518 = tpu.matmul %514, %517, %cst_183 {dimension_numbers = #tpu.dot_dimension_numbers<[1], [0], [0], [1], [0, 0, 1, 1], [], []>} : vector<8x128xf32>, vector<128x384xf32>, vector<8x384xf32> -> vector<8x384xf32>
    %519 = vector.extract_strided_slice %516 {offsets = [0, 0], sizes = [8, 128], strides = [1, 1]} : vector<8x384xf32> to vector<8x128xf32>
    %520 = vector.extract_strided_slice %518 {offsets = [0, 0], sizes = [8, 128], strides = [1, 1]} : vector<8x384xf32> to vector<8x128xf32>
    %521 = arith.addf %519, %520 : vector<8x128xf32>
    %522 = arith.negf %521 : vector<8x128xf32>
    %523 = math.exp %522 : vector<8x128xf32>
    %cst_184 = arith.constant 1.000000e+00 : f32
    %524 = vector.broadcast %cst_184 : f32 to vector<8x128xf32>
    %525 = arith.addf %524, %523 : vector<8x128xf32>
    %526 = arith.divf %524, %525 : vector<8x128xf32>
    %527 = vector.extract_strided_slice %516 {offsets = [0, 128], sizes = [8, 128], strides = [1, 1]} : vector<8x384xf32> to vector<8x128xf32>
    %528 = vector.extract_strided_slice %518 {offsets = [0, 128], sizes = [8, 128], strides = [1, 1]} : vector<8x384xf32> to vector<8x128xf32>
    %529 = arith.addf %527, %528 : vector<8x128xf32>
    %530 = arith.negf %529 : vector<8x128xf32>
    %531 = math.exp %530 : vector<8x128xf32>
    %cst_185 = arith.constant 1.000000e+00 : f32
    %532 = vector.broadcast %cst_185 : f32 to vector<8x128xf32>
    %533 = arith.addf %532, %531 : vector<8x128xf32>
    %534 = arith.divf %532, %533 : vector<8x128xf32>
    %535 = vector.extract_strided_slice %516 {offsets = [0, 256], sizes = [8, 128], strides = [1, 1]} : vector<8x384xf32> to vector<8x128xf32>
    %536 = vector.extract_strided_slice %518 {offsets = [0, 256], sizes = [8, 128], strides = [1, 1]} : vector<8x384xf32> to vector<8x128xf32>
    %537 = arith.addf %536, %296 : vector<8x128xf32>
    %538 = arith.mulf %526, %537 : vector<8x128xf32>
    %539 = arith.addf %535, %538 : vector<8x128xf32>
    %540 = math.tanh %539 : vector<8x128xf32>
    %cst_186 = arith.constant 1.000000e+00 : f32
    %541 = vector.broadcast %cst_186 : f32 to vector<8x128xf32>
    %542 = arith.subf %541, %534 : vector<8x128xf32>
    %543 = arith.mulf %542, %540 : vector<8x128xf32>
    %544 = arith.mulf %534, %514 : vector<8x128xf32>
    %545 = arith.addf %543, %544 : vector<8x128xf32>
    %c0_187 = arith.constant 0 : index
    %c0_188 = arith.constant 0 : index
    %546 = vector.load %arg10[%c0_187, %c0_188] : memref<128x16xf32, #tpu.memory_space<vmem>>, vector<128x16xf32>
    %cst_189 = arith.constant dense<0.000000e+00> : vector<8x16xf32>
    %547 = tpu.matmul %545, %546, %cst_189 {dimension_numbers = #tpu.dot_dimension_numbers<[1], [0], [0], [1], [0, 0, 1, 1], [], []>} : vector<8x128xf32>, vector<128x16xf32>, vector<8x16xf32> -> vector<8x16xf32>
    %c0_190 = arith.constant 0 : index
    %c0_191 = arith.constant 0 : index
    %548 = vector.load %arg11[%c0_190, %c0_191] : memref<1x16xf32, #tpu.memory_space<vmem>>, vector<1x16xf32>
    %549 = vector.broadcast %548 : vector<1x16xf32> to vector<8x16xf32>
    %550 = arith.addf %547, %549 : vector<8x16xf32>
    %551 = arith.mulf %550, %550 : vector<8x16xf32>
    %cst_192 = arith.constant dense<0.000000e+00> : vector<8xf32>
    %552 = vector.multi_reduction <add>, %551, %cst_192 [1] : vector<8x16xf32> to vector<8xf32>
    %553 = vector.shape_cast %552 : vector<8xf32> to vector<8x1xf32>
    %cst_193 = arith.constant 9.99999996E-13 : f32
    %554 = vector.broadcast %cst_193 : f32 to vector<8x1xf32>
    %555 = arith.maximumf %553, %554 : vector<8x1xf32>
    %556 = math.rsqrt %555 : vector<8x1xf32>
    %557 = vector.broadcast %556 : vector<8x1xf32> to vector<8x16xf32>
    %558 = arith.mulf %550, %557 : vector<8x16xf32>
    %c0_194 = arith.constant 0 : index
    %c0_195 = arith.constant 0 : index
    %559 = vector.load %arg12[%c0_194, %c0_195] : memref<8x16xf32, #tpu.memory_space<vmem>>, vector<8x16xf32>
    tpu.vector_store %arg12[%c0_194, %c0_195], %558 {strides = array<i32>} : memref<8x16xf32, #tpu.memory_space<vmem>>, vector<8x16xf32>,
    return
  }
  func.func @transform_0(%arg0: i32) -> (i32, i32, i32) {
    %c0_i32 = arith.constant 0 : i32
    %c0_i32_0 = arith.constant 0 : i32
    %c0_i32_1 = arith.constant 0 : i32
    return %c0_i32, %arg0, %c0_i32_0 : i32, i32, i32
  }
  func.func @transform_1(%arg0: i32) -> (i32, i32) {
    %c0_i32 = arith.constant 0 : i32
    %c0_i32_0 = arith.constant 0 : i32
    %c0_i32_1 = arith.constant 0 : i32
    return %c0_i32, %c0_i32_0 : i32, i32
  }
  func.func @transform_2(%arg0: i32) -> (i32, i32) {
    %c0_i32 = arith.constant 0 : i32
    %c0_i32_0 = arith.constant 0 : i32
    %c0_i32_1 = arith.constant 0 : i32
    return %c0_i32, %c0_i32_0 : i32, i32
  }
  func.func @transform_3(%arg0: i32) -> (i32, i32) {
    %c0_i32 = arith.constant 0 : i32
    %c0_i32_0 = arith.constant 0 : i32
    %c0_i32_1 = arith.constant 0 : i32
    return %c0_i32, %c0_i32_0 : i32, i32
  }
  func.func @transform_4(%arg0: i32) -> (i32, i32) {
    %c0_i32 = arith.constant 0 : i32
    %c0_i32_0 = arith.constant 0 : i32
    %c0_i32_1 = arith.constant 0 : i32
    return %c0_i32, %c0_i32_0 : i32, i32
  }
  func.func @transform_5(%arg0: i32) -> (i32, i32) {
    %c0_i32 = arith.constant 0 : i32
    %c0_i32_0 = arith.constant 0 : i32
    %c0_i32_1 = arith.constant 0 : i32
    return %c0_i32, %c0_i32_0 : i32, i32
  }
  func.func @transform_6(%arg0: i32) -> (i32, i32) {
    %c0_i32 = arith.constant 0 : i32
    %c0_i32_0 = arith.constant 0 : i32
    %c0_i32_1 = arith.constant 0 : i32
    return %c0_i32, %c0_i32_0 : i32, i32
  }
  func.func @transform_7(%arg0: i32) -> (i32, i32) {
    %c0_i32 = arith.constant 0 : i32
    %c0_i32_0 = arith.constant 0 : i32
    %c0_i32_1 = arith.constant 0 : i32
    return %c0_i32, %c0_i32_0 : i32, i32
  }
  func.func @transform_8(%arg0: i32) -> (i32, i32) {
    %c0_i32 = arith.constant 0 : i32
    %c0_i32_0 = arith.constant 0 : i32
    %c0_i32_1 = arith.constant 0 : i32
    return %c0_i32, %c0_i32_0 : i32, i32
  }
  func.func @transform_9(%arg0: i32) -> (i32, i32) {
    %c0_i32 = arith.constant 0 : i32
    %c0_i32_0 = arith.constant 0 : i32
    %c0_i32_1 = arith.constant 0 : i32
    return %c0_i32, %c0_i32_0 : i32, i32
  }
  func.func @transform_10(%arg0: i32) -> (i32, i32) {
    %c0_i32 = arith.constant 0 : i32
    %c0_i32_0 = arith.constant 0 : i32
    %c0_i32_1 = arith.constant 0 : i32
    return %c0_i32, %c0_i32_0 : i32, i32
  }
  func.func @transform_11(%arg0: i32) -> (i32, i32) {
    %c0_i32 = arith.constant 0 : i32
    %c0_i32_0 = arith.constant 0 : i32
    return %arg0, %c0_i32 : i32, i32
  }
}

</mosaic_0001>

<bundles_post_ra>
// kernel: tpu_custom_call.1
= control target key start
LH: loop header
LB: loop body
LE: loop exit
PB: predicated region body
PF: predicated region fallthrough
CT: control target
= control target key end

     0   :  { %16 = vsyncpa [#allocation5], 0  ;;  %s4900_s0 = inlined_call_operand.vmem [shape: f32[8,8,16], index: 0, kind: input, shape index: {}]   ;;  %s4901_s1 = inlined_call_operand.vmem [shape: f32[16,384], index: 1, kind: input, shape index: {}]   ;;  %s4902_s2 = inlined_call_operand.hbm [shape: f32[128,384], index: 2, kind: input, shape index: {}]   ;;  %s4903_s3 = inlined_call_operand.vmem [shape: f32[1,384], index: 3, kind: input, shape index: {}]   ;;  %s4904_s4 = inlined_call_operand.vmem [shape: f32[1,128], index: 4, kind: input, shape index: {}]   ;;  %s4905_s5 = inlined_call_operand.hbm [shape: f32[128,384], index: 5, kind: input, shape index: {}]   ;;  %s4906_s6 = inlined_call_operand.hbm [shape: f32[128,384], index: 6, kind: input, shape index: {}]   ;;  %s4907_s7 = inlined_call_operand.vmem [shape: f32[1,384], index: 7, kind: input, shape index: {}]   ;;  %s4908_s8 = inlined_call_operand.vmem [shape: f32[1,128], index: 8, kind: input, shape index: {}]   ;;  %s4909_s9 = inlined_call_operand.vmem [shape: f32[128,16], index: 9, kind: input, shape index: {}]   ;;  %s4910_s10 = inlined_call_operand.vmem [shape: f32[1,16], index: 10, kind: input, shape index: {}]   ;;  %s4911_s11 = inlined_call_operand.hbm [shape: f32[8,16], index: 11, kind: output, shape index: {}]  }
   0x1   :  { %17 = vsyncpa [#allocation8], 0 }
   0x2   :  { %18 = vsyncpa [#allocation6], 0  ;;  %s44_s19 = sshll.u32 %s4905_s5, 4  ;;  %s3186_s20 = smov [#allocation7]   ;;  %s45_s19 = int_to_ptr.hbm [resolvable:$true] %s44_s19 }
   0x3   :  { %s46_s21 = sshll.u32 %s3186_s20, 4  ;;  %s27_s24 = sshll.u32 %s4902_s2, 4  ;;  %s47_s21 = int_to_ptr.vmem [resolvable:$true] %s46_s21  ;;  %s28_s24 = int_to_ptr.hbm [resolvable:$true] %s27_s24 }
   0x4   :  { %s3187_s25 = smov 384   ;;  %s3188_s26 = smov 24  }
   0x5   :  { %52 = dma.hbm_to_vmem [thread:$0]  %s45_s19, 6144, %s47_s21, [#allocation8], %s3187_s25, %s3187_s25, %s3188_s26  }
   0x6   :  { %s3189_s27 = smov [#allocation4]   ;;  %s57_s12 = sshll.u32 %s4906_s6, 4  ;;  %s58_s12 = int_to_ptr.hbm [resolvable:$true] %s57_s12 }
   0x7   :  { %s29_s28 = sshll.u32 %s3189_s27, 4  ;;  %s3190_s5 = smov [#allocation9]   ;;  %s30_s28 = int_to_ptr.vmem [resolvable:$true] %s29_s28 }
   0x8   :  { %35 = dma.hbm_to_vmem [thread:$0]  %s28_s24, 6144, %s30_s28, [#allocation5], %s3187_s25, %s3187_s25, %s3188_s26  }
   0x9   :  { %s59_s13 = sshll.u32 %s3190_s5, 4  ;;  %s60_s13 = int_to_ptr.vmem [resolvable:$true] %s59_s13 }
   0xa   :  { %65 = dma.hbm_to_vmem [thread:$0]  %s58_s12, 6144, %s60_s13, [#allocation8], %s3187_s25, %s3187_s25, %s3188_s26  }
   0xb   :  { %3180 = dma.done.wait [#allocation5], 6144  }
   0xc   :  { %3181 = vsyncadd [#allocation5], 4294961152 }
   0xd   :  { %3182 = dma.done.wait [#allocation8], 12288  }
   0xe   :  { %3183 = vsyncadd [#allocation8], 4294955008  ;;  %v3262_v0 = vld [vmem:[#allocation4 + $0x168] sm:$0xff]  ;;  %v3264_v1 = vld [vmem:[#allocation4 + $0x150] sm:$0xff]  ;;  %vm108_vm0 = vcmask 130048   ;;  %v4912_v42 = vmov 0.0  }
   0xf   :  { %335 = vmatpush.msra.mxu3 %v3262_v0  ;;  %v3267_v2 = vld [vmem:[#allocation4 + $0x138] sm:$0xff]  ;;  %v94_v4 = vld [vmem:[%s4901_s1] sm:$0xff]  ;;  %v3284_v7 = vld [vmem:[#allocation4 + $0x108] sm:$0xff]  ;;  %s3192_s29 = smov [#allocation10]   ;;  %s2793_s5 = sshll.u32 %s4911_s11, 4  ;;  %s2794_s5 = int_to_ptr.hbm [resolvable:$true] %s2793_s5 }
  0x10   :  { %v97_v3 = vld [vmem:[%s4901_s1 + $0x18] sm:$0xff]  ;;  %v3279_v5 = vld [vmem:[%s4900_s0] sm:$0xff]  ;;  %v3291_v9 = vld [vmem:[#allocation4 + $0xf0] sm:$0xff]  ;;  %s2791_s30 = sshll.u32 %s3192_s29, 4  ;;  %s2792_s30 = int_to_ptr.vmem [resolvable:$true] %s2791_s30 }
  0x11   :  { %336 = vmatpush.msra.mxu3 %v3264_v1  ;;  %147 = vmatpush.msra.mxu0 %v97_v3  ;;  %v3281_v6 = vld [vmem:[#allocation4 + $0x120] sm:$0xff]  ;;  %v3289_v8 = vld [vmem:[#allocation4 + $0x178] sm:$0xff]  ;;  %v3297_v11 = vld [vmem:[#allocation4 + $0x148] sm:$0xff] }
  0x12   :  { %2860 = vmatpush.msra.mxu1 %v97_v3  ;;  %v3294_v10 = vld [vmem:[#allocation4 + $0x160] sm:$0xff]  ;;  %v3299_v12 = vld [vmem:[#allocation4 + $0xd8] sm:$0xff]  ;;  %v3306_v13 = vld [vmem:[%s4900_s0 + $0x8] sm:$0xff] }
  0x13   :  { %337 = vmatpush.msra.mxu3 %v3267_v2  ;;  %148 = vmatpush.msra.mxu0 %v94_v4  ;;  %v3308_v14 = vld [vmem:[#allocation4 + $0xc0] sm:$0xff]  ;;  %v3311_v15 = vld [vmem:[#allocation4 + $0x130] sm:$0xff]  ;;  %v3314_v16 = vld [vmem:[#allocation4 + $0xa8] sm:$0xff] }
  0x14   :  { %2804 = vmatmul.msk.f32.vlgmr.msra.gmra.mxu0 %vm108_vm0, %v3279_v5  ;;  %2861 = vmatpush.msra.mxu1 %v94_v4  ;;  %v3318_v17 = vld [vmem:[#allocation4 + $0x118] sm:$0xff]  ;;  %v3322_v18 = vld [vmem:[#allocation4 + $0x90] sm:$0xff]  ;;  %v3324_v19 = vld [vmem:[#allocation4 + $0x100] sm:$0xff] }
  0x15   :  { %338 = vmatpush.msra.mxu3 %v3281_v6  ;;  %375 = vmatpush.msrb.mxu0 %v3289_v8  ;;  %v3328_v20 = vld [vmem:[#allocation4 + $0x78] sm:$0xff]  ;;  %v3330_v21 = vld [vmem:[#allocation4 + $0xe8] sm:$0xff]  ;;  %v3336_v22 = vld [vmem:[%s4900_s0 + $0x10] sm:$0xff] }
  0x16   :  { %v3342_v23 = vld [vmem:[%s4900_s0 + $0x30] sm:$0xff]  ;;  %v98_v24 = vld [vmem:[%s4901_s1 + $0x20] sm:$0xff]  ;;  %v3355_v27 = vld [vmem:[#allocation4 + $0x48] sm:$0xff] }
  0x17   :  { %339 = vmatpush.msra.mxu3 %v3284_v7  ;;  %376 = vmatpush.msrb.mxu0 %v3294_v10  ;;  %v3347_v25 = vld [vmem:[#allocation4 + $0x60] sm:$0xff]  ;;  %v3349_v26 = vld [vmem:[#allocation4 + $0xd0] sm:$0xff]  ;;  %v3359_v28 = vld [vmem:[#allocation4 + $0xb8] sm:$0xff] }
  0x18   :  { %2810 = vmatmul.msk.f32.vlgmr.msra.gmra.mxu1 %vm108_vm0, %v3342_v23  ;;  %v3363_v29 = vld [vmem:[#allocation4 + $0x30] sm:$0xff]  ;;  %v3365_v30 = vld [vmem:[#allocation4 + $0xa0] sm:$0xff]  ;;  %v3369_v31 = vld [vmem:[#allocation4 + $0x18] sm:$0xff] }
  0x19   :  { %340 = vmatpush.msra.mxu3 %v3291_v9  ;;  %377 = vmatpush.msrb.mxu0 %v3297_v11  ;;  %v3374_v32 = vld [vmem:[%s4900_s0 + $0x18] sm:$0xff]  ;;  %v3376_v33 = vld [vmem:[#allocation4 + $0x88] sm:$0xff]  ;;  %v3391_v37 = vld [vmem:[#allocation4] sm:$0xff] }
  0x1a   :  { %188 = vmatpush.msrb.mxu1 %v98_v24  ;;  %v3383_v34 = vld [vmem:[%s4900_s0 + $0x38] sm:$0xff]  ;;  %v95_v35 = vld [vmem:[%s4901_s1 + $0x8] sm:$0xff]  ;;  %v3393_v38 = vld [vmem:[#allocation4 + $0x70] sm:$0xff] }
  0x1b   :  { %341 = vmatpush.msra.mxu3 %v3299_v12  ;;  %378 = vmatpush.msrb.mxu0 %v3311_v15  ;;  %v99_v36 = vld [vmem:[%s4901_s1 + $0x28] sm:$0xff]  ;;  %v96_v39 = vld [vmem:[%s4901_s1 + $0x10] sm:$0xff]  ;;  %v3406_v41 = vld [vmem:[#allocation4 + $0x58] sm:$0xff] }
  0x1c   :  { %2805 = vmatmul.msk.f32.gmra.mxu0 %vm108_vm0, %v3306_v13  ;;  %229 = vmatpush.msra.mxu2 %v99_v36  ;;  %v3402_v40 = vld [vmem:[#allocation4 + $0x170] sm:$0xff]  ;;  %v3411_v43 = vld [vmem:[#allocation4 + $0x158] sm:$0xff]  ;;  %v3413_v44 = vld [vmem:[#allocation4 + $0x40] sm:$0xff] }
  0x1d   :  { %342 = vmatpush.msra.mxu3 %v3308_v14  ;;  %379 = vmatpush.msrb.mxu0 %v3318_v17  ;;  %v3417_v45 = vld [vmem:[#allocation4 + $0x140] sm:$0xff]  ;;  %v3421_v46 = vld [vmem:[#allocation4 + $0x28] sm:$0xff]  ;;  %v3433_v49 = vld [vmem:[#allocation4 + $0x10] sm:$0xff] }
  0x1e   :  { %189 = vmatpush.msrb.mxu1 %v95_v35  ;;  %230 = vmatpush.msra.mxu2 %v96_v39  ;;  %v3428_v47 = vld [vmem:[%s4900_s0 + $0x20] sm:$0xff]  ;;  %v3431_v48 = vld [vmem:[#allocation4 + $0x128] sm:$0xff]  ;;  %v3440_v50 = vld [vmem:[#allocation4 + $0x110] sm:$0xff] }
  0x1f   :  { %343 = vmatpush.msra.mxu3 %v3314_v16  ;;  %380 = vmatpush.msrb.mxu0 %v3324_v19  ;;  %v3447_v51 = vld [vmem:[#allocation4 + $0xf8] sm:$0xff]  ;;  %v3453_v52 = vld [vmem:[#allocation4 + $0xe0] sm:$0xff]  ;;  %v3462_v53 = vld [vmem:[%s4900_s0 + $0x28] sm:$0xff] }
  0x20   :  { %2811 = vmatmul.msk.f32.gmra.mxu1 %vm108_vm0, %v3383_v34  ;;  %2820 = vmatmul.msk.f32.vlgmr.msra.gmra.mxu2 %vm108_vm0, %v3279_v5  ;;  %v3465_v54 = vld [vmem:[#allocation4 + $0xc8] sm:$0xff]  ;;  %v3472_v55 = vld [vmem:[#allocation4 + $0xb0] sm:$0xff]  ;;  %v3479_v56 = vld [vmem:[#allocation4 + $0x98] sm:$0xff] }
  0x21   :  { %344 = vmatpush.msra.mxu3 %v3322_v18  ;;  %381 = vmatpush.msrb.mxu0 %v3330_v21  ;;  %v3485_v57 = vld [vmem:[#allocation4 + $0x80] sm:$0xff]  ;;  %v3492_v58 = vld [vmem:[#allocation4 + $0x68] sm:$0xff]  ;;  %v3499_v59 = vld [vmem:[#allocation4 + $0x50] sm:$0xff] }
  0x22   :  { %496 = vmatpush.msra.mxu1 %v3262_v0  ;;  %516 = vmatpush.msrb.mxu2 %v3402_v40  ;;  %v3505_v60 = vld [vmem:[#allocation4 + $0x38] sm:$0xff]  ;;  %v3511_v61 = vld [vmem:[#allocation4 + $0x20] sm:$0xff]  ;;  %v3518_v62 = vld [vmem:[#allocation4 + $0x8] sm:$0xff] }
  0x23   :  { %345 = vmatpush.msra.mxu3 %v3328_v20  ;;  %382 = vmatpush.msrb.mxu0 %v3349_v26 }
  0x24   :  { %2806 = vmatmul.msk.f32.gmra.mxu0 %vm108_vm0, %v3336_v22  ;;  %497 = vmatpush.msra.mxu1 %v3264_v1 }
  0x25   :  { %346 = vmatpush.msra.mxu3 %v3347_v25  ;;  %383 = vmatpush.msrb.mxu0 %v3359_v28 }
  0x26   :  { %517 = vmatpush.msrb.mxu2 %v3411_v43  ;;  %498 = vmatpush.msra.mxu1 %v3267_v2 }
  0x27   :  { %347 = vmatpush.msra.mxu3 %v3355_v27  ;;  %384 = vmatpush.msrb.mxu0 %v3365_v30 }
  0x28   :  { %2812 = vmatmul.msk.f32.vlgmr.msrb.gmra.mxu1 %vm108_vm0, %v3279_v5  ;;  %2821 = vmatmul.msk.f32.gmra.mxu2 %vm108_vm0, %v3306_v13 }
  0x29   :  { %348 = vmatpush.msra.mxu3 %v3363_v29  ;;  %385 = vmatpush.msrb.mxu0 %v3376_v33 }
  0x2a   :  { %499 = vmatpush.msra.mxu1 %v3281_v6  ;;  %518 = vmatpush.msrb.mxu2 %v3417_v45 }
  0x2b   :  { %349 = vmatpush.msra.mxu3 %v3369_v31  ;;  %386 = vmatpush.msrb.mxu0 %v3393_v38 }
  0x2c   :  { %2807 = vmatmul.msk.f32.gmra.mxu0 %vm108_vm0, %v3374_v32  ;;  %519 = vmatpush.msrb.mxu2 %v3431_v48 }
  0x2d   :  { %350 = vmatpush.msra.mxu3 %v3391_v37  ;;  %387 = vmatpush.msrb.mxu0 %v3406_v41 }
  0x2e   :  { %351 = vmatmul.f32.vlgmr.msra.gmra.mxu3 %v4912_v42  ;;  %500 = vmatpush.msra.mxu1 %v3284_v7 }
  0x2f   :  { %355 = vmatpush.msrb.mxu3 %v3402_v40  ;;  %388 = vmatpush.msrb.mxu0 %v3413_v44 }
  0x30   :  { %2813 = vmatmul.msk.f32.gmra.mxu1 %vm108_vm0, %v3306_v13  ;;  %520 = vmatpush.msrb.mxu2 %v3440_v50 }
  0x31   :  { %356 = vmatpush.msrb.mxu3 %v3411_v43  ;;  %389 = vmatpush.msrb.mxu0 %v3421_v46 }
  0x32   :  { %501 = vmatpush.msra.mxu1 %v3291_v9  ;;  %521 = vmatpush.msrb.mxu2 %v3447_v51 }
  0x33   :  { %357 = vmatpush.msrb.mxu3 %v3417_v45  ;;  %390 = vmatpush.msrb.mxu0 %v3433_v49 }
  0x34   :  { %2808 = vmatmul.msk.f32.gmra.mxu0 %vm108_vm0, %v3428_v47  ;;  %2822 = vmatmul.msk.f32.gmra.mxu2 %vm108_vm0, %v3336_v22 }
  0x35   :  { %358 = vmatpush.msrb.mxu3 %v3431_v48  ;;  %658 = vmatpush.msra.mxu0 %v3262_v0 }
  0x36   :  { %502 = vmatpush.msra.mxu1 %v3299_v12  ;;  %522 = vmatpush.msrb.mxu2 %v3453_v52 }
  0x37   :  { %359 = vmatpush.msrb.mxu3 %v3440_v50  ;;  %659 = vmatpush.msra.mxu0 %v3264_v1  ;;  %v100_v1 = vld [vmem:[%s4903_s3] sm:$0x7] }
  0x38   :  { %2814 = vmatmul.msk.f32.gmra.mxu1 %vm108_vm0, %v3336_v22  ;;  %523 = vmatpush.msrb.mxu2 %v3465_v54 }
  0x39   :  { %360 = vmatpush.msrb.mxu3 %v3447_v51  ;;  %660 = vmatpush.msra.mxu0 %v3267_v2  ;;  %v3628_v2 = vperm.slane %v100_v1, 0 }
  0x3a   :  { %503 = vmatpush.msra.mxu1 %v3308_v14  ;;  %524 = vmatpush.msrb.mxu2 %v3472_v55 }
  0x3b   :  { %361 = vmatpush.msrb.mxu3 %v3453_v52  ;;  %661 = vmatpush.msra.mxu0 %v3281_v6 }
  0x3c   :  { %2809 = vmatmul.msk.f32.gmra.mxu0 %vm108_vm0, %v3462_v53  ;;  %504 = vmatpush.msra.mxu1 %v3314_v16 }
  0x3d   :  { %362 = vmatpush.msrb.mxu3 %v3465_v54  ;;  %662 = vmatpush.msra.mxu0 %v3284_v7 }
  0x3e   :  { %505 = vmatpush.msra.mxu1 %v3322_v18  ;;  %2823 = vmatmul.msk.f32.gmra.mxu2 %vm108_vm0, %v3374_v32 }
  0x3f   :  { %363 = vmatpush.msrb.mxu3 %v3472_v55  ;;  %663 = vmatpush.msra.mxu0 %v3291_v9 }
  0x40   :  { %525 = vmatpush.msrb.mxu2 %v3479_v56  ;;  %2815 = vmatmul.msk.f32.gmra.mxu1 %vm108_vm0, %v3374_v32  ;;  %v3649_v32 = vperm.slane %v100_v1, 1 }
  0x41   :  { %364 = vmatpush.msrb.mxu3 %v3479_v56  ;;  %664 = vmatpush.msra.mxu0 %v3299_v12 }
  0x42   :  { %506 = vmatpush.msra.mxu1 %v3328_v20  ;;  %526 = vmatpush.msrb.mxu2 %v3485_v57 }
  0x43   :  { %365 = vmatpush.msrb.mxu3 %v3485_v57  ;;  %665 = vmatpush.msra.mxu0 %v3308_v14 }
  0x44   :  { %391 = vmatmul.f32.vlgmr.msrb.gmra.mxu0 %v4912_v42  ;;  %507 = vmatpush.msra.mxu1 %v3347_v25 }
  0x45   :  { %366 = vmatpush.msrb.mxu3 %v3492_v58  ;;  %527 = vmatpush.msrb.mxu2 %v3492_v58 }
  0x46   :  { %508 = vmatpush.msra.mxu1 %v3355_v27  ;;  %2824 = vmatmul.msk.f32.gmra.mxu2 %vm108_vm0, %v3428_v47 }
  0x47   :  { %367 = vmatpush.msrb.mxu3 %v3499_v59  ;;  %666 = vmatpush.msra.mxu0 %v3314_v16 }
  0x48   :  { %528 = vmatpush.msrb.mxu2 %v3499_v59  ;;  %2816 = vmatmul.msk.f32.gmra.mxu1 %vm108_vm0, %v3428_v47 }
  0x49   :  { %368 = vmatpush.msrb.mxu3 %v3505_v60  ;;  %667 = vmatpush.msra.mxu0 %v3322_v18 }
  0x4a   :  { %509 = vmatpush.msra.mxu1 %v3363_v29  ;;  %529 = vmatpush.msrb.mxu2 %v3505_v60 }
  0x4b   :  { %369 = vmatpush.msrb.mxu3 %v3511_v61  ;;  %668 = vmatpush.msra.mxu0 %v3328_v20 }
  0x4c   :  { %510 = vmatpush.msra.mxu1 %v3369_v31  ;;  %530 = vmatpush.msrb.mxu2 %v3511_v61 }
  0x4d   :  { %370 = vmatpush.msrb.mxu3 %v3518_v62  ;;  %669 = vmatpush.msra.mxu0 %v3347_v25 }
  0x4e   :  { %371 = vmatmul.f32.vlgmr.msrb.gmra.mxu3 %v4912_v42  ;;  %511 = vmatpush.msra.mxu1 %v3391_v37  ;;  %v3902_v42 = vld [vmem:[#allocation4 + $0x68] sm:$0xff] }
  0x4f   :  { %536 = vmatpush.msra.mxu3 %v3289_v8  ;;  %2825 = vmatmul.msk.f32.gmra.mxu2 %vm108_vm0, %v3462_v53 }
  0x50   :  { %678 = vmatpush.msrb.mxu1 %v3402_v40  ;;  %531 = vmatpush.msrb.mxu2 %v3518_v62 }
  0x51   :  { %537 = vmatpush.msra.mxu3 %v3294_v10  ;;  %2817 = vmatmul.msk.f32.gmra.mxu1 %vm108_vm0, %v3462_v53 }
  0x52   :  { %698 = vmatpush.msra.mxu2 %v3289_v8  ;;  %679 = vmatpush.msrb.mxu1 %v3411_v43 }
  0x53   :  { %538 = vmatpush.msra.mxu3 %v3297_v11  ;;  %670 = vmatpush.msra.mxu0 %v3355_v27 }
  0x54   :  { %699 = vmatpush.msra.mxu2 %v3294_v10  ;;  %680 = vmatpush.msrb.mxu1 %v3417_v45 }
  0x55   :  { %539 = vmatpush.msra.mxu3 %v3311_v15  ;;  %671 = vmatpush.msra.mxu0 %v3363_v29 }
  0x56   :  { %700 = vmatpush.msra.mxu2 %v3297_v11  ;;  %681 = vmatpush.msrb.mxu1 %v3431_v48 }
  0x57   :  { %540 = vmatpush.msra.mxu3 %v3318_v17  ;;  %2826 = vmatmul.msk.f32.gmra.mxu2 %vm108_vm0, %v3342_v23 }
  0x58   :  { %672 = vmatpush.msra.mxu0 %v3369_v31  ;;  %701 = vmatpush.msra.mxu2 %v3311_v15 }
  0x59   :  { %541 = vmatpush.msra.mxu3 %v3324_v19  ;;  %2818 = vmatmul.msk.f32.gmra.mxu1 %vm108_vm0, %v3342_v23 }
  0x5a   :  { %673 = vmatpush.msra.mxu0 %v3391_v37  ;;  %682 = vmatpush.msrb.mxu1 %v3440_v50 }
  0x5b   :  { %542 = vmatpush.msra.mxu3 %v3330_v21  ;;  %702 = vmatpush.msra.mxu2 %v3318_v17 }
  0x5c   :  { %840 = vmatpush.msrb.mxu0 %v3402_v40  ;;  %683 = vmatpush.msrb.mxu1 %v3447_v51 }
  0x5d   :  { %543 = vmatpush.msra.mxu3 %v3349_v26  ;;  %703 = vmatpush.msra.mxu2 %v3324_v19 }
  0x5e   :  { %841 = vmatpush.msrb.mxu0 %v3411_v43  ;;  %684 = vmatpush.msrb.mxu1 %v3453_v52 }
  0x5f   :  { %544 = vmatpush.msra.mxu3 %v3359_v28  ;;  %2827 = vmatmul.msk.f32.gmra.mxu2 %vm108_vm0, %v3383_v34 }
  0x60   :  { %842 = vmatpush.msrb.mxu0 %v3417_v45  ;;  %704 = vmatpush.msra.mxu2 %v3330_v21 }
  0x61   :  { %545 = vmatpush.msra.mxu3 %v3365_v30  ;;  %2819 = vmatmul.msk.f32.gmra.mxu1 %vm108_vm0, %v3383_v34 }
  0x62   :  { %843 = vmatpush.msrb.mxu0 %v3431_v48  ;;  %685 = vmatpush.msrb.mxu1 %v3465_v54 }
  0x63   :  { %546 = vmatpush.msra.mxu3 %v3376_v33  ;;  %705 = vmatpush.msra.mxu2 %v3349_v26 }
  0x64   :  { %844 = vmatpush.msrb.mxu0 %v3440_v50  ;;  %686 = vmatpush.msrb.mxu1 %v3472_v55  ;;  %v3655_v50 = vld [vmem:[%s4904_s4] ss:$0 sm:$0xff] }
  0x65   :  { %547 = vmatpush.msra.mxu3 %v3393_v38  ;;  %706 = vmatpush.msra.mxu2 %v3359_v28 }
  0x66   :  { %845 = vmatpush.msrb.mxu0 %v3447_v51  ;;  %687 = vmatpush.msrb.mxu1 %v3479_v56 }
  0x67   :  { %548 = vmatpush.msra.mxu3 %v3406_v41  ;;  %707 = vmatpush.msra.mxu2 %v3365_v30 }
  0x68   :  { %846 = vmatpush.msrb.mxu0 %v3453_v52  ;;  %688 = vmatpush.msrb.mxu1 %v3485_v57 }
  0x69   :  { %549 = vmatpush.msra.mxu3 %v3413_v44  ;;  %708 = vmatpush.msra.mxu2 %v3376_v33 }
  0x6a   :  { %847 = vmatpush.msrb.mxu0 %v3465_v54  ;;  %689 = vmatpush.msrb.mxu1 %v3492_v58 }
  0x6b   :  { %550 = vmatpush.msra.mxu3 %v3421_v46  ;;  %709 = vmatpush.msra.mxu2 %v3393_v38 }
  0x6c   :  { %848 = vmatpush.msrb.mxu0 %v3472_v55  ;;  %690 = vmatpush.msrb.mxu1 %v3499_v59 }
  0x6d   :  { %551 = vmatpush.msra.mxu3 %v3433_v49  ;;  %710 = vmatpush.msra.mxu2 %v3406_v41 }
  0x6e   :  { %849 = vmatpush.msrb.mxu0 %v3479_v56  ;;  %691 = vmatpush.msrb.mxu1 %v3505_v60 }
  0x6f   :  { %711 = vmatpush.msra.mxu2 %v3413_v44 }
  0x70   :  { %850 = vmatpush.msrb.mxu0 %v3485_v57  ;;  %692 = vmatpush.msrb.mxu1 %v3511_v61 }
  0x71   :  { %712 = vmatpush.msra.mxu2 %v3421_v46 }
  0x72   :  { %851 = vmatpush.msrb.mxu0 %v3492_v58  ;;  %693 = vmatpush.msrb.mxu1 %v3518_v62  ;;  %v3658_v58 = vperm.slane %v100_v1, 2 }
  0x73   :  { %713 = vmatpush.msra.mxu2 %v3433_v49 }
  0x91   :  { %v150_v63 = vpop.f32.mrf.mxu0 }
  0x92   :  { %v151_v14 = vadd.f32 %v150_v63, %v3628_v2 }
  0x95   :  { %v168_v3 = vpop.f32.mrf.mxu1 }
  0x96   :  { %v3631_v4 = vadd.f32 %v168_v3, %v3628_v2 }
  0x98   :  { %4937 = vst [vmem:[#allocation14_spill] sm:$0xff] %v3631_v4  ;;  %v3935_v4 = vld [vmem:[#allocation4 + $0x10] sm:$0xff] }
  0x99   :  { %v3623_v0 = vpop.f32.mrf.mxu0 }
  0x9d   :  { %v171_v7 = vpop.f32.mrf.mxu1 }
  0x9e   :  { %v3637_v9 = vadd.f32 %v171_v7, %v3628_v2 }
  0xa0   :  { %4938 = vst [vmem:[#allocation15_spill] sm:$0xff] %v3637_v9  ;;  %v3918_v9 = vld [vmem:[#allocation4 + $0x40] sm:$0xff] }
  0xa1   :  { %v156_v5 = vpop.f32.mrf.mxu0 }
  0xa2   :  { %v3634_v6 = vadd.f32 %v156_v5, %v3628_v2 }
  0xa3   :  { %v232_v60 = vpop.f32.mrf.mxu2 }
  0xa4   :  { %v233_v3 = vadd.f32 %v232_v60, %v3658_v58 }
  0xa5   :  { %v191_v34 = vpop.f32.mrf.mxu1 }
  0xa6   :  { %v192_v36 = vadd.f32 %v191_v34, %v3649_v32 }
  0xa9   :  { %v159_v12 = vpop.f32.mrf.mxu0 }
  0xaa   :  { %v3640_v13 = vadd.f32 %v159_v12, %v3628_v2 }
  0xb1   :  { %v352_v16 = vpop.f32.mrf.mxu3  ;;  %v162_v18 = vpop.f32.mrf.mxu0 }
  0xb2   :  { %v395_v20 = vadd.f32 %v352_v16, %v151_v14  ;;  %v3644_v22 = vadd.f32 %v162_v18, %v3628_v2 }
  0xb4   :  { %v2828_v23 = vmul.f32 -1.442695, %v395_v20 }
  0xb6   :  { %2872 = vpow2.f32 %v2828_v23 }
  0xb9   :  { %v165_v24 = vpop.f32.mrf.mxu0 }
  0xba   :  { %v3647_v25 = vadd.f32 %v165_v24, %v3628_v2 }
  0xbc   :  { %v2873_v27 = vpop.eup %2872 }
  0xbd   :  { %v399_v29 = vadd.f32 1.0, %v2873_v27 }
  0xbf   :  { %2874 = vrcp.f32 %v399_v29  ;;  %v411_v48 = vand.u32 2147483648, %v399_v29  ;;  %vm405_vm2 = vweird.f32 %v399_v29  ;;  %v409_v51 = vand.u32 2147483647, %v399_v29 }
  0xc1   :  { %v392_v53 = vpop.f32.mrf.mxu0  ;;  %v412_v56 = vor.u32 1.1754944e-38, %v411_v48  ;;  %vm410_vm4 = vcmp.eq.f32.partialorder %v409_v51, 8.507059e+37 }
  0xc2   :  { %v435_v57 = vadd.f32 %v3655_v50, %v392_v53 }
  0xc5   :  { %v2875_v31 = vpop.eup %2874 }
  0xc6   :  { %v401_v35 = vmul.f32 %v2875_v31, %v399_v29  ;;  %vm406_vm1 = vweird.f32 %v2875_v31 }
  0xc7   :  { %vm407_vm3 = vmor %vm405_vm2, %vm406_vm1 }
  0xc8   :  { %v402_v37 = vsub.f32 1.0, %v401_v35 }
  0xca   :  { %v403_v45 = vmul.f32 %v2875_v31, %v402_v37 }
  0xcc   :  { %v404_v47 = vadd.f32 %v2875_v31, %v403_v45 }
  0xce   :  { %v408_v54 = vsel %vm407_vm3, %v2875_v31, %v404_v47 }
  0xcf   :  { %v413_v59 = vsel %vm410_vm4, %v412_v56, %v408_v54 }
  0xd0   :  { %v436_v63 = vmul.f32 %v435_v57, %v413_v59 }
  0xd1   :  { %v372_v39 = vpop.f32.mrf.mxu3 }
  0xd2   :  { %v415_v40 = vadd.f32 %v372_v39, %v192_v36  ;;  %v437_v12 = vadd.f32 %v436_v63, %v233_v3 }
  0xd4   :  { %v2829_v43 = vmul.f32 -1.442695, %v415_v40 }
  0xd6   :  { %2876 = vpow2.f32 %v2829_v43 }
  0xdc   :  { %v2877_v52 = vpop.eup %2876 }
  0xdd   :  { %v419_v55 = vadd.f32 1.0, %v2877_v52 }
  0xdf   :  { %2878 = vrcp.f32 %v419_v55  ;;  %v431_v16 = vand.u32 2147483648, %v419_v55  ;;  %v429_v20 = vand.u32 2147483647, %v419_v55  ;;  %vm425_vm6 = vweird.f32 %v419_v55 }
  0xe0   :  { %2880 = vtanh.f32 %v437_v12 }
  0xe1   :  { %v432_v1 = vor.u32 1.1754944e-38, %v431_v16  ;;  %vm430_vm8 = vcmp.eq.f32.partialorder %v429_v20, 8.507059e+37 }
  0xe5   :  { %v2879_v5 = vpop.eup %2878 }
  0xe6   :  { %v421_v7 = vmul.f32 %v2879_v5, %v419_v55  ;;  %vm426_vm5 = vweird.f32 %v2879_v5  ;;  %v2881_v31 = vpop.eup %2880 }
  0xe7   :  { %vm427_vm7 = vmor %vm425_vm6, %vm426_vm5 }
  0xe8   :  { %v422_v14 = vsub.f32 1.0, %v421_v7 }
  0xea   :  { %v423_v18 = vmul.f32 %v2879_v5, %v422_v14 }
  0xec   :  { %v424_v23 = vadd.f32 %v2879_v5, %v423_v18 }
  0xee   :  { %v428_v24 = vsel %vm427_vm7, %v2879_v5, %v424_v23 }
  0xef   :  { %v433_v27 = vsel %vm430_vm8, %v432_v1, %v428_v24 }
  0xf0   :  { %v439_v29 = vsub.f32 1.0, %v433_v27  ;;  %v441_v35 = vmul.f32 0.0, %v433_v27 }
  0xf2   :  { %v440_v34 = vmul.f32 %v2881_v31, %v439_v29 }
  0xf4   :  { %v3661_v36 = vadd.f32 %v441_v35, %v440_v34 }
  0xf6   :  { %4939 = vst [vmem:[#allocation16_spill] sm:$0xff] %v3661_v36  ;;  %512 = vmatmul.f32.vlgmr.msra.gmra.mxu1 %v3661_v36  ;;  %532 = vmatmul.f32.vlgmr.msrb.gmra.mxu2 %v3661_v36 }
  0xf7   :  { %552 = vmatmul.f32.vlgmr.msra.gmra.mxu3 %v3661_v36  ;;  %860 = vmatpush.msra.mxu1 %v3289_v8  ;;  %v194_v8 = vpop.f32.mrf.mxu1 }
  0xf8   :  { %v195_v40 = vadd.f32 %v194_v8, %v3649_v32 }
  0xf9   :  { %861 = vmatpush.msra.mxu1 %v3294_v10  ;;  %v235_v10 = vpop.f32.mrf.mxu2 }
  0xfa   :  { %v236_v16 = vadd.f32 %v235_v10, %v3658_v58 }
  0xfb   :  { %862 = vmatpush.msra.mxu1 %v3297_v11 }
  0xfd   :  { %863 = vmatpush.msra.mxu1 %v3311_v15 }
  0xff   :  { %864 = vmatpush.msra.mxu1 %v3318_v17  ;;  %v3682_v11 = vpop.f32.mrf.mxu1 }
 0x101   :  { %865 = vmatpush.msra.mxu1 %v3324_v19  ;;  %v3684_v15 = vpop.f32.mrf.mxu2 }
 0x103   :  { %866 = vmatpush.msra.mxu1 %v3330_v21 }
 0x105   :  { %867 = vmatpush.msra.mxu1 %v3349_v26 }
 0x107   :  { %868 = vmatpush.msra.mxu1 %v3359_v28  ;;  %v3686_v17 = vpop.f32.mrf.mxu1 }
 0x109   :  { %869 = vmatpush.msra.mxu1 %v3365_v30  ;;  %v3688_v19 = vpop.f32.mrf.mxu2 }
 0x10b   :  { %870 = vmatpush.msra.mxu1 %v3376_v33 }
 0x10d   :  { %871 = vmatpush.msra.mxu1 %v3393_v38 }
 0x10f   :  { %872 = vmatpush.msra.mxu1 %v3406_v41  ;;  %v3690_v21 = vpop.f32.mrf.mxu1 }
 0x111   :  { %873 = vmatpush.msra.mxu1 %v3413_v44  ;;  %v3692_v26 = vpop.f32.mrf.mxu2 }
 0x113   :  { %874 = vmatpush.msra.mxu1 %v3421_v46  ;;  %v154_v46 = vadd.f32 %v3623_v0, %v3628_v2 }
 0x115   :  { %875 = vmatpush.msra.mxu1 %v3433_v49 }
 0x117   :  { %v3694_v28 = vpop.f32.mrf.mxu1 }
 0x118   :  { %4940 = vst [vmem:[#allocation17_spill] sm:$0xff] %v3694_v28 }
 0x119   :  { %v3696_v30 = vpop.f32.mrf.mxu2 }
 0x11a   :  { %4941 = vst [vmem:[#allocation18_spill] sm:$0xff] %v3696_v30 }
 0x11f   :  { %v3698_v33 = vpop.f32.mrf.mxu1 }
 0x120   :  { %4942 = vst [vmem:[#allocation19_spill] sm:$0xff] %v3698_v33 }
 0x121   :  { %v3700_v38 = vpop.f32.mrf.mxu2 }
 0x122   :  { %4943 = vst [vmem:[#allocation20_spill] sm:$0xff] %v3700_v38  ;;  %v3933_v38 = vld [vmem:[#allocation4 + $0x8] sm:$0xff] }
 0x123   :  { %4948 = vst [vmem:[#allocation25_spill] sm:$0xff] %v3933_v38 }
 0x127   :  { %v3702_v41 = vpop.f32.mrf.mxu1 }
 0x128   :  { %4944 = vst [vmem:[#allocation21_spill] sm:$0xff] %v3702_v41 }
 0x129   :  { %v3704_v44 = vpop.f32.mrf.mxu2 }
 0x12a   :  { %4945 = vst [vmem:[#allocation22_spill] sm:$0xff] %v3704_v44  ;;  %v3910_v44 = vld [vmem:[#allocation4 + $0x58] sm:$0xff] }
 0x173   :  { %v513_v49 = vpop.f32.mrf.mxu1 }
 0x174   :  { %v556_v37 = vadd.f32 %v513_v49, %v154_v46 }
 0x176   :  { %v2830_v39 = vmul.f32 -1.442695, %v556_v37 }
 0x178   :  { %2882 = vpow2.f32 %v2830_v39  ;;  %v3717_v39 = vld [vmem:[#allocation4 + $0x168] sm:$0xff] }
 0x179   :  { %v533_v43 = vpop.f32.mrf.mxu2  ;;  %820 = vmatpush.msrb.mxu3 %v3717_v39  ;;  %982 = vmatpush.msrb.mxu2 %v3717_v39 }
 0x17a   :  { %v576_v45 = vadd.f32 %v533_v43, %v195_v40  ;;  %v553_v60 = vpop.f32.mrf.mxu3  ;;  %v3721_v40 = vld [vmem:[#allocation4 + $0x150] sm:$0xff]  ;;  %v3726_v43 = vld [vmem:[#allocation4 + $0x138] sm:$0xff] }
 0x17b   :  { %v596_v14 = vadd.f32 %v3655_v50, %v553_v60  ;;  %821 = vmatpush.msrb.mxu3 %v3721_v40  ;;  %983 = vmatpush.msrb.mxu2 %v3721_v40  ;;  %v3769_v60 = vld [vmem:[#allocation4 + $0x78] sm:$0xff] }
 0x17c   :  { %v2831_v47 = vmul.f32 -1.442695, %v576_v45  ;;  %v3731_v45 = vld [vmem:[#allocation4 + $0x120] sm:$0xff] }
 0x17d   :  { %822 = vmatpush.msrb.mxu3 %v3726_v43  ;;  %984 = vmatpush.msrb.mxu2 %v3726_v43 }
 0x17e   :  { %v2883_v48 = vpop.eup %2882  ;;  %2884 = vpow2.f32 %v2831_v47  ;;  %v3736_v47 = vld [vmem:[#allocation4 + $0x108] sm:$0xff] }
 0x17f   :  { %v560_v51 = vadd.f32 1.0, %v2883_v48  ;;  %823 = vmatpush.msrb.mxu3 %v3731_v45  ;;  %985 = vmatpush.msrb.mxu2 %v3731_v45  ;;  %v3741_v48 = vld [vmem:[#allocation4 + $0xf0] sm:$0xff] }
 0x181   :  { %2886 = vrcp.f32 %v560_v51  ;;  %v572_v0 = vand.u32 2147483648, %v560_v51  ;;  %v570_v57 = vand.u32 2147483647, %v560_v51  ;;  %vm566_vm10 = vweird.f32 %v560_v51  ;;  %824 = vmatpush.msrb.mxu3 %v3736_v47  ;;  %986 = vmatpush.msrb.mxu2 %v3736_v47 }
 0x183   :  { %v573_v5 = vor.u32 1.1754944e-38, %v572_v0  ;;  %vm571_vm12 = vcmp.eq.f32.partialorder %v570_v57, 8.507059e+37  ;;  %825 = vmatpush.msrb.mxu3 %v3741_v48  ;;  %987 = vmatpush.msrb.mxu2 %v3741_v48  ;;  %v3764_v57 = vld [vmem:[#allocation4 + $0x90] sm:$0xff] }
 0x184   :  { %v2885_v52 = vpop.eup %2884 }
 0x185   :  { %v580_v53 = vadd.f32 1.0, %v2885_v52  ;;  %v3751_v52 = vld [vmem:[#allocation4 + $0xc0] sm:$0xff] }
 0x187   :  { %v2887_v54 = vpop.eup %2886  ;;  %2888 = vrcp.f32 %v580_v53  ;;  %v592_v23 = vand.u32 2147483648, %v580_v53  ;;  %v590_v24 = vand.u32 2147483647, %v580_v53  ;;  %vm586_vm14 = vweird.f32 %v580_v53 }
 0x188   :  { %v562_v55 = vmul.f32 %v2887_v54, %v560_v51  ;;  %vm567_vm9 = vweird.f32 %v2887_v54  ;;  %v3746_v51 = vld [vmem:[#allocation4 + $0xd8] sm:$0xff] }
 0x189   :  { %vm568_vm11 = vmor %vm566_vm10, %vm567_vm9  ;;  %v593_v31 = vor.u32 1.1754944e-38, %v592_v23  ;;  %vm591_vm1 = vcmp.eq.f32.partialorder %v590_v24, 8.507059e+37  ;;  %826 = vmatpush.msrb.mxu3 %v3746_v51  ;;  %988 = vmatpush.msrb.mxu2 %v3746_v51 }
 0x18a   :  { %v563_v56 = vsub.f32 1.0, %v562_v55 }
 0x18b   :  { %827 = vmatpush.msrb.mxu3 %v3751_v52  ;;  %989 = vmatpush.msrb.mxu2 %v3751_v52 }
 0x18c   :  { %v564_v2 = vmul.f32 %v2887_v54, %v563_v56 }
 0x18d   :  { %v2889_v59 = vpop.eup %2888 }
 0x18e   :  { %v582_v63 = vmul.f32 %v2889_v59, %v580_v53  ;;  %v565_v3 = vadd.f32 %v2887_v54, %v564_v2  ;;  %vm587_vm13 = vweird.f32 %v2889_v59  ;;  %v198_v53 = vadd.f32 %v3682_v11, %v3649_v32 }
 0x18f   :  { %vm588_vm15 = vmor %vm586_vm14, %vm587_vm13 }
 0x190   :  { %v583_v7 = vsub.f32 1.0, %v582_v63  ;;  %v569_v12 = vsel %vm568_vm11, %v2887_v54, %v565_v3  ;;  %v3758_v54 = vld [vmem:[#allocation4 + $0xa8] sm:$0xff]  ;;  %v3781_v3 = vld [vmem:[#allocation4 + $0x50] sm:$0xff] }
 0x191   :  { %v574_v18 = vsel %vm571_vm12, %v573_v5, %v569_v12  ;;  %828 = vmatpush.msrb.mxu3 %v3758_v54  ;;  %990 = vmatpush.msrb.mxu2 %v3758_v54  ;;  %v3779_v63 = vld [vmem:[#allocation4 + $0x48] sm:$0xff]  ;;  %v3786_v5 = vld [vmem:[#allocation4 + $0x30] sm:$0xff] }
 0x192   :  { %v584_v20 = vmul.f32 %v2889_v59, %v583_v7  ;;  %v597_v1 = vmul.f32 %v596_v14, %v574_v18  ;;  %852 = vmatpush.msrb.mxu0 %v3781_v3  ;;  %v3788_v7 = vld [vmem:[#allocation4 + $0x38] sm:$0xff] }
 0x193   :  { %829 = vmatpush.msrb.mxu3 %v3764_v57  ;;  %991 = vmatpush.msrb.mxu2 %v3764_v57  ;;  %v3794_v14 = vld [vmem:[#allocation4 + $0x18] sm:$0xff] }
 0x194   :  { %v585_v27 = vadd.f32 %v2889_v59, %v584_v20  ;;  %v598_v29 = vadd.f32 %v597_v1, %v236_v16  ;;  %853 = vmatpush.msrb.mxu0 %v3788_v7  ;;  %v3800_v20 = vld [vmem:[#allocation4] sm:$0xff] }
 0x195   :  { %830 = vmatpush.msrb.mxu3 %v3769_v60  ;;  %992 = vmatpush.msrb.mxu2 %v3769_v60 }
 0x196   :  { %v589_v34 = vsel %vm588_vm15, %v2889_v59, %v585_v27  ;;  %2890 = vtanh.f32 %v598_v29  ;;  %854 = vmatpush.msrb.mxu0 %v3511_v61 }
 0x197   :  { %v594_v35 = vsel %vm591_vm1, %v593_v31, %v589_v34 }
 0x198   :  { %v600_v8 = vsub.f32 1.0, %v594_v35  ;;  %v602_v10 = vmul.f32 %v594_v35, %v3661_v36  ;;  %855 = vmatpush.msrb.mxu0 %v3518_v62 }
 0x19c   :  { %v2891_v46 = vpop.eup %2890 }
 0x19d   :  { %v601_v49 = vmul.f32 %v2891_v46, %v600_v8 }
 0x19f   :  { %v3712_v37 = vadd.f32 %v602_v10, %v601_v49 }
 0x1a1   :  { %4946 = vst [vmem:[#allocation23_spill] sm:$0xff] %v3712_v37  ;;  %674 = vmatmul.f32.vlgmr.msra.gmra.mxu0 %v3712_v37  ;;  %694 = vmatmul.f32.vlgmr.msrb.gmra.mxu1 %v3712_v37 }
 0x1a2   :  { %714 = vmatmul.f32.vlgmr.msra.gmra.mxu2 %v3712_v37  ;;  %1144 = vmatpush.msrb.mxu1 %v3717_v39 }
 0x1a4   :  { %1145 = vmatpush.msrb.mxu1 %v3721_v40 }
 0x1a6   :  { %1146 = vmatpush.msrb.mxu1 %v3726_v43 }
 0x1a8   :  { %1147 = vmatpush.msrb.mxu1 %v3731_v45 }
 0x1aa   :  { %1148 = vmatpush.msrb.mxu1 %v3736_v47 }
 0x1ac   :  { %1149 = vmatpush.msrb.mxu1 %v3741_v48 }
 0x1ae   :  { %1150 = vmatpush.msrb.mxu1 %v3746_v51 }
 0x1b0   :  { %1151 = vmatpush.msrb.mxu1 %v3751_v52 }
 0x1b2   :  { %1152 = vmatpush.msrb.mxu1 %v3758_v54 }
 0x1b4   :  { %1153 = vmatpush.msrb.mxu1 %v3764_v57 }
 0x1b6   :  { %1154 = vmatpush.msrb.mxu1 %v3769_v60 }
 0x21e   :  { %v675_v55 = vpop.f32.mrf.mxu0  ;;  %v695_v56 = vpop.f32.mrf.mxu1 }
 0x21f   :  { %v718_v0 = vadd.f32 %v675_v55, %v3634_v6  ;;  %v738_v2 = vadd.f32 %v695_v56, %v198_v53  ;;  %v3774_v6 = vld [vmem:[#allocation4 + $0x60] sm:$0xff] }
 0x220   :  { %831 = vmatpush.msrb.mxu3 %v3774_v6  ;;  %993 = vmatpush.msrb.mxu2 %v3774_v6 }
 0x221   :  { %v2832_v11 = vmul.f32 -1.442695, %v718_v0  ;;  %v2833_v59 = vmul.f32 -1.442695, %v738_v2  ;;  %1155 = vmatpush.msrb.mxu1 %v3774_v6  ;;  %v239_v2 = vadd.f32 %v3684_v15, %v3658_v58  ;;  %v3817_v15 = vld [vmem:[#allocation4 + $0x170] sm:$0xff] }
 0x222   :  { %832 = vmatpush.msrb.mxu3 %v3779_v63  ;;  %994 = vmatpush.msrb.mxu2 %v3779_v63 }
 0x223   :  { %2892 = vpow2.f32 %v2832_v11  ;;  %1156 = vmatpush.msrb.mxu1 %v3779_v63 }
 0x224   :  { %2894 = vpow2.f32 %v2833_v59  ;;  %833 = vmatpush.msrb.mxu3 %v3786_v5  ;;  %995 = vmatpush.msrb.mxu2 %v3786_v5 }
 0x225   :  { %1157 = vmatpush.msrb.mxu1 %v3786_v5  ;;  %v715_v49 = vpop.f32.mrf.mxu2 }
 0x226   :  { %834 = vmatpush.msrb.mxu3 %v3794_v14  ;;  %996 = vmatpush.msrb.mxu2 %v3794_v14  ;;  %v758_v55 = vadd.f32 %v3655_v50, %v715_v49  ;;  %v3833_v49 = vld [vmem:[#allocation4 + $0x148] sm:$0xff] }
 0x227   :  { %1158 = vmatpush.msrb.mxu1 %v3794_v14 }
 0x228   :  { %835 = vmatpush.msrb.mxu3 %v3800_v20  ;;  %997 = vmatpush.msrb.mxu2 %v3800_v20 }
 0x229   :  { %v2893_v12 = vpop.eup %2892  ;;  %1159 = vmatpush.msrb.mxu1 %v3800_v20 }
 0x22a   :  { %v2895_v16 = vpop.eup %2894  ;;  %v722_v18 = vadd.f32 1.0, %v2893_v12  ;;  %1002 = vmatpush.msra.mxu3 %v3817_v15  ;;  %1164 = vmatpush.msra.mxu2 %v3817_v15 }
 0x22b   :  { %v742_v23 = vadd.f32 1.0, %v2895_v16 }
 0x22c   :  { %2896 = vrcp.f32 %v722_v18  ;;  %v734_v34 = vand.u32 2147483648, %v722_v18  ;;  %v732_v8 = vand.u32 2147483647, %v722_v18  ;;  %vm728_vm3 = vweird.f32 %v722_v18 }
 0x22d   :  { %2898 = vrcp.f32 %v742_v23  ;;  %v754_v11 = vand.u32 2147483648, %v742_v23  ;;  %vm748_vm7 = vweird.f32 %v742_v23  ;;  %v752_v12 = vand.u32 2147483647, %v742_v23 }
 0x22e   :  { %v735_v62 = vor.u32 1.1754944e-38, %v734_v34  ;;  %vm733_vm5 = vcmp.eq.f32.partialorder %v732_v8, 8.507059e+37  ;;  %v3825_v8 = vld [vmem:[#allocation4 + $0x160] sm:$0xff] }
 0x22f   :  { %vm753_vm9 = vcmp.eq.f32.partialorder %v752_v12, 8.507059e+37  ;;  %v3865_v12 = vld [vmem:[#allocation4 + $0xe0] sm:$0xff] }
 0x232   :  { %v2897_v1 = vpop.eup %2896 }
 0x233   :  { %v2899_v24 = vpop.eup %2898  ;;  %v724_v61 = vmul.f32 %v2897_v1, %v722_v18  ;;  %vm729_vm2 = vweird.f32 %v2897_v1  ;;  %v755_v18 = vor.u32 1.1754944e-38, %v754_v11 }
 0x234   :  { %v744_v27 = vmul.f32 %v2899_v24, %v742_v23  ;;  %vm730_vm4 = vmor %vm728_vm3, %vm729_vm2  ;;  %vm749_vm6 = vweird.f32 %v2899_v24  ;;  %v3819_v23 = vld [vmem:[#allocation4 + $0x178] sm:$0xff] }
 0x235   :  { %v725_v29 = vsub.f32 1.0, %v724_v61  ;;  %vm750_vm8 = vmor %vm748_vm7, %vm749_vm6  ;;  %1022 = vmatpush.msra.mxu0 %v3819_v23 }
 0x236   :  { %v745_v31 = vsub.f32 1.0, %v744_v27 }
 0x237   :  { %v726_v35 = vmul.f32 %v2897_v1, %v725_v29  ;;  %1023 = vmatpush.msra.mxu0 %v3825_v8 }
 0x238   :  { %v746_v46 = vmul.f32 %v2899_v24, %v745_v31 }
 0x239   :  { %v727_v10 = vadd.f32 %v2897_v1, %v726_v35  ;;  %1024 = vmatpush.msra.mxu0 %v3833_v49 }
 0x23a   :  { %v747_v56 = vadd.f32 %v2899_v24, %v746_v46  ;;  %v3831_v46 = vld [vmem:[#allocation4 + $0x140] sm:$0xff] }
 0x23b   :  { %v731_v53 = vsel %vm730_vm4, %v2897_v1, %v727_v10  ;;  %v3839_v10 = vld [vmem:[#allocation4 + $0x128] sm:$0xff] }
 0x23c   :  { %v736_v0 = vsel %vm733_vm5, %v735_v62, %v731_v53  ;;  %v751_v61 = vsel %vm750_vm8, %v2899_v24, %v747_v56  ;;  %v3823_v24 = vld [vmem:[#allocation4 + $0x158] sm:$0xff]  ;;  %v3841_v62 = vld [vmem:[#allocation4 + $0x130] sm:$0xff]  ;;  %v201_v56 = vadd.f32 %v3686_v17, %v3649_v32 }
 0x23d   :  { %v759_v59 = vmul.f32 %v758_v55, %v736_v0  ;;  %v756_v1 = vsel %vm753_vm9, %v755_v18, %v751_v61  ;;  %1003 = vmatpush.msra.mxu3 %v3823_v24  ;;  %1165 = vmatpush.msra.mxu2 %v3823_v24  ;;  %v3847_v53 = vld [vmem:[#allocation4 + $0x110] sm:$0xff]  ;;  %v3849_v55 = vld [vmem:[#allocation4 + $0x118] sm:$0xff]  ;;  %v3873_v61 = vld [vmem:[#allocation4 + $0xc8] sm:$0xff] }
 0x23e   :  { %v762_v27 = vsub.f32 1.0, %v756_v1  ;;  %v764_v34 = vmul.f32 %v756_v1, %v3712_v37  ;;  %1025 = vmatpush.msra.mxu0 %v3841_v62  ;;  %v3857_v0 = vld [vmem:[#allocation4 + $0xf8] sm:$0xff]  ;;  %v3875_v18 = vld [vmem:[#allocation4 + $0xd0] sm:$0xff] }
 0x23f   :  { %v760_v16 = vadd.f32 %v759_v59, %v239_v2  ;;  %1004 = vmatpush.msra.mxu3 %v3831_v46  ;;  %1166 = vmatpush.msra.mxu2 %v3831_v46  ;;  %v3859_v2 = vld [vmem:[#allocation4 + $0x100] sm:$0xff]  ;;  %v3881_v1 = vld [vmem:[#allocation4 + $0xb0] sm:$0xff] }
 0x240   :  { %1026 = vmatpush.msra.mxu0 %v3849_v55 }
 0x241   :  { %2900 = vtanh.f32 %v760_v16  ;;  %1005 = vmatpush.msra.mxu3 %v3839_v10  ;;  %1167 = vmatpush.msra.mxu2 %v3839_v10  ;;  %v3867_v16 = vld [vmem:[#allocation4 + $0xe8] sm:$0xff] }
 0x242   :  { %1027 = vmatpush.msra.mxu0 %v3859_v2 }
 0x243   :  { %1006 = vmatpush.msra.mxu3 %v3847_v53  ;;  %1168 = vmatpush.msra.mxu2 %v3847_v53 }
 0x244   :  { %1028 = vmatpush.msra.mxu0 %v3867_v16 }
 0x245   :  { %1007 = vmatpush.msra.mxu3 %v3857_v0  ;;  %1169 = vmatpush.msra.mxu2 %v3857_v0 }
 0x246   :  { %1029 = vmatpush.msra.mxu0 %v3875_v18 }
 0x247   :  { %v2901_v29 = vpop.eup %2900  ;;  %1008 = vmatpush.msra.mxu3 %v3865_v12  ;;  %1170 = vmatpush.msra.mxu2 %v3865_v12 }
 0x248   :  { %v763_v31 = vmul.f32 %v2901_v29, %v762_v27  ;;  %v3883_v27 = vld [vmem:[#allocation4 + $0xb8] sm:$0xff] }
 0x249   :  { %1009 = vmatpush.msra.mxu3 %v3873_v61  ;;  %1171 = vmatpush.msra.mxu2 %v3873_v61 }
 0x24a   :  { %v3812_v35 = vadd.f32 %v764_v34, %v763_v31  ;;  %1030 = vmatpush.msra.mxu0 %v3883_v27  ;;  %v3890_v34 = vld [vmem:[#allocation4 + $0x98] sm:$0xff] }
 0x24b   :  { %1010 = vmatpush.msra.mxu3 %v3881_v1  ;;  %1172 = vmatpush.msra.mxu2 %v3881_v1 }
 0x24c   :  { %836 = vmatmul.f32.vlgmr.msrb.gmra.mxu3 %v3812_v35  ;;  %856 = vmatmul.f32.vlgmr.msrb.gmra.mxu0 %v3812_v35 }
 0x24d   :  { %876 = vmatmul.f32.vlgmr.msra.gmra.mxu1 %v3812_v35  ;;  %1011 = vmatpush.msra.mxu3 %v3890_v34 }
 0x24e   :  { %1326 = vmatpush.msra.mxu1 %v3817_v15  ;;  %1173 = vmatpush.msra.mxu2 %v3890_v34 }
 0x250   :  { %1327 = vmatpush.msra.mxu1 %v3823_v24 }
 0x252   :  { %1328 = vmatpush.msra.mxu1 %v3831_v46 }
 0x254   :  { %1329 = vmatpush.msra.mxu1 %v3839_v10 }
 0x256   :  { %1330 = vmatpush.msra.mxu1 %v3847_v53 }
 0x258   :  { %1331 = vmatpush.msra.mxu1 %v3857_v0 }
 0x25a   :  { %1332 = vmatpush.msra.mxu1 %v3865_v12 }
 0x25c   :  { %1333 = vmatpush.msra.mxu1 %v3873_v61 }
 0x25e   :  { %1334 = vmatpush.msra.mxu1 %v3881_v1 }
 0x260   :  { %1335 = vmatpush.msra.mxu1 %v3890_v34 }
 0x2c9   :  { %v857_v11 = vpop.f32.mrf.mxu0 }
 0x2ca   :  { %v900_v59 = vadd.f32 %v857_v11, %v201_v56  ;;  %v3892_v56 = vld [vmem:[#allocation4 + $0xa0] sm:$0xff]  ;;  %v877_v28 = vpop.f32.mrf.mxu1 }
 0x2cb   :  { %1031 = vmatpush.msra.mxu0 %v3892_v56 }
 0x2cc   :  { %v2835_v17 = vmul.f32 -1.442695, %v900_v59  ;;  %v3898_v59 = vld [vmem:[#allocation4 + $0x80] sm:$0xff] }
 0x2cd   :  { %1012 = vmatpush.msra.mxu3 %v3898_v59  ;;  %1174 = vmatpush.msra.mxu2 %v3898_v59 }
 0x2ce   :  { %2902 = vpow2.f32 %v2835_v17  ;;  %v3900_v17 = vld [vmem:[#allocation4 + $0x88] sm:$0xff]  ;;  %1336 = vmatpush.msra.mxu1 %v3898_v59 }
 0x2cf   :  { %v837_v29 = vpop.f32.mrf.mxu3  ;;  %1032 = vmatpush.msra.mxu0 %v3900_v17  ;;  %1013 = vmatpush.msra.mxu3 %v3902_v42 }
 0x2d0   :  { %v880_v31 = vadd.f32 %v837_v29, %v3640_v13  ;;  %v3908_v13 = vld [vmem:[#allocation4 + $0x70] sm:$0xff]  ;;  %1175 = vmatpush.msra.mxu2 %v3902_v42  ;;  %1337 = vmatpush.msra.mxu1 %v3902_v42 }
 0x2d1   :  { %1033 = vmatpush.msra.mxu0 %v3908_v13  ;;  %1014 = vmatpush.msra.mxu3 %v3781_v3 }
 0x2d2   :  { %v2834_v11 = vmul.f32 -1.442695, %v880_v31  ;;  %1176 = vmatpush.msra.mxu2 %v3781_v3  ;;  %1338 = vmatpush.msra.mxu1 %v3781_v3 }
 0x2d3   :  { %1034 = vmatpush.msra.mxu0 %v3910_v44  ;;  %1015 = vmatpush.msra.mxu3 %v3788_v7 }
 0x2d4   :  { %v2903_v29 = vpop.eup %2902  ;;  %2904 = vpow2.f32 %v2834_v11  ;;  %v3925_v11 = vld [vmem:[#allocation4 + $0x20] sm:$0xff]  ;;  %1177 = vmatpush.msra.mxu2 %v3788_v7  ;;  %1339 = vmatpush.msra.mxu1 %v3788_v7 }
 0x2d5   :  { %v3914_v31 = vadd.f32 1.0, %v2903_v29  ;;  %4947 = vst [vmem:[#allocation24_spill] sm:$0xff] %v3925_v11  ;;  %v3927_v29 = vld [vmem:[#allocation4 + $0x28] sm:$0xff]  ;;  %1035 = vmatpush.msra.mxu0 %v3918_v9  ;;  %1016 = vmatpush.msra.mxu3 %v3925_v11 }
 0x2d6   :  { %1178 = vmatpush.msra.mxu2 %v3925_v11  ;;  %1340 = vmatpush.msra.mxu1 %v3925_v11 }
 0x2d7   :  { %2906 = vrcp.f32 %v3914_v31  ;;  %1036 = vmatpush.msra.mxu0 %v3927_v29  ;;  %1017 = vmatpush.msra.mxu3 %v3933_v38  ;;  %vm910_vm15 = vweird.f32 %v3914_v31 }
 0x2d8   :  { %1179 = vmatpush.msra.mxu2 %v3933_v38  ;;  %1341 = vmatpush.msra.mxu1 %v3933_v38 }
 0x2d9   :  { %1037 = vmatpush.msra.mxu0 %v3935_v4  ;;  %1184 = vmatpush.msrb.mxu3 %v3819_v23 }
 0x2da   :  { %v2905_v41 = vpop.eup %2904 }
 0x2db   :  { %v884_v33 = vadd.f32 1.0, %v2905_v41  ;;  %1306 = vmatpush.msrb.mxu0 %v3717_v39  ;;  %1185 = vmatpush.msrb.mxu3 %v3825_v8 }
 0x2dd   :  { %2908 = vrcp.f32 %v884_v33  ;;  %v2907_v3 = vpop.eup %2906  ;;  %1307 = vmatpush.msrb.mxu0 %v3721_v40  ;;  %1186 = vmatpush.msrb.mxu3 %v3833_v49  ;;  %v896_v38 = vand.u32 2147483648, %v884_v33  ;;  %v894_v40 = vand.u32 2147483647, %v884_v33  ;;  %vm890_vm11 = vweird.f32 %v884_v33 }
 0x2de   :  { %v906_v41 = vmul.f32 %v2907_v3, %v3914_v31  ;;  %vm911_vm14 = vweird.f32 %v2907_v3 }
 0x2df   :  { %1308 = vmatpush.msrb.mxu0 %v3726_v43  ;;  %1187 = vmatpush.msrb.mxu3 %v3841_v62  ;;  %vm895_vm13 = vcmp.eq.f32.partialorder %v894_v40, 8.507059e+37  ;;  %vm912_vm1 = vmor %vm910_vm15, %vm911_vm14 }
 0x2e0   :  { %v907_v37 = vsub.f32 1.0, %v906_v41 }
 0x2e1   :  { %1309 = vmatpush.msrb.mxu0 %v3731_v45  ;;  %1188 = vmatpush.msrb.mxu3 %v3849_v55  ;;  %v897_v45 = vor.u32 1.1754944e-38, %v896_v38 }
 0x2e2   :  { %v908_v30 = vmul.f32 %v2907_v3, %v907_v37 }
 0x2e3   :  { %v2909_v7 = vpop.eup %2908  ;;  %1310 = vmatpush.msrb.mxu0 %v3736_v47  ;;  %1189 = vmatpush.msrb.mxu3 %v3859_v2 }
 0x2e4   :  { %v886_v11 = vmul.f32 %v2909_v7, %v884_v33  ;;  %vm891_vm10 = vweird.f32 %v2909_v7  ;;  %v909_v41 = vadd.f32 %v2907_v3, %v908_v30  ;;  %v916_v33 = vand.u32 2147483648, %v3914_v31 }
 0x2e5   :  { %1311 = vmatpush.msrb.mxu0 %v3741_v48  ;;  %1190 = vmatpush.msrb.mxu3 %v3867_v16  ;;  %vm892_vm12 = vmor %vm890_vm11, %vm891_vm10 }
 0x2e6   :  { %v887_v39 = vsub.f32 1.0, %v886_v11  ;;  %v920_v11 = vadd.f32 %v3655_v50, %v877_v28  ;;  %v914_v28 = vand.u32 2147483647, %v3914_v31  ;;  %v913_v38 = vsel %vm912_vm1, %v2907_v3, %v909_v41 }
 0x2e7   :  { %1312 = vmatpush.msrb.mxu0 %v3746_v51  ;;  %1191 = vmatpush.msrb.mxu3 %v3875_v18  ;;  %v917_v51 = vor.u32 1.1754944e-38, %v916_v33 }
 0x2e8   :  { %v888_v36 = vmul.f32 %v2909_v7, %v887_v39  ;;  %vm915_vm2 = vcmp.eq.f32.partialorder %v914_v28, 8.507059e+37 }
 0x2e9   :  { %1313 = vmatpush.msrb.mxu0 %v3751_v52  ;;  %1192 = vmatpush.msrb.mxu3 %v3883_v27 }
 0x2ea   :  { %v889_v43 = vadd.f32 %v2909_v7, %v888_v36  ;;  %v242_v36 = vadd.f32 %v3688_v19, %v3658_v58  ;;  %v918_v19 = vsel %vm915_vm2, %v917_v51, %v913_v38 }
 0x2eb   :  { %1314 = vmatpush.msrb.mxu0 %v3758_v54  ;;  %1193 = vmatpush.msrb.mxu3 %v3892_v56  ;;  %v924_v52 = vsub.f32 1.0, %v918_v19 }
 0x2ec   :  { %v893_v47 = vsel %vm892_vm12, %v2909_v7, %v889_v43 }
 0x2ed   :  { %v898_v37 = vsel %vm895_vm13, %v897_v45, %v893_v47  ;;  %1315 = vmatpush.msrb.mxu0 %v3764_v57  ;;  %1194 = vmatpush.msrb.mxu3 %v3900_v17  ;;  %v926_v57 = vmul.f32 %v918_v19, %v3812_v35 }
 0x2ee   :  { %v921_v48 = vmul.f32 %v920_v11, %v898_v37  ;;  %v245_v37 = vadd.f32 %v3692_v26, %v3658_v58  ;;  %v1631_v26 = vld [vmem:[#allocation7 + $0x168] sm:$0xff] }
 0x2ef   :  { %1316 = vmatpush.msrb.mxu0 %v3769_v60  ;;  %1195 = vmatpush.msrb.mxu3 %v3908_v13 }
 0x2f0   :  { %v922_v30 = vadd.f32 %v921_v48, %v242_v36 }
 0x2f1   :  { %1317 = vmatpush.msrb.mxu0 %v3774_v6  ;;  %1196 = vmatpush.msrb.mxu3 %v3910_v44  ;;  %v204_v6 = vadd.f32 %v3690_v21, %v3649_v32 }
 0x2f2   :  { %2910 = vtanh.f32 %v922_v30 }
 0x2f3   :  { %1318 = vmatpush.msrb.mxu0 %v3779_v63  ;;  %1197 = vmatpush.msrb.mxu3 %v3918_v9 }
 0x2f5   :  { %1319 = vmatpush.msrb.mxu0 %v3786_v5  ;;  %1198 = vmatpush.msrb.mxu3 %v3927_v29 }
 0x2f7   :  { %1320 = vmatpush.msrb.mxu0 %v3794_v14  ;;  %1199 = vmatpush.msrb.mxu3 %v3935_v4 }
 0x2f8   :  { %v2911_v54 = vpop.eup %2910 }
 0x2f9   :  { %v925_v31 = vmul.f32 %v2911_v54, %v924_v52  ;;  %1321 = vmatpush.msrb.mxu0 %v3800_v20 }
 0x2fb   :  { %v3984_v60 = vadd.f32 %v926_v57, %v925_v31  ;;  %v1604_v31 = vld [vmem:[#allocation7 + $0x90] sm:$0xff] }
 0x2fd   :  { %998 = vmatmul.f32.vlgmr.msrb.gmra.mxu2 %v3984_v60  ;;  %1018 = vmatmul.f32.vlgmr.msra.gmra.mxu3 %v3984_v60 }
 0x2fe   :  { %1038 = vmatmul.f32.vlgmr.msra.gmra.mxu0 %v3984_v60  ;;  %1346 = vmatpush.msrb.mxu2 %v3819_v23 }
 0x2ff   :  { %1488 = vmatpush.msra.mxu0 %v3817_v15 }
 0x300   :  { %1347 = vmatpush.msrb.mxu2 %v3825_v8 }
 0x301   :  { %1489 = vmatpush.msra.mxu0 %v3823_v24 }
 0x302   :  { %1348 = vmatpush.msrb.mxu2 %v3833_v49 }
 0x303   :  { %1490 = vmatpush.msra.mxu0 %v3831_v46 }
 0x304   :  { %1349 = vmatpush.msrb.mxu2 %v3841_v62 }
 0x305   :  { %1491 = vmatpush.msra.mxu0 %v3839_v10 }
 0x306   :  { %1350 = vmatpush.msrb.mxu2 %v3849_v55 }
 0x307   :  { %1492 = vmatpush.msra.mxu0 %v3847_v53 }
 0x308   :  { %1351 = vmatpush.msrb.mxu2 %v3859_v2 }
 0x309   :  { %1493 = vmatpush.msra.mxu0 %v3857_v0 }
 0x30a   :  { %1352 = vmatpush.msrb.mxu2 %v3867_v16 }
 0x30b   :  { %1494 = vmatpush.msra.mxu0 %v3865_v12 }
 0x30c   :  { %1353 = vmatpush.msrb.mxu2 %v3875_v18 }
 0x30d   :  { %1495 = vmatpush.msra.mxu0 %v3873_v61 }
 0x30e   :  { %1354 = vmatpush.msrb.mxu2 %v3883_v27 }
 0x30f   :  { %1496 = vmatpush.msra.mxu0 %v3881_v1 }
 0x310   :  { %1355 = vmatpush.msrb.mxu2 %v3892_v56 }
 0x311   :  { %1497 = vmatpush.msra.mxu0 %v3890_v34 }
 0x312   :  { %1356 = vmatpush.msrb.mxu2 %v3900_v17 }
 0x313   :  { %1498 = vmatpush.msra.mxu0 %v3898_v59 }
 0x314   :  { %1357 = vmatpush.msrb.mxu2 %v3908_v13 }
 0x315   :  { %1499 = vmatpush.msra.mxu0 %v3902_v42 }
 0x316   :  { %1358 = vmatpush.msrb.mxu2 %v3910_v44 }
 0x318   :  { %1359 = vmatpush.msrb.mxu2 %v3918_v9 }
 0x31a   :  { %1360 = vmatpush.msrb.mxu2 %v3927_v29 }
 0x31c   :  { %1361 = vmatpush.msrb.mxu2 %v3935_v4 }
 0x37b   :  { %v1039_v7 = vpop.f32.mrf.mxu0 }
 0x37c   :  { %v1082_v45 = vadd.f32 %v3655_v50, %v1039_v7 }
 0x380   :  { %v999_v63 = vpop.f32.mrf.mxu2  ;;  %v1019_v5 = vpop.f32.mrf.mxu3 }
 0x381   :  { %v1042_v14 = vadd.f32 %v999_v63, %v3644_v22  ;;  %v1062_v20 = vadd.f32 %v1019_v5, %v204_v6  ;;  %v1598_v5 = vld [vmem:[#allocation7 + $0x60] sm:$0xff] }
 0x383   :  { %v2836_v15 = vmul.f32 -1.442695, %v1042_v14  ;;  %v2837_v24 = vmul.f32 -1.442695, %v1062_v20  ;;  %v1595_v14 = vld [vmem:[#allocation7 + $0x48] sm:$0xff]  ;;  %v1592_v20 = vld [vmem:[#allocation7 + $0x30] sm:$0xff] }
 0x385   :  { %2912 = vpow2.f32 %v2836_v15 }
 0x386   :  { %2914 = vpow2.f32 %v2837_v24  ;;  %v1589_v24 = vld [vmem:[#allocation7 + $0x18] sm:$0xff] }
 0x38b   :  { %v2913_v46 = vpop.eup %2912 }
 0x38c   :  { %v2915_v42 = vpop.eup %2914  ;;  %v1046_v10 = vadd.f32 1.0, %v2913_v46 }
 0x38d   :  { %v1066_v53 = vadd.f32 1.0, %v2915_v42  ;;  %v1586_v42 = vld [vmem:[#allocation7] sm:$0xff] }
 0x38e   :  { %2916 = vrcp.f32 %v1046_v10  ;;  %v1058_v34 = vand.u32 2147483648, %v1046_v10  ;;  %v1056_v22 = vand.u32 2147483647, %v1046_v10  ;;  %vm1052_vm4 = vweird.f32 %v1046_v10 }
 0x38f   :  { %2918 = vrcp.f32 %v1066_v53  ;;  %v1078_v33 = vand.u32 2147483648, %v1066_v53  ;;  %vm1072_vm8 = vweird.f32 %v1066_v53  ;;  %v1076_v48 = vand.u32 2147483647, %v1066_v53 }
 0x390   :  { %v1059_v43 = vor.u32 1.1754944e-38, %v1058_v34  ;;  %vm1057_vm6 = vcmp.eq.f32.partialorder %v1056_v22, 8.507059e+37 }
 0x391   :  { %v1079_v38 = vor.u32 1.1754944e-38, %v1078_v33  ;;  %vm1077_vm10 = vcmp.eq.f32.partialorder %v1076_v48, 8.507059e+37 }
 0x394   :  { %v2917_v0 = vpop.eup %2916 }
 0x395   :  { %v2919_v12 = vpop.eup %2918  ;;  %v1048_v61 = vmul.f32 %v2917_v0, %v1046_v10  ;;  %vm1053_vm3 = vweird.f32 %v2917_v0 }
 0x396   :  { %v1068_v1 = vmul.f32 %v2919_v12, %v1066_v53  ;;  %vm1054_vm5 = vmor %vm1052_vm4, %vm1053_vm3  ;;  %vm1073_vm7 = vweird.f32 %v2919_v12 }
 0x397   :  { %v1049_v21 = vsub.f32 1.0, %v1048_v61  ;;  %vm1074_vm9 = vmor %vm1072_vm8, %vm1073_vm7 }
 0x398   :  { %v1069_v59 = vsub.f32 1.0, %v1068_v1 }
 0x399   :  { %v1050_v3 = vmul.f32 %v2917_v0, %v1049_v21 }
 0x39a   :  { %v1070_v39 = vmul.f32 %v2919_v12, %v1069_v59 }
 0x39b   :  { %v1051_v40 = vadd.f32 %v2917_v0, %v1050_v3 }
 0x39c   :  { %v1071_v41 = vadd.f32 %v2919_v12, %v1070_v39 }
 0x39d   :  { %v1055_v11 = vsel %vm1054_vm5, %v2917_v0, %v1051_v40  ;;  %v4054_v40 = vld [vmem:[%s4904_s4] ss:$0 sm:$0xff] }
 0x39e   :  { %v1060_v47 = vsel %vm1057_vm6, %v1059_v43, %v1055_v11  ;;  %v1075_v30 = vsel %vm1074_vm9, %v2919_v12, %v1071_v41 }
 0x39f   :  { %v1083_v36 = vmul.f32 %v1082_v45, %v1060_v47  ;;  %v1080_v51 = vsel %vm1077_vm10, %v1079_v38, %v1075_v30  ;;  %v4950_v45 = vld [vmem:[#allocation18_spill] sm:$0xff] }
 0x3a0   :  { %v1086_v50 = vsub.f32 1.0, %v1080_v51  ;;  %v1088_v54 = vmul.f32 %v1080_v51, %v3984_v60  ;;  %v248_v11 = vadd.f32 %v4950_v45, %v3658_v58  ;;  %v1621_v45 = vld [vmem:[#allocation7 + $0x118] sm:$0xff] }
 0x3a1   :  { %v1084_v28 = vadd.f32 %v1083_v36, %v245_v37 }
 0x3a3   :  { %2920 = vtanh.f32 %v1084_v28 }
 0x3a9   :  { %v2921_v19 = vpop.eup %2920 }
 0x3aa   :  { %v1087_v52 = vmul.f32 %v2921_v19, %v1086_v50 }
 0x3ac   :  { %v4027_v57 = vadd.f32 %v1088_v54, %v1087_v52 }
 0x3ae   :  { %1160 = vmatmul.f32.vlgmr.msrb.gmra.mxu1 %v4027_v57  ;;  %1180 = vmatmul.f32.vlgmr.msra.gmra.mxu2 %v4027_v57 }
 0x3af   :  { %1200 = vmatmul.f32.vlgmr.msrb.gmra.mxu3 %v4027_v57  ;;  %1508 = vmatpush.msrb.mxu1 %v3819_v23  ;;  %v1628_v23 = vld [vmem:[#allocation7 + $0x150] sm:$0xff] }
 0x3b0   :  { %1642 = vmatpush.msra.mxu2 %v1631_v26 }
 0x3b1   :  { %1509 = vmatpush.msrb.mxu1 %v3825_v8  ;;  %v1625_v8 = vld [vmem:[#allocation7 + $0x138] sm:$0xff] }
 0x3b2   :  { %1643 = vmatpush.msra.mxu2 %v1628_v23  ;;  %v4951_v23 = vld [vmem:[#allocation16_spill] sm:$0xff] }
 0x3b3   :  { %1510 = vmatpush.msrb.mxu1 %v3833_v49  ;;  %v1622_v49 = vld [vmem:[#allocation7 + $0x120] sm:$0xff] }
 0x3b4   :  { %1644 = vmatpush.msra.mxu2 %v1625_v8  ;;  %v4952_v8 = vld [vmem:[#allocation23_spill] sm:$0xff] }
 0x3b5   :  { %1511 = vmatpush.msrb.mxu1 %v3841_v62  ;;  %v1619_v62 = vld [vmem:[#allocation7 + $0x108] sm:$0xff] }
 0x3b6   :  { %1645 = vmatpush.msra.mxu2 %v1622_v49  ;;  %v1465_v49 = vld [vmem:[#allocation4 + $0x168] sm:$0xff] }
 0x3b7   :  { %1512 = vmatpush.msrb.mxu1 %v3849_v55  ;;  %1468 = vmatpush.msra.mxu3 %v1465_v49  ;;  %v1612_v49 = vld [vmem:[#allocation7 + $0xd0] sm:$0xff] }
 0x3b8   :  { %1646 = vmatpush.msra.mxu2 %v1619_v62  ;;  %v1462_v62 = vld [vmem:[#allocation4 + $0x150] sm:$0xff] }
 0x3b9   :  { %1513 = vmatpush.msrb.mxu1 %v3859_v2  ;;  %1469 = vmatpush.msra.mxu3 %v1462_v62  ;;  %v4109_v62 = vld [vmem:[#allocation9 + $0x60] sm:$0xff] }
 0x3bb   :  { %1514 = vmatpush.msrb.mxu1 %v3867_v16  ;;  %v1613_v16 = vld [vmem:[#allocation7 + $0xd8] sm:$0xff] }
 0x3bd   :  { %1515 = vmatpush.msrb.mxu1 %v3875_v18 }
 0x3bf   :  { %1516 = vmatpush.msrb.mxu1 %v3883_v27  ;;  %v1610_v27 = vld [vmem:[#allocation7 + $0xc0] sm:$0xff] }
 0x3c1   :  { %1517 = vmatpush.msrb.mxu1 %v3892_v56 }
 0x3c3   :  { %1518 = vmatpush.msrb.mxu1 %v3900_v17 }
 0x3c5   :  { %1519 = vmatpush.msrb.mxu1 %v3908_v13  ;;  %v1607_v13 = vld [vmem:[#allocation7 + $0xa8] sm:$0xff] }
 0x3c7   :  { %1520 = vmatpush.msrb.mxu1 %v3910_v44  ;;  %v1616_v44 = vld [vmem:[#allocation7 + $0xf0] sm:$0xff] }
 0x3c8   :  { %1647 = vmatpush.msra.mxu2 %v1616_v44  ;;  %v1453_v44 = vld [vmem:[#allocation4 + $0x108] sm:$0xff] }
 0x3c9   :  { %1521 = vmatpush.msrb.mxu1 %v3918_v9 }
 0x3ca   :  { %1648 = vmatpush.msra.mxu2 %v1613_v16  ;;  %v1447_v16 = vld [vmem:[#allocation4 + $0xd8] sm:$0xff] }
 0x3cb   :  { %1522 = vmatpush.msrb.mxu1 %v3927_v29 }
 0x3cc   :  { %1649 = vmatpush.msra.mxu2 %v1610_v27  ;;  %v1438_v27 = vld [vmem:[#allocation4 + $0x90] sm:$0xff] }
 0x3cd   :  { %1523 = vmatpush.msrb.mxu1 %v3935_v4  ;;  %v4949_v4 = vld [vmem:[#allocation17_spill] sm:$0xff] }
 0x3ce   :  { %v207_v18 = vadd.f32 %v4949_v4, %v3649_v32  ;;  %1650 = vmatpush.msra.mxu2 %v1607_v13  ;;  %v1444_v4 = vld [vmem:[#allocation4 + $0xc0] sm:$0xff]  ;;  %v4071_v13 = vld [vmem:[#allocation9 + $0x168] sm:$0xff] }
 0x3d0   :  { %1651 = vmatpush.msra.mxu2 %v1604_v31  ;;  %v1430_v31 = vld [vmem:[#allocation4 + $0x50] sm:$0xff] }
 0x3d1   :  { %1500 = vmatpush.msra.mxu0 %v1430_v31 }
 0x42b   :  { %v1161_v55 = vpop.f32.mrf.mxu1 }
 0x42c   :  { %v1204_v2 = vadd.f32 %v1161_v55, %v3647_v25  ;;  %v1601_v25 = vld [vmem:[#allocation7 + $0x78] sm:$0xff] }
 0x42d   :  { %1652 = vmatpush.msra.mxu2 %v1601_v25  ;;  %v1459_v55 = vld [vmem:[#allocation4 + $0x138] sm:$0xff]  ;;  %v1426_v25 = vld [vmem:[#allocation4 + $0x30] sm:$0xff] }
 0x42e   :  { %v2838_v9 = vmul.f32 -1.442695, %v1204_v2  ;;  %v1456_v2 = vld [vmem:[#allocation4 + $0x120] sm:$0xff]  ;;  %1470 = vmatpush.msra.mxu3 %v1459_v55  ;;  %v1608_v55 = vld [vmem:[#allocation7 + $0xb0] sm:$0xff] }
 0x42f   :  { %1653 = vmatpush.msra.mxu2 %v1598_v5  ;;  %v4077_v5 = vld [vmem:[#allocation9 + $0x138] sm:$0xff] }
 0x430   :  { %2922 = vpow2.f32 %v2838_v9  ;;  %1471 = vmatpush.msra.mxu3 %v1456_v2  ;;  %v1450_v9 = vld [vmem:[#allocation4 + $0xf0] sm:$0xff]  ;;  %v1609_v2 = vld [vmem:[#allocation7 + $0xb8] sm:$0xff] }
 0x431   :  { %v1181_v56 = vpop.f32.mrf.mxu2  ;;  %1654 = vmatpush.msra.mxu2 %v1595_v14  ;;  %v1423_v14 = vld [vmem:[#allocation4 + $0x18] sm:$0xff] }
 0x432   :  { %v1224_v17 = vadd.f32 %v1181_v56, %v207_v18  ;;  %v1201_v34 = vpop.f32.mrf.mxu3  ;;  %1472 = vmatpush.msra.mxu3 %v1453_v44  ;;  %v1441_v18 = vld [vmem:[#allocation4 + $0xa8] sm:$0xff]  ;;  %v1435_v56 = vld [vmem:[#allocation4 + $0x78] sm:$0xff] }
 0x433   :  { %1655 = vmatpush.msra.mxu2 %v1592_v20  ;;  %v1244_v43 = vadd.f32 %v4054_v40, %v1201_v34  ;;  %v4953_v20 = vld [vmem:[#allocation24_spill] sm:$0xff]  ;;  %v4112_v44 = vld [vmem:[#allocation9 + $0x48] sm:$0xff] }
 0x434   :  { %v2839_v29 = vmul.f32 -1.442695, %v1224_v17  ;;  %1473 = vmatpush.msra.mxu3 %v1450_v9  ;;  %v1432_v17 = vld [vmem:[#allocation4 + $0x60] sm:$0xff]  ;;  %v4091_v34 = vld [vmem:[#allocation9 + $0xd8] sm:$0xff] }
 0x435   :  { %1656 = vmatpush.msra.mxu2 %v1589_v24  ;;  %v1420_v24 = vld [vmem:[#allocation4] sm:$0xff]  ;;  %v1605_v9 = vld [vmem:[#allocation7 + $0x98] sm:$0xff] }
 0x436   :  { %v2923_v6 = vpop.eup %2922  ;;  %2924 = vpow2.f32 %v2839_v29  ;;  %1474 = vmatpush.msra.mxu3 %v1447_v16  ;;  %v1429_v29 = vld [vmem:[#allocation4 + $0x48] sm:$0xff]  ;;  %v1606_v16 = vld [vmem:[#allocation7 + $0xa0] sm:$0xff] }
 0x437   :  { %v1208_v63 = vadd.f32 1.0, %v2923_v6  ;;  %1657 = vmatpush.msra.mxu2 %v1586_v42  ;;  %v4074_v6 = vld [vmem:[#allocation9 + $0x150] sm:$0xff] }
 0x438   :  { %1475 = vmatpush.msra.mxu3 %v1444_v4  ;;  %v1632_v42 = vld [vmem:[#allocation7 + $0x170] sm:$0xff] }
 0x439   :  { %2926 = vrcp.f32 %v1208_v63  ;;  %v1220_v12 = vand.u32 2147483648, %v1208_v63  ;;  %v1218_v1 = vand.u32 2147483647, %v1208_v63  ;;  %vm1214_vm12 = vweird.f32 %v1208_v63  ;;  %v4115_v4 = vld [vmem:[#allocation9 + $0x30] sm:$0xff] }
 0x43a   :  { %1476 = vmatpush.msra.mxu3 %v1441_v18 }
 0x43b   :  { %v1221_v22 = vor.u32 1.1754944e-38, %v1220_v12  ;;  %vm1219_vm14 = vcmp.eq.f32.partialorder %v1218_v1, 8.507059e+37  ;;  %v1630_v12 = vld [vmem:[#allocation7 + $0x160] sm:$0xff] }
 0x43c   :  { %v2925_v15 = vpop.eup %2924  ;;  %1477 = vmatpush.msra.mxu3 %v1438_v27  ;;  %v1626_v1 = vld [vmem:[#allocation7 + $0x140] sm:$0xff] }
 0x43d   :  { %v1228_v46 = vadd.f32 1.0, %v2925_v15  ;;  %v4081_v15 = vld [vmem:[#allocation9 + $0x120] sm:$0xff] }
 0x43e   :  { %1478 = vmatpush.msra.mxu3 %v1435_v56  ;;  %v1602_v27 = vld [vmem:[#allocation7 + $0x80] sm:$0xff]  ;;  %v1603_v56 = vld [vmem:[#allocation7 + $0x88] sm:$0xff] }
 0x43f   :  { %v2927_v10 = vpop.eup %2926  ;;  %2928 = vrcp.f32 %v1228_v46  ;;  %v1240_v37 = vand.u32 2147483648, %v1228_v46  ;;  %v1238_v33 = vand.u32 2147483647, %v1228_v46  ;;  %vm1234_vm1 = vweird.f32 %v1228_v46 }
 0x440   :  { %v1210_v53 = vmul.f32 %v2927_v10, %v1208_v63  ;;  %vm1215_vm11 = vweird.f32 %v2927_v10  ;;  %1479 = vmatpush.msra.mxu3 %v1432_v17  ;;  %v1427_v63 = vld [vmem:[#allocation4 + $0x38] sm:$0xff] }
 0x441   :  { %vm1216_vm13 = vmor %vm1214_vm12, %vm1215_vm11  ;;  %v1241_v30 = vor.u32 1.1754944e-38, %v1240_v37  ;;  %vm1239_vm3 = vcmp.eq.f32.partialorder %v1238_v33, 8.507059e+37  ;;  %1501 = vmatpush.msra.mxu0 %v1427_v63  ;;  %v4956_v37 = vld [vmem:[#allocation14_spill] sm:$0xff]  ;;  %v4118_v17 = vld [vmem:[#allocation9 + $0x18] sm:$0xff] }
 0x442   :  { %v1211_v0 = vsub.f32 1.0, %v1210_v53  ;;  %1480 = vmatpush.msra.mxu3 %v1429_v29  ;;  %v4085_v53 = vld [vmem:[#allocation9 + $0x108] sm:$0xff]  ;;  %v1600_v63 = vld [vmem:[#allocation7 + $0x70] sm:$0xff] }
 0x443   :  { %1502 = vmatpush.msra.mxu0 %v4953_v20 }
 0x444   :  { %v1212_v61 = vmul.f32 %v2927_v10, %v1211_v0  ;;  %1481 = vmatpush.msra.mxu3 %v1426_v25  ;;  %v1629_v0 = vld [vmem:[#allocation7 + $0x158] sm:$0xff]  ;;  %v1599_v25 = vld [vmem:[#allocation7 + $0x68] sm:$0xff] }
 0x445   :  { %v2929_v21 = vpop.eup %2928 }
 0x446   :  { %v1230_v59 = vmul.f32 %v2929_v21, %v1228_v46  ;;  %v1213_v3 = vadd.f32 %v2927_v10, %v1212_v61  ;;  %vm1235_vm15 = vweird.f32 %v2929_v21  ;;  %1482 = vmatpush.msra.mxu3 %v1423_v14  ;;  %v4954_v46 = vld [vmem:[#allocation25_spill] sm:$0xff]  ;;  %v4088_v61 = vld [vmem:[#allocation9 + $0xf0] sm:$0xff] }
 0x447   :  { %vm1236_vm2 = vmor %vm1234_vm1, %vm1235_vm15  ;;  %1503 = vmatpush.msra.mxu0 %v4954_v46  ;;  %v4120_v14 = vld [vmem:[#allocation9] sm:$0xff]  ;;  %v1597_v46 = vld [vmem:[#allocation7 + $0x58] sm:$0xff] }
 0x448   :  { %v1231_v7 = vsub.f32 1.0, %v1230_v59  ;;  %v1217_v39 = vsel %vm1216_vm13, %v2927_v10, %v1213_v3  ;;  %1483 = vmatpush.msra.mxu3 %v1420_v24  ;;  %v1633_v10 = vld [vmem:[#allocation7 + $0x178] sm:$0xff]  ;;  %v1623_v59 = vld [vmem:[#allocation7 + $0x128] sm:$0xff]  ;;  %v1624_v3 = vld [vmem:[#allocation7 + $0x130] sm:$0xff]  ;;  %4957 = vst [vmem:[#allocation17_spill] sm:$0xff] %v4120_v14 }
 0x449   :  { %v1222_v47 = vsel %vm1219_vm14, %v1221_v22, %v1217_v39  ;;  %v4094_v22 = vld [vmem:[#allocation9 + $0xc0] sm:$0xff]  ;;  %v1596_v24 = vld [vmem:[#allocation7 + $0x50] sm:$0xff] }
 0x44a   :  { %v1232_v41 = vmul.f32 %v2929_v21, %v1231_v7  ;;  %v1245_v36 = vmul.f32 %v1244_v43, %v1222_v47  ;;  %1683 = vmatpush.msrb.mxu3 %v1632_v42  ;;  %v4955_v7 = vld [vmem:[#allocation19_spill] sm:$0xff]  ;;  %v1593_v42 = vld [vmem:[#allocation7 + $0x38] sm:$0xff] }
 0x44b   :  { %v210_v39 = vadd.f32 %v4955_v7, %v3649_v32  ;;  %v1620_v43 = vld [vmem:[#allocation7 + $0x110] sm:$0xff]  ;;  %v1587_v7 = vld [vmem:[#allocation7 + $0x8] sm:$0xff] }
 0x44c   :  { %v1233_v48 = vadd.f32 %v2929_v21, %v1232_v41  ;;  %v1246_v28 = vadd.f32 %v1245_v36, %v248_v11  ;;  %1684 = vmatpush.msrb.mxu3 %v1629_v0  ;;  %v4099_v11 = vld [vmem:[#allocation9 + $0xa8] sm:$0xff] }
 0x44e   :  { %v1237_v38 = vsel %vm1236_vm2, %v2929_v21, %v1233_v48  ;;  %2930 = vtanh.f32 %v1246_v28  ;;  %v1627_v21 = vld [vmem:[#allocation7 + $0x148] sm:$0xff]  ;;  %1685 = vmatpush.msrb.mxu3 %v1626_v1  ;;  %v1617_v48 = vld [vmem:[#allocation7 + $0xf8] sm:$0xff]  ;;  %v1618_v28 = vld [vmem:[#allocation7 + $0x100] sm:$0xff] }
 0x44f   :  { %v1242_v51 = vsel %vm1239_vm3, %v1241_v30, %v1237_v38  ;;  %v4103_v30 = vld [vmem:[#allocation9 + $0x90] sm:$0xff]  ;;  %v1591_v1 = vld [vmem:[#allocation7 + $0x28] sm:$0xff] }
 0x450   :  { %v1248_v50 = vsub.f32 1.0, %v1242_v51  ;;  %v1250_v54 = vmul.f32 %v1242_v51, %v4027_v57  ;;  %1686 = vmatpush.msrb.mxu3 %v1623_v59 }
 0x452   :  { %1687 = vmatpush.msrb.mxu3 %v1620_v43 }
 0x454   :  { %v2931_v19 = vpop.eup %2930  ;;  %1688 = vmatpush.msrb.mxu3 %v1617_v48 }
 0x455   :  { %v1249_v52 = vmul.f32 %v2931_v19, %v1248_v50  ;;  %v1614_v50 = vld [vmem:[#allocation7 + $0xe0] sm:$0xff]  ;;  %v1615_v19 = vld [vmem:[#allocation7 + $0xe8] sm:$0xff] }
 0x456   :  { %1689 = vmatpush.msrb.mxu3 %v1614_v50 }
 0x457   :  { %v4060_v26 = vadd.f32 %v1250_v54, %v1249_v52  ;;  %v4106_v52 = vld [vmem:[#allocation9 + $0x78] sm:$0xff]  ;;  %v1611_v54 = vld [vmem:[#allocation7 + $0xc8] sm:$0xff] }
 0x458   :  { %1690 = vmatpush.msrb.mxu3 %v1611_v54  ;;  %v4958_v54 = vld [vmem:[#allocation20_spill] sm:$0xff] }
 0x459   :  { %1322 = vmatmul.f32.vlgmr.msrb.gmra.mxu0 %v4060_v26  ;;  %1342 = vmatmul.f32.vlgmr.msra.gmra.mxu1 %v4060_v26 }
 0x45a   :  { %1362 = vmatmul.f32.vlgmr.msrb.gmra.mxu2 %v4060_v26  ;;  %1844 = vmatpush.msra.mxu1 %v4071_v13 }
 0x45b   :  { %1724 = vmatpush.msrb.mxu0 %v1633_v10  ;;  %1691 = vmatpush.msrb.mxu3 %v1608_v55  ;;  %v1594_v10 = vld [vmem:[#allocation7 + $0x40] sm:$0xff] }
 0x45c   :  { %1845 = vmatpush.msra.mxu1 %v4074_v6 }
 0x45d   :  { %1725 = vmatpush.msrb.mxu0 %v1630_v12  ;;  %1692 = vmatpush.msrb.mxu3 %v1605_v9  ;;  %v1590_v12 = vld [vmem:[#allocation7 + $0x20] sm:$0xff] }
 0x45e   :  { %1846 = vmatpush.msra.mxu1 %v4077_v5 }
 0x45f   :  { %1726 = vmatpush.msrb.mxu0 %v1627_v21  ;;  %1693 = vmatpush.msrb.mxu3 %v1602_v27 }
 0x460   :  { %1847 = vmatpush.msra.mxu1 %v4081_v15 }
 0x461   :  { %1727 = vmatpush.msrb.mxu0 %v1624_v3  ;;  %1694 = vmatpush.msrb.mxu3 %v1599_v25 }
 0x462   :  { %1658 = vmatmul.f32.vlgmr.msra.gmra.mxu2 %v4951_v23  ;;  %1848 = vmatpush.msra.mxu1 %v4085_v53 }
 0x463   :  { %1728 = vmatpush.msrb.mxu0 %v1621_v45  ;;  %1695 = vmatpush.msrb.mxu3 %v1596_v24 }
 0x464   :  { %1849 = vmatpush.msra.mxu1 %v4088_v61 }
 0x465   :  { %1729 = vmatpush.msrb.mxu0 %v1618_v28  ;;  %1696 = vmatpush.msrb.mxu3 %v1593_v42  ;;  %v4140_v42 = vld [vmem:[#allocation9 + $0x140] sm:$0xff] }
 0x466   :  { %1850 = vmatpush.msra.mxu1 %v4091_v34 }
 0x467   :  { %1730 = vmatpush.msrb.mxu0 %v1615_v19  ;;  %1697 = vmatpush.msrb.mxu3 %v1590_v12  ;;  %v4959_v12 = vmov 0.0  }
 0x468   :  { %1851 = vmatpush.msra.mxu1 %v4094_v22 }
 0x469   :  { %1731 = vmatpush.msrb.mxu0 %v1612_v49  ;;  %1698 = vmatpush.msrb.mxu3 %v1587_v7  ;;  %v251_v49 = vadd.f32 %v4958_v54, %v3658_v58  ;;  %v4182_v7 = vld [vmem:[#allocation9 + $0x80] sm:$0xff]  ;;  %v4280_v54 = vld [vmem:[#allocation9 + $0xd0] sm:$0xff] }
 0x46a   :  { %1661 = vmatmul.f32.gmra.mxu2 %v4952_v8  ;;  %1852 = vmatpush.msra.mxu1 %v4099_v11 }
 0x46b   :  { %1732 = vmatpush.msrb.mxu0 %v1609_v2 }
 0x46c   :  { %1853 = vmatpush.msra.mxu1 %v4103_v30 }
 0x46d   :  { %1733 = vmatpush.msrb.mxu0 %v1606_v16 }
 0x46e   :  { %1854 = vmatpush.msra.mxu1 %v4106_v52 }
 0x46f   :  { %1734 = vmatpush.msrb.mxu0 %v1603_v56 }
 0x470   :  { %1855 = vmatpush.msra.mxu1 %v4109_v62 }
 0x471   :  { %1735 = vmatpush.msrb.mxu0 %v1600_v63 }
 0x472   :  { %1664 = vmatmul.f32.gmra.mxu2 %v3812_v35  ;;  %1856 = vmatpush.msra.mxu1 %v4112_v44 }
 0x473   :  { %1736 = vmatpush.msrb.mxu0 %v1597_v46  ;;  %v4130_v46 = vld [vmem:[#allocation9 + $0x170] sm:$0xff] }
 0x474   :  { %1857 = vmatpush.msra.mxu1 %v4115_v4 }
 0x475   :  { %1737 = vmatpush.msrb.mxu0 %v1594_v10  ;;  %v4145_v10 = vld [vmem:[#allocation9 + $0x128] sm:$0xff] }
 0x476   :  { %1858 = vmatpush.msra.mxu1 %v4118_v17 }
 0x477   :  { %1738 = vmatpush.msrb.mxu0 %v1591_v1  ;;  %v4157_v1 = vld [vmem:[#allocation9 + $0xf8] sm:$0xff] }
 0x478   :  { %1859 = vmatpush.msra.mxu1 %v4120_v14 }
 0x47a   :  { %1667 = vmatmul.f32.gmra.mxu2 %v3984_v60 }
 0x482   :  { %1670 = vmatmul.f32.gmra.mxu2 %v4027_v57 }
 0x48a   :  { %1673 = vmatmul.f32.gmra.mxu2 %v4060_v26 }
 0x4d6   :  { %v1323_v47 = vpop.f32.mrf.mxu0  ;;  %v1343_v41 = vpop.f32.mrf.mxu1 }
 0x4d7   :  { %v1366_v36 = vadd.f32 %v1323_v47, %v4956_v37  ;;  %v1386_v33 = vadd.f32 %v1343_v41, %v210_v39  ;;  %v1588_v39 = vld [vmem:[#allocation7 + $0x10] sm:$0xff] }
 0x4d8   :  { %1739 = vmatpush.msrb.mxu0 %v1588_v39  ;;  %v4187_v39 = vld [vmem:[#allocation9 + $0x68] sm:$0xff] }
 0x4d9   :  { %v2840_v38 = vmul.f32 -1.442695, %v1366_v36  ;;  %v2841_v51 = vmul.f32 -1.442695, %v1386_v33 }
 0x4db   :  { %2932 = vpow2.f32 %v2840_v38 }
 0x4dc   :  { %2934 = vpow2.f32 %v2841_v51 }
 0x4dd   :  { %v1363_v33 = vpop.f32.mrf.mxu2 }
 0x4de   :  { %v1406_v51 = vadd.f32 %v4054_v40, %v1363_v33  ;;  %v4263_v33 = vld [vmem:[#allocation9 + $0x130] sm:$0xff] }
 0x4e1   :  { %v2933_v18 = vpop.eup %2932 }
 0x4e2   :  { %v2935_v29 = vpop.eup %2934  ;;  %v1370_v31 = vadd.f32 1.0, %v2933_v18 }
 0x4e3   :  { %v1390_v20 = vadd.f32 1.0, %v2935_v29 }
 0x4e4   :  { %2936 = vrcp.f32 %v1370_v31  ;;  %v1382_v47 = vand.u32 2147483648, %v1370_v31  ;;  %v1380_v37 = vand.u32 2147483647, %v1370_v31  ;;  %vm1376_vm5 = vweird.f32 %v1370_v31 }
 0x4e5   :  { %2938 = vrcp.f32 %v1390_v20  ;;  %v1402_v55 = vand.u32 2147483648, %v1390_v20  ;;  %vm1396_vm9 = vweird.f32 %v1390_v20  ;;  %v1400_v9 = vand.u32 2147483647, %v1390_v20 }
 0x4e6   :  { %v1383_v28 = vor.u32 1.1754944e-38, %v1382_v47  ;;  %vm1381_vm7 = vcmp.eq.f32.partialorder %v1380_v37, 8.507059e+37  ;;  %v4205_v47 = vld [vmem:[#allocation9 + $0x20] sm:$0xff] }
 0x4e7   :  { %v1403_v27 = vor.u32 1.1754944e-38, %v1402_v55  ;;  %vm1401_vm11 = vcmp.eq.f32.partialorder %v1400_v9, 8.507059e+37  ;;  %4960 = vst [vmem:[#allocation18_spill] sm:$0xff] %v4205_v47  ;;  %v4285_v55 = vld [vmem:[#allocation9 + $0xb8] sm:$0xff] }
 0x4ea   :  { %v2937_v0 = vpop.eup %2936 }
 0x4eb   :  { %v2939_v21 = vpop.eup %2938  ;;  %v1372_v59 = vmul.f32 %v2937_v0, %v1370_v31  ;;  %vm1377_vm4 = vweird.f32 %v2937_v0 }
 0x4ec   :  { %v1392_v3 = vmul.f32 %v2939_v21, %v1390_v20  ;;  %vm1378_vm6 = vmor %vm1376_vm5, %vm1377_vm4  ;;  %vm1397_vm8 = vweird.f32 %v2939_v21  ;;  %v4136_v20 = vld [vmem:[#allocation9 + $0x158] sm:$0xff] }
 0x4ed   :  { %v1373_v43 = vsub.f32 1.0, %v1372_v59  ;;  %vm1398_vm10 = vmor %vm1396_vm9, %vm1397_vm8  ;;  %v4166_v59 = vld [vmem:[#allocation9 + $0xc8] sm:$0xff] }
 0x4ee   :  { %v1393_v45 = vsub.f32 1.0, %v1392_v3  ;;  %v4177_v3 = vld [vmem:[#allocation9 + $0x98] sm:$0xff] }
 0x4ef   :  { %v1374_v41 = vmul.f32 %v2937_v0, %v1373_v43  ;;  %v4198_v43 = vld [vmem:[#allocation9 + $0x38] sm:$0xff] }
 0x4f0   :  { %v1394_v36 = vmul.f32 %v2939_v21, %v1393_v45  ;;  %v4200_v45 = vld [vmem:[#allocation9 + $0x178] sm:$0xff] }
 0x4f1   :  { %v1375_v48 = vadd.f32 %v2937_v0, %v1374_v41  ;;  %1884 = vmatpush.msrb.mxu2 %v4200_v45  ;;  %v4210_v41 = vld [vmem:[#allocation9 + $0x8] sm:$0xff] }
 0x4f2   :  { %v1395_v50 = vadd.f32 %v2939_v21, %v1394_v36  ;;  %4961 = vst [vmem:[#allocation16_spill] sm:$0xff] %v4210_v41 }
 0x4f3   :  { %v1379_v38 = vsel %vm1378_vm6, %v2937_v0, %v1375_v48  ;;  %v4150_v0 = vld [vmem:[#allocation9 + $0x110] sm:$0xff]  ;;  %v4265_v48 = vld [vmem:[#allocation9 + $0x118] sm:$0xff] }
 0x4f4   :  { %v1384_v19 = vsel %vm1381_vm7, %v1383_v28, %v1379_v38  ;;  %v1399_v18 = vsel %vm1398_vm10, %v2939_v21, %v1395_v50  ;;  %v4161_v21 = vld [vmem:[#allocation9 + $0xe0] sm:$0xff]  ;;  %v4963_v50 = vld [vmem:[#allocation15_spill] sm:$0xff] }
 0x4f5   :  { %v1407_v2 = vmul.f32 %v1406_v51, %v1384_v19  ;;  %v1404_v56 = vsel %vm1401_vm11, %v1403_v27, %v1399_v18  ;;  %v4269_v38 = vld [vmem:[#allocation9 + $0x100] sm:$0xff] }
 0x4f6   :  { %v1410_v29 = vsub.f32 1.0, %v1404_v56  ;;  %v1412_v63 = vmul.f32 %v1404_v56, %v4060_v26  ;;  %v4301_v56 = vld [vmem:[#allocation9 + $0x88] sm:$0xff] }
 0x4f7   :  { %v1408_v16 = vadd.f32 %v1407_v2, %v251_v49 }
 0x4f9   :  { %2940 = vtanh.f32 %v1408_v16  ;;  %v4297_v16 = vld [vmem:[#allocation9 + $0xa0] sm:$0xff] }
 0x4ff   :  { %v2941_v31 = vpop.eup %2940 }
 0x500   :  { %v1411_v25 = vmul.f32 %v2941_v31, %v1410_v29  ;;  %v4306_v29 = vld [vmem:[#allocation9 + $0x70] sm:$0xff] }
 0x502   :  { %v4128_v24 = vadd.f32 %v1412_v63, %v1411_v25  ;;  %v4313_v25 = vld [vmem:[#allocation9 + $0x58] sm:$0xff] }
 0x503   :  { %4964 = vst [vmem:[#allocation23_spill] sm:$0xff] %v4313_v25 }
 0x504   :  { %1484 = vmatmul.f32.vlgmr.msra.gmra.mxu3 %v4128_v24  ;;  %1504 = vmatmul.f32.vlgmr.msra.gmra.mxu0 %v4128_v24 }
 0x505   :  { %1524 = vmatmul.f32.vlgmr.msrb.gmra.mxu1 %v4128_v24  ;;  %1676 = vmatmul.f32.gmra.mxu2 %v4128_v24 }
 0x506   :  { %1864 = vmatpush.msrb.mxu1 %v4130_v46  ;;  %1955 = vmatpush.msra.mxu3 %v4071_v13 }
 0x507   :  { %1975 = vmatpush.msra.mxu0 %v4130_v46 }
 0x508   :  { %1865 = vmatpush.msrb.mxu1 %v4136_v20  ;;  %1956 = vmatpush.msra.mxu3 %v4074_v6 }
 0x509   :  { %1976 = vmatpush.msra.mxu0 %v4136_v20 }
 0x50a   :  { %1866 = vmatpush.msrb.mxu1 %v4140_v42  ;;  %1957 = vmatpush.msra.mxu3 %v4077_v5 }
 0x50b   :  { %1977 = vmatpush.msra.mxu0 %v4140_v42 }
 0x50c   :  { %1867 = vmatpush.msrb.mxu1 %v4145_v10  ;;  %1699 = vmatmul.f32.vlgmr.msrb.gmra.mxu3 %v4951_v23 }
 0x50d   :  { %1740 = vmatmul.f32.vlgmr.msrb.gmra.mxu0 %v4951_v23  ;;  %1860 = vmatmul.f32.vlgmr.msra.gmra.mxu1 %v4959_v12  ;;  %v4171_v23 = vld [vmem:[#allocation9 + $0xb0] sm:$0xff] }
 0x50e   :  { %1868 = vmatpush.msrb.mxu1 %v4150_v0  ;;  %1958 = vmatpush.msra.mxu3 %v4081_v15 }
 0x50f   :  { %1978 = vmatpush.msra.mxu0 %v4145_v10 }
 0x510   :  { %1869 = vmatpush.msrb.mxu1 %v4157_v1  ;;  %1959 = vmatpush.msra.mxu3 %v4085_v53 }
 0x511   :  { %1979 = vmatpush.msra.mxu0 %v4150_v0 }
 0x512   :  { %1870 = vmatpush.msrb.mxu1 %v4161_v21  ;;  %1960 = vmatpush.msra.mxu3 %v4088_v61 }
 0x513   :  { %1980 = vmatpush.msra.mxu0 %v4157_v1 }
 0x514   :  { %1871 = vmatpush.msrb.mxu1 %v4166_v59  ;;  %1702 = vmatmul.f32.gmra.mxu3 %v4952_v8 }
 0x515   :  { %1743 = vmatmul.f32.gmra.mxu0 %v4952_v8  ;;  %1961 = vmatpush.msra.mxu3 %v4091_v34  ;;  %v4192_v8 = vld [vmem:[#allocation9 + $0x50] sm:$0xff] }
 0x516   :  { %1872 = vmatpush.msrb.mxu1 %v4171_v23  ;;  %1981 = vmatpush.msra.mxu0 %v4161_v21 }
 0x517   :  { %1962 = vmatpush.msra.mxu3 %v4094_v22 }
 0x518   :  { %1873 = vmatpush.msrb.mxu1 %v4177_v3  ;;  %1982 = vmatpush.msra.mxu0 %v4166_v59 }
 0x519   :  { %1963 = vmatpush.msra.mxu3 %v4099_v11 }
 0x51a   :  { %1874 = vmatpush.msrb.mxu1 %v4182_v7  ;;  %1983 = vmatpush.msra.mxu0 %v4171_v23 }
 0x51b   :  { %1964 = vmatpush.msra.mxu3 %v4103_v30 }
 0x51c   :  { %1875 = vmatpush.msrb.mxu1 %v4187_v39  ;;  %1705 = vmatmul.f32.gmra.mxu3 %v3812_v35 }
 0x51d   :  { %1746 = vmatmul.f32.gmra.mxu0 %v3812_v35  ;;  %1965 = vmatpush.msra.mxu3 %v4106_v52  ;;  %v4251_v35 = vld [vmem:[#allocation9 + $0x160] sm:$0xff] }
 0x51e   :  { %1876 = vmatpush.msrb.mxu1 %v4192_v8  ;;  %1984 = vmatpush.msra.mxu0 %v4177_v3 }
 0x51f   :  { %1966 = vmatpush.msra.mxu3 %v4109_v62  ;;  %1885 = vmatpush.msrb.mxu2 %v4251_v35 }
 0x520   :  { %1877 = vmatpush.msrb.mxu1 %v4198_v43  ;;  %1985 = vmatpush.msra.mxu0 %v4182_v7 }
 0x521   :  { %1967 = vmatpush.msra.mxu3 %v4112_v44 }
 0x522   :  { %1878 = vmatpush.msrb.mxu1 %v4205_v47  ;;  %1986 = vmatpush.msra.mxu0 %v4187_v39 }
 0x523   :  { %1968 = vmatpush.msra.mxu3 %v4115_v4 }
 0x524   :  { %1879 = vmatpush.msrb.mxu1 %v4210_v41  ;;  %1708 = vmatmul.f32.gmra.mxu3 %v3984_v60 }
 0x525   :  { %1880 = vmatmul.f32.vlgmr.msrb.gmra.mxu1 %v4959_v12  ;;  %1749 = vmatmul.f32.gmra.mxu0 %v3984_v60  ;;  %v4253_v60 = vld [vmem:[#allocation9 + $0x148] sm:$0xff] }
 0x526   :  { %1995 = vmatpush.msra.mxu1 %v4200_v45  ;;  %1969 = vmatpush.msra.mxu3 %v4118_v17 }
 0x527   :  { %1987 = vmatpush.msra.mxu0 %v4192_v8  ;;  %1886 = vmatpush.msrb.mxu2 %v4253_v60 }
 0x528   :  { %1970 = vmatpush.msra.mxu3 %v4120_v14  ;;  %1996 = vmatpush.msra.mxu1 %v4251_v35 }
 0x529   :  { %1988 = vmatpush.msra.mxu0 %v4198_v43  ;;  %1887 = vmatpush.msrb.mxu2 %v4263_v33 }
 0x52a   :  { %2086 = vmatpush.msrb.mxu3 %v4130_v46  ;;  %1997 = vmatpush.msra.mxu1 %v4253_v60 }
 0x52b   :  { %1989 = vmatpush.msra.mxu0 %v4205_v47  ;;  %1888 = vmatpush.msrb.mxu2 %v4265_v48 }
 0x52c   :  { %2087 = vmatpush.msrb.mxu3 %v4136_v20  ;;  %1998 = vmatpush.msra.mxu1 %v4263_v33 }
 0x52d   :  { %1711 = vmatmul.f32.gmra.mxu3 %v4027_v57  ;;  %1752 = vmatmul.f32.gmra.mxu0 %v4027_v57  ;;  %v4962_v57 = vld [vmem:[#allocation21_spill] sm:$0xff] }
 0x52e   :  { %2088 = vmatpush.msrb.mxu3 %v4140_v42  ;;  %1990 = vmatpush.msra.mxu0 %v4210_v41 }
 0x52f   :  { %1999 = vmatpush.msra.mxu1 %v4265_v48  ;;  %1889 = vmatpush.msrb.mxu2 %v4269_v38 }
 0x530   :  { %2106 = vmatpush.msrb.mxu0 %v4200_v45  ;;  %2089 = vmatpush.msrb.mxu3 %v4145_v10 }
 0x531   :  { %2000 = vmatpush.msra.mxu1 %v4269_v38 }
 0x532   :  { %2090 = vmatpush.msrb.mxu3 %v4150_v0  ;;  %2107 = vmatpush.msrb.mxu0 %v4251_v35 }
 0x534   :  { %2091 = vmatpush.msrb.mxu3 %v4157_v1  ;;  %2108 = vmatpush.msrb.mxu0 %v4253_v60 }
 0x535   :  { %1714 = vmatmul.f32.gmra.mxu3 %v4060_v26  ;;  %1755 = vmatmul.f32.gmra.mxu0 %v4060_v26  ;;  %v213_v26 = vadd.f32 %v4962_v57, %v3649_v32  ;;  %v4274_v32 = vld [vmem:[#allocation9 + $0xe8] sm:$0xff]  ;;  %v4320_v57 = vld [vmem:[#allocation9 + $0x40] sm:$0xff] }
 0x536   :  { %2092 = vmatpush.msrb.mxu3 %v4161_v21  ;;  %2109 = vmatpush.msrb.mxu0 %v4263_v33  ;;  %4965 = vst [vmem:[#allocation24_spill] sm:$0xff] %v4320_v57 }
 0x537   :  { %1890 = vmatpush.msrb.mxu2 %v4274_v32  ;;  %2001 = vmatpush.msra.mxu1 %v4274_v32 }
 0x538   :  { %2093 = vmatpush.msrb.mxu3 %v4166_v59  ;;  %2110 = vmatpush.msrb.mxu0 %v4265_v48 }
 0x539   :  { %1891 = vmatpush.msrb.mxu2 %v4280_v54  ;;  %2002 = vmatpush.msra.mxu1 %v4280_v54 }
 0x53a   :  { %2094 = vmatpush.msrb.mxu3 %v4171_v23  ;;  %2111 = vmatpush.msrb.mxu0 %v4269_v38 }
 0x53b   :  { %1892 = vmatpush.msrb.mxu2 %v4285_v55  ;;  %2003 = vmatpush.msra.mxu1 %v4285_v55 }
 0x53c   :  { %2095 = vmatpush.msrb.mxu3 %v4177_v3  ;;  %2112 = vmatpush.msrb.mxu0 %v4274_v32 }
 0x53d   :  { %1717 = vmatmul.f32.gmra.mxu3 %v4128_v24  ;;  %1758 = vmatmul.f32.gmra.mxu0 %v4128_v24 }
 0x53e   :  { %2096 = vmatpush.msrb.mxu3 %v4182_v7  ;;  %2113 = vmatpush.msrb.mxu0 %v4280_v54 }
 0x53f   :  { %1893 = vmatpush.msrb.mxu2 %v4297_v16  ;;  %2004 = vmatpush.msra.mxu1 %v4297_v16 }
 0x540   :  { %2097 = vmatpush.msrb.mxu3 %v4187_v39  ;;  %2114 = vmatpush.msrb.mxu0 %v4285_v55 }
 0x541   :  { %1894 = vmatpush.msrb.mxu2 %v4301_v56  ;;  %2005 = vmatpush.msra.mxu1 %v4301_v56 }
 0x542   :  { %2098 = vmatpush.msrb.mxu3 %v4192_v8  ;;  %2115 = vmatpush.msrb.mxu0 %v4297_v16 }
 0x543   :  { %1895 = vmatpush.msrb.mxu2 %v4306_v29  ;;  %2006 = vmatpush.msra.mxu1 %v4306_v29 }
 0x544   :  { %2099 = vmatpush.msrb.mxu3 %v4198_v43  ;;  %2116 = vmatpush.msrb.mxu0 %v4301_v56 }
 0x545   :  { %1896 = vmatpush.msrb.mxu2 %v4313_v25  ;;  %2007 = vmatpush.msra.mxu1 %v4313_v25 }
 0x546   :  { %2100 = vmatpush.msrb.mxu3 %v4205_v47  ;;  %2117 = vmatpush.msrb.mxu0 %v4306_v29 }
 0x547   :  { %1897 = vmatpush.msrb.mxu2 %v4320_v57  ;;  %2008 = vmatpush.msra.mxu1 %v4320_v57 }
 0x548   :  { %2101 = vmatpush.msrb.mxu3 %v4210_v41  ;;  %2118 = vmatpush.msrb.mxu0 %v4313_v25 }
 0x54a   :  { %2119 = vmatpush.msrb.mxu0 %v4320_v57 }
 0x581   :  { %v1505_v37 = vpop.f32.mrf.mxu0 }
 0x582   :  { %v1548_v36 = vadd.f32 %v1505_v37, %v213_v26  ;;  %v4325_v37 = vld [vmem:[#allocation9 + $0x28] sm:$0xff] }
 0x583   :  { %4966 = vst [vmem:[#allocation25_spill] sm:$0xff] %v4325_v37  ;;  %1898 = vmatpush.msrb.mxu2 %v4325_v37  ;;  %2009 = vmatpush.msra.mxu1 %v4325_v37 }
 0x584   :  { %v2843_v28 = vmul.f32 -1.442695, %v1548_v36  ;;  %v4327_v36 = vld [vmem:[#allocation9 + $0x10] sm:$0xff]  ;;  %2120 = vmatpush.msrb.mxu0 %v4325_v37 }
 0x585   :  { %4967 = vst [vmem:[#allocation19_spill] sm:$0xff] %v4327_v36  ;;  %1899 = vmatpush.msrb.mxu2 %v4327_v36  ;;  %2010 = vmatpush.msra.mxu1 %v4327_v36 }
 0x586   :  { %2942 = vpow2.f32 %v2843_v28  ;;  %2121 = vmatpush.msrb.mxu0 %v4327_v36 }
 0x587   :  { %v1485_v51 = vpop.f32.mrf.mxu3  ;;  %2066 = vmatpush.msra.mxu2 %v4071_v13  ;;  %2177 = vmatpush.msrb.mxu1 %v4071_v13 }
 0x588   :  { %v1528_v19 = vadd.f32 %v1485_v51, %v4963_v50 }
 0x589   :  { %2067 = vmatpush.msra.mxu2 %v4074_v6  ;;  %2178 = vmatpush.msrb.mxu1 %v4074_v6 }
 0x58a   :  { %v2842_v49 = vmul.f32 -1.442695, %v1528_v19 }
 0x58b   :  { %2068 = vmatpush.msra.mxu2 %v4077_v5  ;;  %2179 = vmatpush.msrb.mxu1 %v4077_v5 }
 0x58c   :  { %v2943_v2 = vpop.eup %2942  ;;  %2944 = vpow2.f32 %v2842_v49 }
 0x58d   :  { %v4291_v9 = vadd.f32 1.0, %v2943_v2  ;;  %2069 = vmatpush.msra.mxu2 %v4081_v15  ;;  %2180 = vmatpush.msrb.mxu1 %v4081_v15 }
 0x58f   :  { %2946 = vrcp.f32 %v4291_v9  ;;  %vm1558_vm2 = vweird.f32 %v4291_v9  ;;  %2070 = vmatpush.msra.mxu2 %v4085_v53  ;;  %2181 = vmatpush.msrb.mxu1 %v4085_v53 }
 0x591   :  { %2071 = vmatpush.msra.mxu2 %v4088_v61  ;;  %2182 = vmatpush.msrb.mxu1 %v4088_v61 }
 0x592   :  { %v2945_v18 = vpop.eup %2944 }
 0x593   :  { %v1532_v27 = vadd.f32 1.0, %v2945_v18  ;;  %v1525_v18 = vpop.f32.mrf.mxu1  ;;  %2072 = vmatpush.msra.mxu2 %v4091_v34  ;;  %2183 = vmatpush.msrb.mxu1 %v4091_v34 }
 0x594   :  { %v1568_v36 = vadd.f32 %v4054_v40, %v1525_v18  ;;  %v1562_v40 = vand.u32 2147483647, %v4291_v9  ;;  %v1634_v18 = vld [vmem:[%s4907_s7] sm:$0x7] }
 0x595   :  { %2948 = vrcp.f32 %v1532_v27  ;;  %v4309_v31 = vpop.eup %2946  ;;  %v1544_v19 = vand.u32 2147483648, %v1532_v27  ;;  %v1542_v2 = vand.u32 2147483647, %v1532_v27  ;;  %vm1538_vm13 = vweird.f32 %v1532_v27  ;;  %2073 = vmatpush.msra.mxu2 %v4094_v22  ;;  %2184 = vmatpush.msrb.mxu1 %v4094_v22 }
 0x596   :  { %v1554_v63 = vmul.f32 %v4309_v31, %v4291_v9  ;;  %vm1559_vm1 = vweird.f32 %v4309_v31  ;;  %vm1563_vm4 = vcmp.eq.f32.partialorder %v1562_v40, 8.507059e+37 }
 0x597   :  { %v1545_v37 = vor.u32 1.1754944e-38, %v1544_v19  ;;  %vm1543_vm15 = vcmp.eq.f32.partialorder %v1542_v2, 8.507059e+37  ;;  %v1564_v19 = vand.u32 2147483648, %v4291_v9  ;;  %vm1560_vm3 = vmor %vm1558_vm2, %vm1559_vm1  ;;  %2074 = vmatpush.msra.mxu2 %v4099_v11  ;;  %2185 = vmatpush.msrb.mxu1 %v4099_v11 }
 0x598   :  { %v1555_v51 = vsub.f32 1.0, %v1554_v63 }
 0x599   :  { %2075 = vmatpush.msra.mxu2 %v4103_v30  ;;  %2186 = vmatpush.msrb.mxu1 %v4103_v30 }
 0x59a   :  { %v1556_v63 = vmul.f32 %v4309_v31, %v1555_v51 }
 0x59b   :  { %v2949_v26 = vpop.eup %2948  ;;  %2076 = vmatpush.msra.mxu2 %v4106_v52  ;;  %2187 = vmatpush.msrb.mxu1 %v4106_v52 }
 0x59c   :  { %v1534_v28 = vmul.f32 %v2949_v26, %v1532_v27  ;;  %vm1539_vm12 = vweird.f32 %v2949_v26  ;;  %v1557_v25 = vadd.f32 %v4309_v31, %v1556_v63  ;;  %v4968_v27 = vld [vmem:[#allocation22_spill] sm:$0xff] }
 0x59d   :  { %vm1540_vm14 = vmor %vm1538_vm13, %vm1539_vm12  ;;  %v254_v51 = vadd.f32 %v4968_v27, %v3658_v58  ;;  %v1565_v58 = vor.u32 1.1754944e-38, %v1564_v19  ;;  %2077 = vmatpush.msra.mxu2 %v4109_v62  ;;  %2188 = vmatpush.msrb.mxu1 %v4109_v62  ;;  %v4406_v19 = vperm.slane %v1634_v18, 1 }
 0x59e   :  { %v1535_v50 = vsub.f32 1.0, %v1534_v28 }
 0x59f   :  { %2078 = vmatpush.msra.mxu2 %v4112_v44  ;;  %2189 = vmatpush.msrb.mxu1 %v4112_v44  ;;  %4972 = vst [vmem:[#allocation15_spill] sm:$0xff] %v4406_v19 }
 0x5a0   :  { %v1536_v49 = vmul.f32 %v2949_v26, %v1535_v50 }
 0x5a1   :  { %2079 = vmatpush.msra.mxu2 %v4115_v4  ;;  %2190 = vmatpush.msrb.mxu1 %v4115_v4 }
 0x5a2   :  { %v1537_v28 = vadd.f32 %v2949_v26, %v1536_v49 }
 0x5a3   :  { %2080 = vmatpush.msra.mxu2 %v4118_v17  ;;  %2191 = vmatpush.msrb.mxu1 %v4118_v17 }
 0x5a4   :  { %v1541_v50 = vsel %vm1540_vm14, %v2949_v26, %v1537_v28  ;;  %v4403_v28 = vperm.slane %v1634_v18, 0 }
 0x5a5   :  { %v1546_v57 = vsel %vm1543_vm15, %v1545_v37, %v1541_v50  ;;  %v1561_v37 = vsel %vm1560_vm3, %v4309_v31, %v1557_v25  ;;  %2081 = vmatpush.msra.mxu2 %v4120_v14  ;;  %2192 = vmatpush.msrb.mxu1 %v4120_v14  ;;  %v1861_v50 = vpop.f32.mrf.mxu1 }
 0x5a6   :  { %v1569_v49 = vmul.f32 %v1568_v36, %v1546_v57  ;;  %v1566_v57 = vsel %vm1563_vm4, %v1565_v58, %v1561_v37  ;;  %4971 = vst [vmem:[#allocation21_spill] sm:$0xff] %v4403_v28 }
 0x5a7   :  { %v1572_v9 = vsub.f32 1.0, %v1566_v57  ;;  %v1574_v36 = vmul.f32 %v1566_v57, %v4128_v24  ;;  %v1659_v24 = vpop.f32.mrf.mxu2 }
 0x5a8   :  { %v1570_v26 = vadd.f32 %v1569_v49, %v254_v51  ;;  %v1660_v27 = vadd.f32 %v1659_v24, %v4403_v28  ;;  %v1700_v49 = vpop.f32.mrf.mxu3 }
 0x5a9   :  { %v1701_v58 = vadd.f32 %v1700_v49, %v4406_v19 }
 0x5aa   :  { %2950 = vtanh.f32 %v1570_v26  ;;  %v1904_v51 = vadd.f32 %v1861_v50, %v1660_v27 }
 0x5ac   :  { %v2844_v26 = vmul.f32 -1.442695, %v1904_v51 }
 0x5ad   :  { %v1881_v37 = vpop.f32.mrf.mxu1 }
 0x5ae   :  { %v1924_v57 = vadd.f32 %v1881_v37, %v1701_v58  ;;  %2952 = vpow2.f32 %v2844_v26 }
 0x5b0   :  { %v2951_v31 = vpop.eup %2950 }
 0x5b1   :  { %v1573_v25 = vmul.f32 %v2951_v31, %v1572_v9  ;;  %v2845_v9 = vmul.f32 -1.442695, %v1924_v57 }
 0x5b3   :  { %v1575_v2 = vadd.f32 %v1574_v36, %v1573_v25  ;;  %2954 = vpow2.f32 %v2845_v9 }
 0x5b4   :  { %v2953_v25 = vpop.eup %2952 }
 0x5b5   :  { %1679 = vmatmul.f32.gmra.mxu2 %v1575_v2  ;;  %1720 = vmatmul.f32.gmra.mxu3 %v1575_v2  ;;  %v1908_v36 = vadd.f32 1.0, %v2953_v25  ;;  %v4422_v25 = vld [vmem:[%s4908_s8] ss:$0 sm:$0xff] }
 0x5b6   :  { %1761 = vmatmul.f32.gmra.mxu0 %v1575_v2 }
 0x5b7   :  { %2956 = vrcp.f32 %v1908_v36  ;;  %v1920_v9 = vand.u32 2147483648, %v1908_v36  ;;  %vm1914_vm6 = vweird.f32 %v1908_v36 }
 0x5b9   :  { %v2955_v2 = vpop.eup %2954  ;;  %v1921_v28 = vor.u32 1.1754944e-38, %v1920_v9 }
 0x5ba   :  { %v1928_v50 = vadd.f32 1.0, %v2955_v2  ;;  %v1918_v2 = vand.u32 2147483647, %v1908_v36 }
 0x5bc   :  { %2958 = vrcp.f32 %v1928_v50  ;;  %vm1919_vm8 = vcmp.eq.f32.partialorder %v1918_v2, 8.507059e+37  ;;  %v1940_v14 = vand.u32 2147483648, %v1928_v50  ;;  %vm1934_vm10 = vweird.f32 %v1928_v50 }
 0x5bd   :  { %1900 = vmatmul.f32.vlgmr.msrb.gmra.mxu2 %v4959_v12  ;;  %v4396_v12 = vpop.f32.mrf.mxu2  ;;  %v2957_v27 = vpop.eup %2956 }
 0x5be   :  { %2197 = vmatpush.msrb.mxu2 %v4130_v46  ;;  %4969 = vst [vmem:[#allocation14_spill] sm:$0xff] %v4396_v12  ;;  %vm1915_vm5 = vweird.f32 %v2957_v27  ;;  %v1741_v12 = vpop.f32.mrf.mxu0 }
 0x5bf   :  { %vm1916_vm7 = vmor %vm1914_vm6, %vm1915_vm5 }
 0x5c0   :  { %2198 = vmatpush.msrb.mxu2 %v4136_v20 }
 0x5c2   :  { %2199 = vmatpush.msrb.mxu2 %v4140_v42 }
 0x5c4   :  { %2200 = vmatpush.msrb.mxu2 %v4145_v10 }
 0x5c5   :  { %v4401_v63 = vpop.f32.mrf.mxu2 }
 0x5c6   :  { %2201 = vmatpush.msrb.mxu2 %v4150_v0  ;;  %4970 = vst [vmem:[#allocation20_spill] sm:$0xff] %v4401_v63  ;;  %v2959_v63 = vpop.eup %2958 }
 0x5c7   :  { %v1930_v37 = vmul.f32 %v2959_v63, %v1928_v50  ;;  %vm1935_vm9 = vweird.f32 %v2959_v63 }
 0x5c8   :  { %2202 = vmatpush.msrb.mxu2 %v4157_v1  ;;  %vm1936_vm11 = vmor %vm1934_vm10, %vm1935_vm9 }
 0x5c9   :  { %v1931_v57 = vsub.f32 1.0, %v1930_v37 }
 0x5ca   :  { %2203 = vmatpush.msrb.mxu2 %v4161_v21 }
 0x5cc   :  { %2204 = vmatpush.msrb.mxu2 %v4166_v59 }
 0x5cd   :  { %v4408_v40 = vpop.f32.mrf.mxu2 }
 0x5ce   :  { %2205 = vmatpush.msrb.mxu2 %v4171_v23  ;;  %4973 = vst [vmem:[#allocation22_spill] sm:$0xff] %v4408_v40  ;;  %v1910_v40 = vmul.f32 %v2957_v27, %v1908_v36  ;;  %v1938_v36 = vand.u32 2147483647, %v1928_v50 }
 0x5d0   :  { %2206 = vmatpush.msrb.mxu2 %v4177_v3  ;;  %v1911_v49 = vsub.f32 1.0, %v1910_v40  ;;  %vm1939_vm12 = vcmp.eq.f32.partialorder %v1938_v36, 8.507059e+37  ;;  %v4994_v36 = vld [vmem:[#allocation14_spill] sm:$0xff] }
 0x5d2   :  { %2207 = vmatpush.msrb.mxu2 %v4182_v7  ;;  %v1912_v26 = vmul.f32 %v2957_v27, %v1911_v49 }
 0x5d4   :  { %2208 = vmatpush.msrb.mxu2 %v4187_v39 }
 0x5d5   :  { %v4411_v31 = vpop.f32.mrf.mxu2 }
 0x5d6   :  { %2209 = vmatpush.msrb.mxu2 %v4192_v8  ;;  %4974 = vst [vmem:[#allocation26_spill] sm:$0xff] %v4411_v31  ;;  %v1913_v31 = vadd.f32 %v2957_v27, %v1912_v26 }
 0x5d8   :  { %2210 = vmatpush.msrb.mxu2 %v4198_v43  ;;  %v1917_v40 = vsel %vm1916_vm7, %v2957_v27, %v1913_v31  ;;  %v1941_v31 = vor.u32 1.1754944e-38, %v1940_v14 }
 0x5d9   :  { %v1922_v26 = vsel %vm1919_vm8, %v1921_v28, %v1917_v40 }
 0x5da   :  { %2211 = vmatpush.msrb.mxu2 %v4205_v47 }
 0x5dc   :  { %2212 = vmatpush.msrb.mxu2 %v4210_v41 }
 0x5dd   :  { %v4413_v24 = vpop.f32.mrf.mxu2 }
 0x5de   :  { %4975 = vst [vmem:[#allocation27_spill] sm:$0xff] %v4413_v24  ;;  %v1932_v24 = vmul.f32 %v2959_v63, %v1931_v57 }
 0x5e5   :  { %v4415_v51 = vpop.f32.mrf.mxu2 }
 0x5e6   :  { %4976 = vst [vmem:[#allocation28_spill] sm:$0xff] %v4415_v51  ;;  %v4424_v51 = vperm.slane %v1634_v18, 2 }
 0x5e8   :  { %v1742_v19 = vadd.f32 %v1741_v12, %v4424_v51 }
 0x638   :  { %v4417_v58 = vpop.f32.mrf.mxu2 }
 0x639   :  { %4977 = vst [vmem:[#allocation29_spill] sm:$0xff] %v4417_v58  ;;  %v1933_v58 = vadd.f32 %v2959_v63, %v1932_v24  ;;  %v4992_v24 = vld [vmem:[#allocation15_spill] sm:$0xff] }
 0x63b   :  { %v1937_v18 = vsel %vm1936_vm11, %v2959_v63, %v1933_v58 }
 0x63c   :  { %v1942_v27 = vsel %vm1939_vm12, %v1941_v31, %v1937_v18 }
 0x63d   :  { %v1948_v9 = vsub.f32 1.0, %v1942_v27 }
 0x640   :  { %v1901_v49 = vpop.f32.mrf.mxu2 }
 0x641   :  { %v1944_v37 = vadd.f32 %v4422_v25, %v1901_v49  ;;  %v1950_v49 = vmul.f32 0.0, %v1942_v27 }
 0x643   :  { %v1945_v41 = vmul.f32 %v1944_v37, %v1922_v26  ;;  %v4993_v26 = vld [vmem:[#allocation21_spill] sm:$0xff] }
 0x645   :  { %v1946_v57 = vadd.f32 %v1945_v41, %v1742_v19 }
 0x647   :  { %2960 = vtanh.f32 %v1946_v57  ;;  %v1663_v57 = vadd.f32 %v4994_v36, %v4993_v26 }
 0x64d   :  { %v2961_v2 = vpop.eup %2960 }
 0x64e   :  { %v1949_v47 = vmul.f32 %v2961_v2, %v1948_v9 }
 0x650   :  { %v4428_v28 = vadd.f32 %v1950_v49, %v1949_v47 }
 0x652   :  { %1971 = vmatmul.f32.vlgmr.msra.gmra.mxu3 %v4428_v28  ;;  %1991 = vmatmul.f32.vlgmr.msra.gmra.mxu0 %v4428_v28 }
 0x653   :  { %2011 = vmatmul.f32.vlgmr.msra.gmra.mxu1 %v4428_v28  ;;  %2217 = vmatpush.msra.mxu3 %v4200_v45 }
 0x654   :  { %2288 = vmatpush.msra.mxu0 %v4071_v13  ;;  %2308 = vmatpush.msra.mxu1 %v4130_v46  ;;  %v4978_v13 = vld [vmem:[#allocation23_spill] sm:$0xff] }
 0x655   :  { %2218 = vmatpush.msra.mxu3 %v4251_v35 }
 0x656   :  { %2289 = vmatpush.msra.mxu0 %v4074_v6  ;;  %2309 = vmatpush.msra.mxu1 %v4136_v20  ;;  %v4979_v6 = vld [vmem:[#allocation24_spill] sm:$0xff] }
 0x657   :  { %2219 = vmatpush.msra.mxu3 %v4253_v60 }
 0x658   :  { %2290 = vmatpush.msra.mxu0 %v4077_v5  ;;  %2310 = vmatpush.msra.mxu1 %v4140_v42  ;;  %v4980_v5 = vld [vmem:[#allocation25_spill] sm:$0xff] }
 0x659   :  { %2220 = vmatpush.msra.mxu3 %v4263_v33 }
 0x65a   :  { %2291 = vmatpush.msra.mxu0 %v4081_v15  ;;  %2311 = vmatpush.msra.mxu1 %v4145_v10  ;;  %v4981_v15 = vld [vmem:[#allocation18_spill] sm:$0xff] }
 0x65b   :  { %2221 = vmatpush.msra.mxu3 %v4265_v48 }
 0x65c   :  { %2292 = vmatpush.msra.mxu0 %v4085_v53  ;;  %2312 = vmatpush.msra.mxu1 %v4150_v0  ;;  %v4982_v53 = vld [vmem:[#allocation19_spill] sm:$0xff] }
 0x65d   :  { %2222 = vmatpush.msra.mxu3 %v4269_v38 }
 0x65e   :  { %2293 = vmatpush.msra.mxu0 %v4088_v61  ;;  %2313 = vmatpush.msra.mxu1 %v4157_v1  ;;  %v4983_v61 = vld [vmem:[#allocation17_spill] sm:$0xff] }
 0x65f   :  { %2223 = vmatpush.msra.mxu3 %v4274_v32 }
 0x660   :  { %2294 = vmatpush.msra.mxu0 %v4091_v34  ;;  %2314 = vmatpush.msra.mxu1 %v4161_v21  ;;  %v4984_v34 = vld [vmem:[#allocation16_spill] sm:$0xff] }
 0x661   :  { %2224 = vmatpush.msra.mxu3 %v4280_v54 }
 0x662   :  { %2295 = vmatpush.msra.mxu0 %v4094_v22  ;;  %2315 = vmatpush.msra.mxu1 %v4166_v59  ;;  %v1744_v22 = vpop.f32.mrf.mxu0 }
 0x663   :  { %2225 = vmatpush.msra.mxu3 %v4285_v55 }
 0x664   :  { %2296 = vmatpush.msra.mxu0 %v4099_v11  ;;  %2316 = vmatpush.msra.mxu1 %v4171_v23  ;;  %v1703_v11 = vpop.f32.mrf.mxu3 }
 0x665   :  { %2226 = vmatpush.msra.mxu3 %v4297_v16  ;;  %v1704_v50 = vadd.f32 %v1703_v11, %v4992_v24 }
 0x666   :  { %2297 = vmatpush.msra.mxu0 %v4103_v30  ;;  %2317 = vmatpush.msra.mxu1 %v4177_v3 }
 0x667   :  { %2227 = vmatpush.msra.mxu3 %v4301_v56 }
 0x668   :  { %2298 = vmatpush.msra.mxu0 %v4106_v52  ;;  %2318 = vmatpush.msra.mxu1 %v4182_v7 }
 0x669   :  { %2228 = vmatpush.msra.mxu3 %v4306_v29 }
 0x66a   :  { %2299 = vmatpush.msra.mxu0 %v4109_v62  ;;  %2319 = vmatpush.msra.mxu1 %v4187_v39  ;;  %v4481_v30 = vpop.f32.mrf.mxu0 }
 0x66b   :  { %2229 = vmatpush.msra.mxu3 %v4978_v13 }
 0x66c   :  { %2300 = vmatpush.msra.mxu0 %v4112_v44  ;;  %2320 = vmatpush.msra.mxu1 %v4192_v8  ;;  %v4483_v52 = vpop.f32.mrf.mxu3 }
 0x66d   :  { %2230 = vmatpush.msra.mxu3 %v4979_v6 }
 0x66e   :  { %2301 = vmatpush.msra.mxu0 %v4115_v4  ;;  %2321 = vmatpush.msra.mxu1 %v4198_v43 }
 0x66f   :  { %2231 = vmatpush.msra.mxu3 %v4980_v5 }
 0x670   :  { %2302 = vmatpush.msra.mxu0 %v4118_v17  ;;  %2322 = vmatpush.msra.mxu1 %v4981_v15 }
 0x671   :  { %2232 = vmatpush.msra.mxu3 %v4982_v53 }
 0x672   :  { %2303 = vmatpush.msra.mxu0 %v4983_v61  ;;  %2323 = vmatpush.msra.mxu1 %v4984_v34  ;;  %v4485_v62 = vpop.f32.mrf.mxu0 }
 0x674   :  { %v4487_v44 = vpop.f32.mrf.mxu3 }
 0x67a   :  { %v4489_v4 = vpop.f32.mrf.mxu0 }
 0x67b   :  { %4985 = vst [vmem:[#allocation23_spill] sm:$0xff] %v4489_v4 }
 0x67c   :  { %v4491_v17 = vpop.f32.mrf.mxu3 }
 0x682   :  { %v4493_v14 = vpop.f32.mrf.mxu0 }
 0x683   :  { %4986 = vst [vmem:[#allocation24_spill] sm:$0xff] %v4493_v14 }
 0x684   :  { %v4495_v47 = vpop.f32.mrf.mxu3 }
 0x685   :  { %4987 = vst [vmem:[#allocation25_spill] sm:$0xff] %v4495_v47 }
 0x68a   :  { %v4497_v41 = vpop.f32.mrf.mxu0 }
 0x68b   :  { %4988 = vst [vmem:[#allocation18_spill] sm:$0xff] %v4497_v41 }
 0x68c   :  { %v4499_v12 = vpop.f32.mrf.mxu3 }
 0x68d   :  { %4989 = vst [vmem:[#allocation19_spill] sm:$0xff] %v4499_v12 }
 0x692   :  { %v4501_v63 = vpop.f32.mrf.mxu0 }
 0x693   :  { %4990 = vst [vmem:[#allocation17_spill] sm:$0xff] %v4501_v63 }
 0x694   :  { %v4503_v19 = vpop.f32.mrf.mxu3 }
 0x695   :  { %4991 = vst [vmem:[#allocation16_spill] sm:$0xff] %v4503_v19 }
 0x6cf   :  { %v1992_v58 = vpop.f32.mrf.mxu0 }
 0x6d0   :  { %v2035_v40 = vadd.f32 %v1992_v58, %v1704_v50 }
 0x6d2   :  { %v2847_v37 = vmul.f32 -1.442695, %v2035_v40 }
 0x6d4   :  { %2962 = vpow2.f32 %v2847_v37 }
 0x6d5   :  { %v1972_v18 = vpop.f32.mrf.mxu3 }
 0x6d6   :  { %v2015_v31 = vadd.f32 %v1972_v18, %v1663_v57  ;;  %v2012_v57 = vpop.f32.mrf.mxu1 }
 0x6d8   :  { %v2846_v27 = vmul.f32 -1.442695, %v2015_v31 }
 0x6da   :  { %v2963_v9 = vpop.eup %2962  ;;  %2964 = vpow2.f32 %v2846_v27  ;;  %v2055_v27 = vadd.f32 %v4422_v25, %v2012_v57 }
 0x6db   :  { %v2039_v2 = vadd.f32 1.0, %v2963_v9 }
 0x6dd   :  { %2966 = vrcp.f32 %v2039_v2  ;;  %vm2045_vm3 = vweird.f32 %v2039_v2 }
 0x6e0   :  { %v2965_v49 = vpop.eup %2964 }
 0x6e1   :  { %v2019_v61 = vadd.f32 1.0, %v2965_v49 }
 0x6e3   :  { %2968 = vrcp.f32 %v2019_v61  ;;  %v2967_v63 = vpop.eup %2966  ;;  %v2031_v40 = vand.u32 2147483648, %v2019_v61  ;;  %v2029_v37 = vand.u32 2147483647, %v2019_v61  ;;  %vm2025_vm14 = vweird.f32 %v2019_v61 }
 0x6e4   :  { %v2041_v19 = vmul.f32 %v2967_v63, %v2039_v2  ;;  %vm2046_vm2 = vweird.f32 %v2967_v63 }
 0x6e5   :  { %v2032_v31 = vor.u32 1.1754944e-38, %v2031_v40  ;;  %vm2030_vm1 = vcmp.eq.f32.partialorder %v2029_v37, 8.507059e+37  ;;  %vm2047_vm4 = vmor %vm2045_vm3, %vm2046_vm2 }
 0x6e6   :  { %v2042_v50 = vsub.f32 1.0, %v2041_v19  ;;  %v1745_v19 = vadd.f32 %v1744_v22, %v4424_v51  ;;  %v4517_v22 = vld [vmem:[#allocation9 + $0x168] sm:$0xff] }
 0x6e8   :  { %v2043_v36 = vmul.f32 %v2967_v63, %v2042_v50 }
 0x6e9   :  { %v2969_v11 = vpop.eup %2968 }
 0x6ea   :  { %v2021_v41 = vmul.f32 %v2969_v11, %v2019_v61  ;;  %vm2026_vm13 = vweird.f32 %v2969_v11  ;;  %v2044_v14 = vadd.f32 %v2967_v63, %v2043_v36 }
 0x6eb   :  { %vm2027_vm15 = vmor %vm2025_vm14, %vm2026_vm13 }
 0x6ec   :  { %v2022_v58 = vsub.f32 1.0, %v2021_v41  ;;  %v2051_v41 = vand.u32 2147483648, %v2039_v2  ;;  %v2048_v4 = vsel %vm2047_vm4, %v2967_v63, %v2044_v14 }
 0x6ee   :  { %v2023_v12 = vmul.f32 %v2969_v11, %v2022_v58  ;;  %v2049_v58 = vand.u32 2147483647, %v2039_v2 }
 0x6f0   :  { %v2024_v18 = vadd.f32 %v2969_v11, %v2023_v12  ;;  %v2052_v12 = vor.u32 1.1754944e-38, %v2051_v41  ;;  %vm2050_vm5 = vcmp.eq.f32.partialorder %v2049_v58, 8.507059e+37 }
 0x6f2   :  { %v2028_v9 = vsel %vm2027_vm15, %v2969_v11, %v2024_v18  ;;  %v2053_v61 = vsel %vm2050_vm5, %v2052_v12, %v2048_v4  ;;  %v4522_v4 = vld [vmem:[#allocation9 + $0x150] sm:$0xff] }
 0x6f3   :  { %v2033_v49 = vsel %vm2030_vm1, %v2032_v31, %v2028_v9  ;;  %v2059_v40 = vsub.f32 1.0, %v2053_v61  ;;  %v2061_v37 = vmul.f32 %v2053_v61, %v4428_v28  ;;  %v4527_v28 = vld [vmem:[#allocation9 + $0x138] sm:$0xff] }
 0x6f4   :  { %v2056_v47 = vmul.f32 %v2055_v27, %v2033_v49 }
 0x6f6   :  { %v2057_v50 = vadd.f32 %v2056_v47, %v1745_v19 }
 0x6f8   :  { %2970 = vtanh.f32 %v2057_v50 }
 0x6fe   :  { %v2971_v57 = vpop.eup %2970 }
 0x6ff   :  { %v2060_v11 = vmul.f32 %v2971_v57, %v2059_v40 }
 0x701   :  { %v4511_v36 = vadd.f32 %v2061_v37, %v2060_v11 }
 0x703   :  { %2082 = vmatmul.f32.vlgmr.msra.gmra.mxu2 %v4511_v36  ;;  %2102 = vmatmul.f32.vlgmr.msrb.gmra.mxu3 %v4511_v36 }
 0x704   :  { %2122 = vmatmul.f32.vlgmr.msrb.gmra.mxu0 %v4511_v36  ;;  %2328 = vmatpush.msra.mxu2 %v4200_v45  ;;  %v4532_v45 = vld [vmem:[#allocation9 + $0x120] sm:$0xff] }
 0x705   :  { %2399 = vmatpush.msrb.mxu3 %v4517_v22  ;;  %2419 = vmatpush.msrb.mxu0 %v4130_v46  ;;  %v4537_v46 = vld [vmem:[#allocation9 + $0x108] sm:$0xff] }
 0x706   :  { %2329 = vmatpush.msra.mxu2 %v4251_v35 }
 0x707   :  { %2400 = vmatpush.msrb.mxu3 %v4522_v4  ;;  %2420 = vmatpush.msrb.mxu0 %v4136_v20  ;;  %v4542_v20 = vld [vmem:[#allocation9 + $0xf0] sm:$0xff] }
 0x708   :  { %2330 = vmatpush.msra.mxu2 %v4253_v60 }
 0x709   :  { %2401 = vmatpush.msrb.mxu3 %v4527_v28  ;;  %2421 = vmatpush.msrb.mxu0 %v4140_v42  ;;  %v4547_v42 = vld [vmem:[#allocation9 + $0xd8] sm:$0xff] }
 0x70a   :  { %2331 = vmatpush.msra.mxu2 %v4263_v33 }
 0x70b   :  { %2402 = vmatpush.msrb.mxu3 %v4532_v45  ;;  %2422 = vmatpush.msrb.mxu0 %v4145_v10  ;;  %v4552_v10 = vld [vmem:[#allocation9 + $0xc0] sm:$0xff] }
 0x70c   :  { %2332 = vmatpush.msra.mxu2 %v4265_v48 }
 0x70d   :  { %2403 = vmatpush.msrb.mxu3 %v4537_v46  ;;  %2423 = vmatpush.msrb.mxu0 %v4150_v0  ;;  %v4557_v0 = vld [vmem:[#allocation9 + $0xa8] sm:$0xff] }
 0x70e   :  { %2333 = vmatpush.msra.mxu2 %v4269_v38 }
 0x70f   :  { %2404 = vmatpush.msrb.mxu3 %v4542_v20  ;;  %2424 = vmatpush.msrb.mxu0 %v4157_v1  ;;  %v4562_v1 = vld [vmem:[#allocation9 + $0x90] sm:$0xff] }
 0x710   :  { %2334 = vmatpush.msra.mxu2 %v4274_v32 }
 0x711   :  { %2405 = vmatpush.msrb.mxu3 %v4547_v42  ;;  %2425 = vmatpush.msrb.mxu0 %v4161_v21  ;;  %v4567_v21 = vld [vmem:[#allocation9 + $0x78] sm:$0xff] }
 0x712   :  { %2335 = vmatpush.msra.mxu2 %v4280_v54 }
 0x713   :  { %2406 = vmatpush.msrb.mxu3 %v4552_v10  ;;  %2426 = vmatpush.msrb.mxu0 %v4166_v59  ;;  %v4572_v59 = vld [vmem:[#allocation9 + $0x60] sm:$0xff] }
 0x714   :  { %2336 = vmatpush.msra.mxu2 %v4285_v55 }
 0x715   :  { %2407 = vmatpush.msrb.mxu3 %v4557_v0  ;;  %2427 = vmatpush.msrb.mxu0 %v4171_v23  ;;  %v4577_v23 = vld [vmem:[#allocation9 + $0x48] sm:$0xff] }
 0x716   :  { %2337 = vmatpush.msra.mxu2 %v4297_v16 }
 0x717   :  { %2408 = vmatpush.msrb.mxu3 %v4562_v1  ;;  %2428 = vmatpush.msrb.mxu0 %v4177_v3  ;;  %v4582_v3 = vld [vmem:[#allocation9 + $0x30] sm:$0xff] }
 0x718   :  { %2338 = vmatpush.msra.mxu2 %v4301_v56 }
 0x719   :  { %2409 = vmatpush.msrb.mxu3 %v4567_v21  ;;  %2429 = vmatpush.msrb.mxu0 %v4182_v7  ;;  %v4587_v7 = vld [vmem:[#allocation9 + $0x18] sm:$0xff] }
 0x71a   :  { %2339 = vmatpush.msra.mxu2 %v4306_v29 }
 0x71b   :  { %2410 = vmatpush.msrb.mxu3 %v4572_v59  ;;  %2430 = vmatpush.msrb.mxu0 %v4187_v39  ;;  %v4592_v39 = vld [vmem:[#allocation9] sm:$0xff] }
 0x71c   :  { %2340 = vmatpush.msra.mxu2 %v4978_v13 }
 0x71d   :  { %2411 = vmatpush.msrb.mxu3 %v4577_v23  ;;  %2431 = vmatpush.msrb.mxu0 %v4192_v8  ;;  %v4995_v8 = vld [vmem:[#allocation20_spill] sm:$0xff] }
 0x71e   :  { %2341 = vmatpush.msra.mxu2 %v4979_v6  ;;  %v1666_v14 = vadd.f32 %v4995_v8, %v4993_v26 }
 0x71f   :  { %2412 = vmatpush.msrb.mxu3 %v4582_v3  ;;  %2432 = vmatpush.msrb.mxu0 %v4198_v43  ;;  %v1707_v43 = vadd.f32 %v4483_v52, %v4992_v24 }
 0x720   :  { %2342 = vmatpush.msra.mxu2 %v4980_v5 }
 0x721   :  { %2413 = vmatpush.msrb.mxu3 %v4587_v7  ;;  %2433 = vmatpush.msrb.mxu0 %v4981_v15 }
 0x722   :  { %2343 = vmatpush.msra.mxu2 %v4982_v53 }
 0x723   :  { %2414 = vmatpush.msrb.mxu3 %v4592_v39  ;;  %2434 = vmatpush.msrb.mxu0 %v4984_v34 }
 0x781   :  { %v2123_v11 = vpop.f32.mrf.mxu0 }
 0x786   :  { %v2083_v47 = vpop.f32.mrf.mxu2  ;;  %v2103_v63 = vpop.f32.mrf.mxu3 }
 0x787   :  { %v2126_v2 = vadd.f32 %v2083_v47, %v1666_v14  ;;  %v2146_v18 = vadd.f32 %v2103_v63, %v1707_v43  ;;  %v2166_v43 = vadd.f32 %v4422_v25, %v2123_v11 }
 0x789   :  { %v2848_v31 = vmul.f32 -1.442695, %v2126_v2  ;;  %v2849_v15 = vmul.f32 -1.442695, %v2146_v18  ;;  %v1748_v18 = vadd.f32 %v4481_v30, %v4424_v51  ;;  %v4609_v30 = vld [vmem:[#allocation9 + $0x178] sm:$0xff] }
 0x78b   :  { %2972 = vpow2.f32 %v2848_v31 }
 0x78c   :  { %2974 = vpow2.f32 %v2849_v15 }
 0x791   :  { %v2973_v27 = vpop.eup %2972 }
 0x792   :  { %v2975_v9 = vpop.eup %2974  ;;  %v2130_v49 = vadd.f32 1.0, %v2973_v27 }
 0x793   :  { %v2150_v19 = vadd.f32 1.0, %v2975_v9 }
 0x794   :  { %2976 = vrcp.f32 %v2130_v49  ;;  %v2142_v52 = vand.u32 2147483648, %v2130_v49  ;;  %v2140_v57 = vand.u32 2147483647, %v2130_v49  ;;  %vm2136_vm7 = vweird.f32 %v2130_v49 }
 0x795   :  { %2978 = vrcp.f32 %v2150_v19  ;;  %v2162_v31 = vand.u32 2147483648, %v2150_v19  ;;  %vm2156_vm11 = vweird.f32 %v2150_v19  ;;  %v2160_v27 = vand.u32 2147483647, %v2150_v19 }
 0x796   :  { %v2143_v14 = vor.u32 1.1754944e-38, %v2142_v52  ;;  %vm2141_vm9 = vcmp.eq.f32.partialorder %v2140_v57, 8.507059e+37  ;;  %v4628_v57 = vld [vmem:[#allocation9 + $0x128] sm:$0xff] }
 0x797   :  { %vm2161_vm13 = vcmp.eq.f32.partialorder %v2160_v27, 8.507059e+37 }
 0x79a   :  { %v2977_v34 = vpop.eup %2976 }
 0x79b   :  { %v2979_v41 = vpop.eup %2978  ;;  %v2132_v58 = vmul.f32 %v2977_v34, %v2130_v49  ;;  %vm2137_vm6 = vweird.f32 %v2977_v34  ;;  %v2163_v49 = vor.u32 1.1754944e-38, %v2162_v31 }
 0x79c   :  { %v2152_v50 = vmul.f32 %v2979_v41, %v2150_v19  ;;  %vm2138_vm8 = vmor %vm2136_vm7, %vm2137_vm6  ;;  %vm2157_vm10 = vweird.f32 %v2979_v41  ;;  %v4613_v19 = vld [vmem:[#allocation9 + $0x170] sm:$0xff] }
 0x79d   :  { %v2133_v12 = vsub.f32 1.0, %v2132_v58  ;;  %vm2158_vm12 = vmor %vm2156_vm11, %vm2157_vm10 }
 0x79e   :  { %v2153_v61 = vsub.f32 1.0, %v2152_v50 }
 0x79f   :  { %v2134_v40 = vmul.f32 %v2977_v34, %v2133_v12 }
 0x7a0   :  { %v2154_v37 = vmul.f32 %v2979_v41, %v2153_v61 }
 0x7a1   :  { %v2135_v8 = vadd.f32 %v2977_v34, %v2134_v40 }
 0x7a2   :  { %v2155_v2 = vadd.f32 %v2979_v41, %v2154_v37 }
 0x7a3   :  { %v2139_v47 = vsel %vm2138_vm8, %v2977_v34, %v2135_v8 }
 0x7a4   :  { %v2144_v63 = vsel %vm2141_vm9, %v2143_v14, %v2139_v47  ;;  %v2159_v58 = vsel %vm2158_vm12, %v2979_v41, %v2155_v2  ;;  %v4623_v41 = vld [vmem:[#allocation9 + $0x140] sm:$0xff]  ;;  %v1710_v14 = vadd.f32 %v4487_v44, %v4992_v24 }
 0x7a5   :  { %v2167_v15 = vmul.f32 %v2166_v43, %v2144_v63  ;;  %v2164_v50 = vsel %vm2161_vm13, %v2163_v49, %v2159_v58 }
 0x7a6   :  { %v2170_v12 = vsub.f32 1.0, %v2164_v50  ;;  %v2172_v61 = vmul.f32 %v2164_v50, %v4511_v36  ;;  %v4618_v36 = vld [vmem:[#allocation9 + $0x158] sm:$0xff] }
 0x7a7   :  { %v2168_v9 = vadd.f32 %v2167_v15, %v1748_v18 }
 0x7a9   :  { %2980 = vtanh.f32 %v2168_v9 }
 0x7af   :  { %v2981_v34 = vpop.eup %2980 }
 0x7b0   :  { %v2171_v52 = vmul.f32 %v2981_v34, %v2170_v12 }
 0x7b2   :  { %v4604_v40 = vadd.f32 %v2172_v61, %v2171_v52 }
 0x7b4   :  { %2193 = vmatmul.f32.vlgmr.msrb.gmra.mxu1 %v4604_v40  ;;  %2213 = vmatmul.f32.vlgmr.msrb.gmra.mxu2 %v4604_v40 }
 0x7b5   :  { %2233 = vmatmul.f32.vlgmr.msra.gmra.mxu3 %v4604_v40  ;;  %2439 = vmatpush.msrb.mxu1 %v4609_v30 }
 0x7b6   :  { %2510 = vmatpush.msrb.mxu2 %v4517_v22  ;;  %2530 = vmatpush.msra.mxu3 %v4613_v19 }
 0x7b7   :  { %2440 = vmatpush.msrb.mxu1 %v4251_v35  ;;  %v4633_v35 = vld [vmem:[#allocation9 + $0x110] sm:$0xff] }
 0x7b8   :  { %2511 = vmatpush.msrb.mxu2 %v4522_v4  ;;  %2531 = vmatpush.msra.mxu3 %v4618_v36 }
 0x7b9   :  { %2441 = vmatpush.msrb.mxu1 %v4253_v60  ;;  %v4638_v60 = vld [vmem:[#allocation9 + $0xf8] sm:$0xff] }
 0x7ba   :  { %2512 = vmatpush.msrb.mxu2 %v4527_v28  ;;  %2532 = vmatpush.msra.mxu3 %v4623_v41 }
 0x7bb   :  { %2442 = vmatpush.msrb.mxu1 %v4263_v33  ;;  %v4643_v33 = vld [vmem:[#allocation9 + $0xe0] sm:$0xff] }
 0x7bc   :  { %2513 = vmatpush.msrb.mxu2 %v4532_v45  ;;  %2533 = vmatpush.msra.mxu3 %v4628_v57 }
 0x7bd   :  { %2443 = vmatpush.msrb.mxu1 %v4265_v48  ;;  %v4648_v48 = vld [vmem:[#allocation9 + $0xc8] sm:$0xff] }
 0x7be   :  { %2514 = vmatpush.msrb.mxu2 %v4537_v46  ;;  %2534 = vmatpush.msra.mxu3 %v4633_v35 }
 0x7bf   :  { %2444 = vmatpush.msrb.mxu1 %v4269_v38  ;;  %v4653_v38 = vld [vmem:[#allocation9 + $0xb0] sm:$0xff] }
 0x7c0   :  { %2515 = vmatpush.msrb.mxu2 %v4542_v20  ;;  %2535 = vmatpush.msra.mxu3 %v4638_v60 }
 0x7c1   :  { %2445 = vmatpush.msrb.mxu1 %v4274_v32  ;;  %v4658_v32 = vld [vmem:[#allocation9 + $0x98] sm:$0xff] }
 0x7c2   :  { %2516 = vmatpush.msrb.mxu2 %v4547_v42  ;;  %2536 = vmatpush.msra.mxu3 %v4643_v33 }
 0x7c3   :  { %2446 = vmatpush.msrb.mxu1 %v4280_v54  ;;  %v4663_v54 = vld [vmem:[#allocation9 + $0x80] sm:$0xff] }
 0x7c4   :  { %2517 = vmatpush.msrb.mxu2 %v4552_v10  ;;  %2537 = vmatpush.msra.mxu3 %v4648_v48 }
 0x7c5   :  { %2447 = vmatpush.msrb.mxu1 %v4285_v55  ;;  %v4668_v55 = vld [vmem:[#allocation9 + $0x68] sm:$0xff] }
 0x7c6   :  { %2518 = vmatpush.msrb.mxu2 %v4557_v0  ;;  %2538 = vmatpush.msra.mxu3 %v4653_v38 }
 0x7c7   :  { %2448 = vmatpush.msrb.mxu1 %v4297_v16  ;;  %v4673_v16 = vld [vmem:[#allocation9 + $0x50] sm:$0xff] }
 0x7c8   :  { %2519 = vmatpush.msrb.mxu2 %v4562_v1  ;;  %2539 = vmatpush.msra.mxu3 %v4658_v32 }
 0x7c9   :  { %2449 = vmatpush.msrb.mxu1 %v4301_v56  ;;  %v4678_v56 = vld [vmem:[#allocation9 + $0x38] sm:$0xff] }
 0x7ca   :  { %2520 = vmatpush.msrb.mxu2 %v4567_v21  ;;  %2540 = vmatpush.msra.mxu3 %v4663_v54 }
 0x7cb   :  { %2450 = vmatpush.msrb.mxu1 %v4306_v29  ;;  %v4683_v29 = vld [vmem:[#allocation9 + $0x20] sm:$0xff] }
 0x7cc   :  { %2521 = vmatpush.msrb.mxu2 %v4572_v59  ;;  %2541 = vmatpush.msra.mxu3 %v4668_v55 }
 0x7cd   :  { %2451 = vmatpush.msrb.mxu1 %v4978_v13  ;;  %v4688_v13 = vld [vmem:[#allocation9 + $0x8] sm:$0xff] }
 0x7ce   :  { %2522 = vmatpush.msrb.mxu2 %v4577_v23  ;;  %2542 = vmatpush.msra.mxu3 %v4673_v16 }
 0x7cf   :  { %2452 = vmatpush.msrb.mxu1 %v4979_v6  ;;  %v4996_v6 = vld [vmem:[#allocation22_spill] sm:$0xff] }
 0x7d0   :  { %2523 = vmatpush.msrb.mxu2 %v4582_v3  ;;  %2543 = vmatpush.msra.mxu3 %v4678_v56  ;;  %v1669_v11 = vadd.f32 %v4996_v6, %v4993_v26 }
 0x7d1   :  { %2453 = vmatpush.msrb.mxu1 %v4980_v5 }
 0x7d2   :  { %2524 = vmatpush.msrb.mxu2 %v4587_v7  ;;  %2544 = vmatpush.msra.mxu3 %v4683_v29 }
 0x7d3   :  { %2454 = vmatpush.msrb.mxu1 %v4982_v53 }
 0x7d4   :  { %2525 = vmatpush.msrb.mxu2 %v4592_v39  ;;  %2545 = vmatpush.msra.mxu3 %v4688_v13 }
 0x831   :  { %v2194_v37 = vpop.f32.mrf.mxu1 }
 0x832   :  { %v2237_v8 = vadd.f32 %v2194_v37, %v1669_v11 }
 0x834   :  { %v2850_v5 = vmul.f32 -1.442695, %v2237_v8  ;;  %v1751_v8 = vadd.f32 %v4485_v62, %v4424_v51 }
 0x836   :  { %2982 = vpow2.f32 %v2850_v5 }
 0x837   :  { %v2214_v43 = vpop.f32.mrf.mxu2 }
 0x838   :  { %v2257_v47 = vadd.f32 %v2214_v43, %v1710_v14  ;;  %v2234_v44 = vpop.f32.mrf.mxu3 }
 0x839   :  { %v2277_v37 = vadd.f32 %v4422_v25, %v2234_v44 }
 0x83a   :  { %v2851_v63 = vmul.f32 -1.442695, %v2257_v47 }
 0x83c   :  { %v2983_v53 = vpop.eup %2982  ;;  %2984 = vpow2.f32 %v2851_v63 }
 0x83d   :  { %v2241_v2 = vadd.f32 1.0, %v2983_v53 }
 0x83f   :  { %2986 = vrcp.f32 %v2241_v2  ;;  %v2253_v58 = vand.u32 2147483648, %v2241_v2  ;;  %v2251_v50 = vand.u32 2147483647, %v2241_v2  ;;  %vm2247_vm15 = vweird.f32 %v2241_v2 }
 0x841   :  { %v2254_v61 = vor.u32 1.1754944e-38, %v2253_v58  ;;  %vm2252_vm2 = vcmp.eq.f32.partialorder %v2251_v50, 8.507059e+37 }
 0x842   :  { %v2985_v18 = vpop.eup %2984 }
 0x843   :  { %v2261_v31 = vadd.f32 1.0, %v2985_v18 }
 0x845   :  { %v2987_v15 = vpop.eup %2986  ;;  %2988 = vrcp.f32 %v2261_v31  ;;  %v2273_v47 = vand.u32 2147483648, %v2261_v31  ;;  %v2271_v63 = vand.u32 2147483647, %v2261_v31  ;;  %vm2267_vm4 = vweird.f32 %v2261_v31 }
 0x846   :  { %v2243_v27 = vmul.f32 %v2987_v15, %v2241_v2  ;;  %vm2248_vm14 = vweird.f32 %v2987_v15 }
 0x847   :  { %vm2249_vm1 = vmor %vm2247_vm15, %vm2248_vm14  ;;  %vm2272_vm6 = vcmp.eq.f32.partialorder %v2271_v63, 8.507059e+37 }
 0x848   :  { %v2244_v9 = vsub.f32 1.0, %v2243_v27  ;;  %v2274_v27 = vor.u32 1.1754944e-38, %v2273_v47 }
 0x84a   :  { %v2245_v49 = vmul.f32 %v2987_v15, %v2244_v9 }
 0x84b   :  { %v2989_v12 = vpop.eup %2988 }
 0x84c   :  { %v2263_v34 = vmul.f32 %v2989_v12, %v2261_v31  ;;  %v2246_v52 = vadd.f32 %v2987_v15, %v2245_v49  ;;  %vm2268_vm3 = vweird.f32 %v2989_v12  ;;  %v4707_v31 = vld [vmem:[#allocation9 + $0x160] sm:$0xff] }
 0x84d   :  { %vm2269_vm5 = vmor %vm2267_vm4, %vm2268_vm3 }
 0x84e   :  { %v2264_v6 = vsub.f32 1.0, %v2263_v34  ;;  %v2250_v11 = vsel %vm2249_vm1, %v2987_v15, %v2246_v52 }
 0x84f   :  { %v2255_v5 = vsel %vm2252_vm2, %v2254_v61, %v2250_v11 }
 0x850   :  { %v2265_v14 = vmul.f32 %v2989_v12, %v2264_v6  ;;  %v2278_v43 = vmul.f32 %v2277_v37, %v2255_v5 }
 0x852   :  { %v2279_v53 = vadd.f32 %v2278_v43, %v1751_v8  ;;  %v2266_v18 = vadd.f32 %v2989_v12, %v2265_v14  ;;  %v4998_v14 = vld [vmem:[#allocation23_spill] sm:$0xff] }
 0x853   :  { %v1754_v43 = vadd.f32 %v4998_v14, %v4424_v51 }
 0x854   :  { %2990 = vtanh.f32 %v2279_v53  ;;  %v2270_v2 = vsel %vm2269_vm5, %v2989_v12, %v2266_v18  ;;  %v4717_v12 = vld [vmem:[#allocation9 + $0x130] sm:$0xff] }
 0x855   :  { %v2275_v15 = vsel %vm2272_vm6, %v2274_v27, %v2270_v2 }
 0x856   :  { %v2281_v9 = vsub.f32 1.0, %v2275_v15  ;;  %v2283_v62 = vmul.f32 %v2275_v15, %v4604_v40  ;;  %v4712_v40 = vld [vmem:[#allocation9 + $0x148] sm:$0xff] }
 0x85a   :  { %v2991_v58 = vpop.eup %2990 }
 0x85b   :  { %v2282_v49 = vmul.f32 %v2991_v58, %v2281_v9 }
 0x85d   :  { %v4699_v50 = vadd.f32 %v2283_v62, %v2282_v49 }
 0x85f   :  { %2304 = vmatmul.f32.vlgmr.msra.gmra.mxu0 %v4699_v50  ;;  %2324 = vmatmul.f32.vlgmr.msra.gmra.mxu1 %v4699_v50 }
 0x860   :  { %2344 = vmatmul.f32.vlgmr.msra.gmra.mxu2 %v4699_v50  ;;  %2550 = vmatpush.msra.mxu0 %v4609_v30 }
 0x861   :  { %2621 = vmatpush.msra.mxu1 %v4517_v22  ;;  %2641 = vmatpush.msra.mxu2 %v4613_v19  ;;  %v4722_v22 = vld [vmem:[#allocation9 + $0x118] sm:$0xff]  ;;  %v1713_v19 = vadd.f32 %v4491_v17, %v4992_v24 }
 0x862   :  { %2551 = vmatpush.msra.mxu0 %v4707_v31 }
 0x863   :  { %2622 = vmatpush.msra.mxu1 %v4522_v4  ;;  %2642 = vmatpush.msra.mxu2 %v4618_v36  ;;  %v4727_v4 = vld [vmem:[#allocation9 + $0x100] sm:$0xff] }
 0x864   :  { %2552 = vmatpush.msra.mxu0 %v4712_v40 }
 0x865   :  { %2623 = vmatpush.msra.mxu1 %v4527_v28  ;;  %2643 = vmatpush.msra.mxu2 %v4623_v41  ;;  %v4732_v28 = vld [vmem:[#allocation9 + $0xe8] sm:$0xff] }
 0x866   :  { %2553 = vmatpush.msra.mxu0 %v4717_v12 }
 0x867   :  { %2624 = vmatpush.msra.mxu1 %v4532_v45  ;;  %2644 = vmatpush.msra.mxu2 %v4628_v57  ;;  %v4737_v45 = vld [vmem:[#allocation9 + $0xd0] sm:$0xff] }
 0x868   :  { %2554 = vmatpush.msra.mxu0 %v4722_v22 }
 0x869   :  { %2625 = vmatpush.msra.mxu1 %v4537_v46  ;;  %2645 = vmatpush.msra.mxu2 %v4633_v35  ;;  %v4742_v46 = vld [vmem:[#allocation9 + $0xb8] sm:$0xff] }
 0x86a   :  { %2555 = vmatpush.msra.mxu0 %v4727_v4 }
 0x86b   :  { %2626 = vmatpush.msra.mxu1 %v4542_v20  ;;  %2646 = vmatpush.msra.mxu2 %v4638_v60  ;;  %v4747_v20 = vld [vmem:[#allocation9 + $0xa0] sm:$0xff] }
 0x86c   :  { %2556 = vmatpush.msra.mxu0 %v4732_v28 }
 0x86d   :  { %2627 = vmatpush.msra.mxu1 %v4547_v42  ;;  %2647 = vmatpush.msra.mxu2 %v4643_v33  ;;  %v4752_v42 = vld [vmem:[#allocation9 + $0x88] sm:$0xff] }
 0x86e   :  { %2557 = vmatpush.msra.mxu0 %v4737_v45 }
 0x86f   :  { %2628 = vmatpush.msra.mxu1 %v4552_v10  ;;  %2648 = vmatpush.msra.mxu2 %v4648_v48  ;;  %v4757_v10 = vld [vmem:[#allocation9 + $0x70] sm:$0xff] }
 0x870   :  { %2558 = vmatpush.msra.mxu0 %v4742_v46 }
 0x871   :  { %2629 = vmatpush.msra.mxu1 %v4557_v0  ;;  %2649 = vmatpush.msra.mxu2 %v4653_v38  ;;  %v4762_v0 = vld [vmem:[#allocation9 + $0x58] sm:$0xff] }
 0x872   :  { %2559 = vmatpush.msra.mxu0 %v4747_v20 }
 0x873   :  { %2630 = vmatpush.msra.mxu1 %v4562_v1  ;;  %2650 = vmatpush.msra.mxu2 %v4658_v32  ;;  %v4767_v1 = vld [vmem:[#allocation9 + $0x40] sm:$0xff] }
 0x874   :  { %2560 = vmatpush.msra.mxu0 %v4752_v42 }
 0x875   :  { %2631 = vmatpush.msra.mxu1 %v4567_v21  ;;  %2651 = vmatpush.msra.mxu2 %v4663_v54  ;;  %v4772_v21 = vld [vmem:[#allocation9 + $0x28] sm:$0xff] }
 0x876   :  { %2561 = vmatpush.msra.mxu0 %v4757_v10 }
 0x877   :  { %2632 = vmatpush.msra.mxu1 %v4572_v59  ;;  %2652 = vmatpush.msra.mxu2 %v4668_v55  ;;  %v4777_v59 = vld [vmem:[#allocation9 + $0x10] sm:$0xff] }
 0x878   :  { %2562 = vmatpush.msra.mxu0 %v4762_v0 }
 0x879   :  { %2633 = vmatpush.msra.mxu1 %v4577_v23  ;;  %2653 = vmatpush.msra.mxu2 %v4673_v16  ;;  %v4997_v23 = vld [vmem:[#allocation26_spill] sm:$0xff] }
 0x87a   :  { %2563 = vmatpush.msra.mxu0 %v4767_v1 }
 0x87b   :  { %2634 = vmatpush.msra.mxu1 %v4582_v3  ;;  %2654 = vmatpush.msra.mxu2 %v4678_v56  ;;  %v1672_v3 = vadd.f32 %v4997_v23, %v4993_v26 }
 0x87c   :  { %2564 = vmatpush.msra.mxu0 %v4772_v21 }
 0x87d   :  { %2635 = vmatpush.msra.mxu1 %v4587_v7  ;;  %2655 = vmatpush.msra.mxu2 %v4683_v29 }
 0x87e   :  { %2565 = vmatpush.msra.mxu0 %v4777_v59 }
 0x87f   :  { %2636 = vmatpush.msra.mxu1 %v4592_v39  ;;  %2656 = vmatpush.msra.mxu2 %v4688_v13 }
 0x8dc   :  { %v2305_v36 = vpop.f32.mrf.mxu0  ;;  %v2325_v41 = vpop.f32.mrf.mxu1 }
 0x8dd   :  { %v2348_v57 = vadd.f32 %v2305_v36, %v1672_v3  ;;  %v2368_v7 = vadd.f32 %v2325_v41, %v1713_v19 }
 0x8df   :  { %v2852_v35 = vmul.f32 -1.442695, %v2348_v57  ;;  %v2853_v60 = vmul.f32 -1.442695, %v2368_v7 }
 0x8e1   :  { %2992 = vpow2.f32 %v2852_v35 }
 0x8e2   :  { %2994 = vpow2.f32 %v2853_v60 }
 0x8e3   :  { %v2345_v52 = vpop.f32.mrf.mxu2 }
 0x8e4   :  { %v2388_v37 = vadd.f32 %v4422_v25, %v2345_v52 }
 0x8e7   :  { %v2993_v33 = vpop.eup %2992 }
 0x8e8   :  { %v2995_v48 = vpop.eup %2994  ;;  %v2352_v38 = vadd.f32 1.0, %v2993_v33 }
 0x8e9   :  { %v2372_v39 = vadd.f32 1.0, %v2995_v48  ;;  %v4818_v48 = vld [vmem:[%s4908_s8] ss:$0 sm:$0xff] }
 0x8ea   :  { %2996 = vrcp.f32 %v2352_v38  ;;  %v2364_v29 = vand.u32 2147483648, %v2352_v38  ;;  %v2362_v44 = vand.u32 2147483647, %v2352_v38  ;;  %vm2358_vm8 = vweird.f32 %v2352_v38 }
 0x8eb   :  { %2998 = vrcp.f32 %v2372_v39  ;;  %v2384_v63 = vand.u32 2147483648, %v2372_v39  ;;  %vm2378_vm12 = vweird.f32 %v2372_v39  ;;  %v2382_v53 = vand.u32 2147483647, %v2372_v39 }
 0x8ec   :  { %v2365_v6 = vor.u32 1.1754944e-38, %v2364_v29  ;;  %vm2363_vm10 = vcmp.eq.f32.partialorder %v2362_v44, 8.507059e+37 }
 0x8ed   :  { %v2385_v27 = vor.u32 1.1754944e-38, %v2384_v63  ;;  %vm2383_vm14 = vcmp.eq.f32.partialorder %v2382_v53, 8.507059e+37 }
 0x8f0   :  { %v2997_v32 = vpop.eup %2996 }
 0x8f1   :  { %v2999_v54 = vpop.eup %2998  ;;  %v2354_v55 = vmul.f32 %v2997_v32, %v2352_v38  ;;  %vm2359_vm7 = vweird.f32 %v2997_v32 }
 0x8f2   :  { %v2374_v16 = vmul.f32 %v2999_v54, %v2372_v39  ;;  %vm2360_vm9 = vmor %vm2358_vm8, %vm2359_vm7  ;;  %vm2379_vm11 = vweird.f32 %v2999_v54 }
 0x8f3   :  { %v2355_v56 = vsub.f32 1.0, %v2354_v55  ;;  %vm2380_vm13 = vmor %vm2378_vm12, %vm2379_vm11  ;;  %v5001_v55 = vld [vmem:[#allocation24_spill] sm:$0xff] }
 0x8f4   :  { %v2375_v17 = vsub.f32 1.0, %v2374_v16  ;;  %v1757_v16 = vadd.f32 %v5001_v55, %v4424_v51  ;;  %v2743_v55 = vld [vmem:[%s4909_s9 + $0x70] sm:$0xff] }
 0x8f5   :  { %v2356_v13 = vmul.f32 %v2997_v32, %v2355_v56 }
 0x8f6   :  { %v2376_v34 = vmul.f32 %v2999_v54, %v2375_v17 }
 0x8f7   :  { %v2357_v61 = vadd.f32 %v2997_v32, %v2356_v13 }
 0x8f8   :  { %v2377_v5 = vadd.f32 %v2999_v54, %v2376_v34 }
 0x8f9   :  { %v2361_v11 = vsel %vm2360_vm9, %v2997_v32, %v2357_v61 }
 0x8fa   :  { %v2366_v8 = vsel %vm2363_vm10, %v2365_v6, %v2361_v11  ;;  %v2381_v2 = vsel %vm2380_vm13, %v2999_v54, %v2377_v5  ;;  %v5002_v5 = vld [vmem:[#allocation28_spill] sm:$0xff] }
 0x8fb   :  { %v2389_v47 = vmul.f32 %v2388_v37, %v2366_v8  ;;  %v2386_v15 = vsel %vm2383_vm14, %v2385_v27, %v2381_v2  ;;  %v1678_v14 = vadd.f32 %v5002_v5, %v4993_v26 }
 0x8fc   :  { %v2392_v9 = vsub.f32 1.0, %v2386_v15  ;;  %v2394_v49 = vmul.f32 %v2386_v15, %v4699_v50 }
 0x8fd   :  { %v2390_v18 = vadd.f32 %v2389_v47, %v1754_v43  ;;  %v5003_v43 = vld [vmem:[#allocation19_spill] sm:$0xff] }
 0x8fe   :  { %v1719_v47 = vadd.f32 %v5003_v43, %v4992_v24 }
 0x8ff   :  { %3000 = vtanh.f32 %v2390_v18 }
 0x905   :  { %v3001_v58 = vpop.eup %3000 }
 0x906   :  { %v2393_v25 = vmul.f32 %v3001_v58, %v2392_v9 }
 0x908   :  { %v4790_v62 = vadd.f32 %v2394_v49, %v2393_v25 }
 0x90a   :  { %2415 = vmatmul.f32.vlgmr.msrb.gmra.mxu3 %v4790_v62  ;;  %2435 = vmatmul.f32.vlgmr.msrb.gmra.mxu0 %v4790_v62 }
 0x90b   :  { %2455 = vmatmul.f32.vlgmr.msrb.gmra.mxu1 %v4790_v62  ;;  %2661 = vmatpush.msrb.mxu3 %v4609_v30  ;;  %v4999_v30 = vld [vmem:[#allocation25_spill] sm:$0xff] }
 0x90c   :  { %v1716_v50 = vadd.f32 %v4999_v30, %v4992_v24 }
 0x90d   :  { %2662 = vmatpush.msrb.mxu3 %v4707_v31 }
 0x90f   :  { %2663 = vmatpush.msrb.mxu3 %v4712_v40 }
 0x911   :  { %2664 = vmatpush.msrb.mxu3 %v4717_v12 }
 0x913   :  { %2665 = vmatpush.msrb.mxu3 %v4722_v22  ;;  %v5000_v22 = vld [vmem:[#allocation27_spill] sm:$0xff] }
 0x915   :  { %2666 = vmatpush.msrb.mxu3 %v4727_v4  ;;  %v1675_v4 = vadd.f32 %v5000_v22, %v4993_v26 }
 0x917   :  { %2667 = vmatpush.msrb.mxu3 %v4732_v28 }
 0x919   :  { %2668 = vmatpush.msrb.mxu3 %v4737_v45 }
 0x91b   :  { %2669 = vmatpush.msrb.mxu3 %v4742_v46 }
 0x91d   :  { %2670 = vmatpush.msrb.mxu3 %v4747_v20 }
 0x91f   :  { %2671 = vmatpush.msrb.mxu3 %v4752_v42 }
 0x921   :  { %2672 = vmatpush.msrb.mxu3 %v4757_v10 }
 0x923   :  { %2673 = vmatpush.msrb.mxu3 %v4762_v0 }
 0x925   :  { %2674 = vmatpush.msrb.mxu3 %v4767_v1 }
 0x927   :  { %2675 = vmatpush.msrb.mxu3 %v4772_v21 }
 0x929   :  { %2676 = vmatpush.msrb.mxu3 %v4777_v59 }
 0x987   :  { %v2436_v31 = vpop.f32.mrf.mxu0 }
 0x988   :  { %v2479_v40 = vadd.f32 %v2436_v31, %v1716_v50  ;;  %v2456_v35 = vpop.f32.mrf.mxu1 }
 0x989   :  { %v2499_v38 = vadd.f32 %v4818_v48, %v2456_v35 }
 0x98a   :  { %v2855_v12 = vmul.f32 -1.442695, %v2479_v40 }
 0x98c   :  { %3002 = vpow2.f32 %v2855_v12 }
 0x98d   :  { %v2416_v28 = vpop.f32.mrf.mxu3 }
 0x98e   :  { %v2459_v45 = vadd.f32 %v2416_v28, %v1675_v4 }
 0x990   :  { %v2854_v46 = vmul.f32 -1.442695, %v2459_v45 }
 0x992   :  { %v3003_v20 = vpop.eup %3002  ;;  %3004 = vpow2.f32 %v2854_v46 }
 0x993   :  { %v2483_v42 = vadd.f32 1.0, %v3003_v20 }
 0x995   :  { %3006 = vrcp.f32 %v2483_v42  ;;  %v2495_v56 = vand.u32 2147483648, %v2483_v42  ;;  %vm2489_vm5 = vweird.f32 %v2483_v42  ;;  %v2493_v29 = vand.u32 2147483647, %v2483_v42 }
 0x997   :  { %v2496_v34 = vor.u32 1.1754944e-38, %v2495_v56  ;;  %vm2494_vm7 = vcmp.eq.f32.partialorder %v2493_v29, 8.507059e+37  ;;  %v2741_v56 = vld [vmem:[%s4909_s9 + $0x60] sm:$0xff]  ;;  %v2739_v29 = vld [vmem:[%s4909_s9 + $0x50] sm:$0xff] }
 0x998   :  { %v3005_v10 = vpop.eup %3004 }
 0x999   :  { %v2463_v0 = vadd.f32 1.0, %v3005_v10 }
 0x99b   :  { %3008 = vrcp.f32 %v2463_v0  ;;  %v3007_v1 = vpop.eup %3006  ;;  %v2475_v36 = vand.u32 2147483648, %v2463_v0  ;;  %v2473_v57 = vand.u32 2147483647, %v2463_v0  ;;  %vm2469_vm1 = vweird.f32 %v2463_v0 }
 0x99c   :  { %v2485_v21 = vmul.f32 %v3007_v1, %v2483_v42  ;;  %vm2490_vm4 = vweird.f32 %v3007_v1 }
 0x99d   :  { %v2476_v33 = vor.u32 1.1754944e-38, %v2475_v36  ;;  %vm2474_vm3 = vcmp.eq.f32.partialorder %v2473_v57, 8.507059e+37  ;;  %vm2491_vm6 = vmor %vm2489_vm5, %vm2490_vm4 }
 0x99e   :  { %v2486_v3 = vsub.f32 1.0, %v2485_v21 }
 0x9a0   :  { %v2487_v7 = vmul.f32 %v3007_v1, %v2486_v3 }
 0x9a1   :  { %v3009_v59 = vpop.eup %3008 }
 0x9a2   :  { %v2465_v23 = vmul.f32 %v3009_v59, %v2463_v0  ;;  %vm2470_vm15 = vweird.f32 %v3009_v59  ;;  %v2488_v32 = vadd.f32 %v3007_v1, %v2487_v7 }
 0x9a3   :  { %vm2471_vm2 = vmor %vm2469_vm1, %vm2470_vm15 }
 0x9a4   :  { %v2466_v19 = vsub.f32 1.0, %v2465_v23  ;;  %v2492_v44 = vsel %vm2491_vm6, %v3007_v1, %v2488_v32 }
 0x9a5   :  { %v2497_v52 = vsel %vm2494_vm7, %v2496_v34, %v2492_v44  ;;  %v5005_v44 = vld [vmem:[#allocation29_spill] sm:$0xff] }
 0x9a6   :  { %v2467_v41 = vmul.f32 %v3009_v59, %v2466_v19  ;;  %v2503_v61 = vsub.f32 1.0, %v2497_v52  ;;  %v2505_v37 = vmul.f32 %v2497_v52, %v4790_v62  ;;  %v1681_v34 = vadd.f32 %v5005_v44, %v4993_v26  ;;  %v2737_v52 = vld [vmem:[%s4909_s9 + $0x40] sm:$0xff]  ;;  %v5006_v26 = vld [vmem:[#allocation16_spill] sm:$0xff] }
 0x9a7   :  { %v1722_v5 = vadd.f32 %v5006_v26, %v4992_v24  ;;  %v2731_v24 = vld [vmem:[%s4909_s9 + $0x10] sm:$0xff] }
 0x9a8   :  { %v2468_v60 = vadd.f32 %v3009_v59, %v2467_v41 }
 0x9aa   :  { %v2472_v39 = vsel %vm2471_vm2, %v3009_v59, %v2468_v60  ;;  %v5004_v59 = vld [vmem:[#allocation18_spill] sm:$0xff] }
 0x9ab   :  { %v2477_v54 = vsel %vm2474_vm3, %v2476_v33, %v2472_v39  ;;  %v1760_v23 = vadd.f32 %v5004_v59, %v4424_v51 }
 0x9ac   :  { %v2500_v17 = vmul.f32 %v2499_v38, %v2477_v54  ;;  %v2744_v54 = vld [vmem:[%s4909_s9 + $0x78] sm:$0xff] }
 0x9ad   :  { %2749 = vmatpush.msrb.mxu0 %v2744_v54 }
 0x9ae   :  { %v2501_v13 = vadd.f32 %v2500_v17, %v1757_v16  ;;  %v2742_v16 = vld [vmem:[%s4909_s9 + $0x68] sm:$0xff]  ;;  %v2740_v17 = vld [vmem:[%s4909_s9 + $0x58] sm:$0xff] }
 0x9af   :  { %2750 = vmatpush.msrb.mxu0 %v2743_v55 }
 0x9b0   :  { %3010 = vtanh.f32 %v2501_v13  ;;  %v2738_v13 = vld [vmem:[%s4909_s9 + $0x48] sm:$0xff] }
 0x9b1   :  { %2751 = vmatpush.msrb.mxu0 %v2742_v16 }
 0x9b3   :  { %2752 = vmatpush.msrb.mxu0 %v2741_v56 }
 0x9b5   :  { %2753 = vmatpush.msrb.mxu0 %v2740_v17 }
 0x9b6   :  { %v3011_v6 = vpop.eup %3010 }
 0x9b7   :  { %v2504_v11 = vmul.f32 %v3011_v6, %v2503_v61  ;;  %2754 = vmatpush.msrb.mxu0 %v2739_v29 }
 0x9b9   :  { %v2506_v8 = vadd.f32 %v2505_v37, %v2504_v11  ;;  %2755 = vmatpush.msrb.mxu0 %v2738_v13  ;;  %v2736_v11 = vld [vmem:[%s4909_s9 + $0x38] sm:$0xff] }
 0x9bb   :  { %2526 = vmatmul.f32.vlgmr.msrb.gmra.mxu2 %v2506_v8  ;;  %2546 = vmatmul.f32.vlgmr.msra.gmra.mxu3 %v2506_v8 }
 0x9bc   :  { %2566 = vmatmul.f32.vlgmr.msra.gmra.mxu0 %v2506_v8 }
 0x9bd   :  { %2756 = vmatpush.msrb.mxu0 %v2737_v52 }
 0x9bf   :  { %2757 = vmatpush.msrb.mxu0 %v2736_v11 }
 0xa39   :  { %v2567_v45 = vpop.f32.mrf.mxu0 }
 0xa3a   :  { %v2610_v10 = vadd.f32 %v4818_v48, %v2567_v45 }
 0xa3e   :  { %v2527_v63 = vpop.f32.mrf.mxu2  ;;  %v2547_v53 = vpop.f32.mrf.mxu3 }
 0xa3f   :  { %v2570_v18 = vadd.f32 %v2527_v63, %v1678_v14  ;;  %v2590_v2 = vadd.f32 %v2547_v53, %v1719_v47  ;;  %v2734_v14 = vld [vmem:[%s4909_s9 + $0x28] sm:$0xff]  ;;  %v2733_v63 = vld [vmem:[%s4909_s9 + $0x20] sm:$0xff] }
 0xa41   :  { %v2856_v27 = vmul.f32 -1.442695, %v2570_v18  ;;  %v2857_v15 = vmul.f32 -1.442695, %v2590_v2  ;;  %v2732_v18 = vld [vmem:[%s4909_s9 + $0x18] sm:$0xff] }
 0xa43   :  { %3012 = vpow2.f32 %v2856_v27  ;;  %v2730_v27 = vld [vmem:[%s4909_s9 + $0x8] sm:$0xff] }
 0xa44   :  { %3014 = vpow2.f32 %v2857_v15 }
 0xa49   :  { %v3013_v9 = vpop.eup %3012 }
 0xa4a   :  { %v3015_v58 = vpop.eup %3014  ;;  %v2574_v25 = vadd.f32 1.0, %v3013_v9  ;;  %v2729_v9 = vld [vmem:[%s4909_s9] sm:$0xff] }
 0xa4b   :  { %v2594_v49 = vadd.f32 1.0, %v3015_v58 }
 0xa4c   :  { %3016 = vrcp.f32 %v2574_v25  ;;  %v2586_v12 = vand.u32 2147483648, %v2574_v25  ;;  %v2584_v28 = vand.u32 2147483647, %v2574_v25  ;;  %vm2580_vm9 = vweird.f32 %v2574_v25 }
 0xa4d   :  { %3018 = vrcp.f32 %v2594_v49  ;;  %v2606_v3 = vand.u32 2147483648, %v2594_v49  ;;  %vm2600_vm13 = vweird.f32 %v2594_v49  ;;  %v2604_v36 = vand.u32 2147483647, %v2594_v49 }
 0xa4e   :  { %v2587_v42 = vor.u32 1.1754944e-38, %v2586_v12  ;;  %vm2585_vm11 = vcmp.eq.f32.partialorder %v2584_v28, 8.507059e+37 }
 0xa4f   :  { %v2607_v7 = vor.u32 1.1754944e-38, %v2606_v3  ;;  %vm2605_vm15 = vcmp.eq.f32.partialorder %v2604_v36, 8.507059e+37 }
 0xa52   :  { %v3017_v62 = vpop.eup %3016 }
 0xa53   :  { %v3019_v30 = vpop.eup %3018  ;;  %v2576_v50 = vmul.f32 %v3017_v62, %v2574_v25  ;;  %vm2581_vm8 = vweird.f32 %v3017_v62 }
 0xa54   :  { %v2596_v31 = vmul.f32 %v3019_v30, %v2594_v49  ;;  %vm2582_vm10 = vmor %vm2580_vm9, %vm2581_vm8  ;;  %vm2601_vm12 = vweird.f32 %v3019_v30 }
 0xa55   :  { %v2577_v40 = vsub.f32 1.0, %v2576_v50  ;;  %vm2602_vm14 = vmor %vm2600_vm13, %vm2601_vm12 }
 0xa56   :  { %v2597_v22 = vsub.f32 1.0, %v2596_v31 }
 0xa57   :  { %v2578_v4 = vmul.f32 %v3017_v62, %v2577_v40 }
 0xa58   :  { %v2598_v46 = vmul.f32 %v3019_v30, %v2597_v22 }
 0xa59   :  { %v2579_v20 = vadd.f32 %v3017_v62, %v2578_v4 }
 0xa5a   :  { %v2599_v21 = vadd.f32 %v3019_v30, %v2598_v46 }
 0xa5b   :  { %v2583_v0 = vsel %vm2582_vm10, %v3017_v62, %v2579_v20 }
 0xa5c   :  { %v2588_v1 = vsel %vm2585_vm11, %v2587_v42, %v2583_v0  ;;  %v2603_v57 = vsel %vm2602_vm14, %v3019_v30, %v2599_v21 }
 0xa5d   :  { %v2611_v19 = vmul.f32 %v2610_v10, %v2588_v1  ;;  %v2608_v35 = vsel %vm2605_vm15, %v2607_v7, %v2603_v57  ;;  %v5007_v10 = vld [vmem:[#allocation17_spill] sm:$0xff] }
 0xa5e   :  { %v2614_v60 = vsub.f32 1.0, %v2608_v35  ;;  %v2616_v39 = vmul.f32 %v2608_v35, %v2506_v8  ;;  %v2735_v8 = vld [vmem:[%s4909_s9 + $0x30] sm:$0xff]  ;;  %v1763_v0 = vadd.f32 %v5007_v10, %v4424_v51 }
 0xa5f   :  { %v2612_v41 = vadd.f32 %v2611_v19, %v1760_v23  ;;  %2758 = vmatpush.msrb.mxu0 %v2735_v8 }
 0xa61   :  { %3020 = vtanh.f32 %v2612_v41  ;;  %2759 = vmatpush.msrb.mxu0 %v2734_v14 }
 0xa63   :  { %2760 = vmatpush.msrb.mxu0 %v2733_v63 }
 0xa65   :  { %2761 = vmatpush.msrb.mxu0 %v2732_v18 }
 0xa67   :  { %v3021_v33 = vpop.eup %3020  ;;  %2762 = vmatpush.msrb.mxu0 %v2731_v24 }
 0xa68   :  { %v2615_v38 = vmul.f32 %v3021_v33, %v2614_v60 }
 0xa69   :  { %2763 = vmatpush.msrb.mxu0 %v2730_v27 }
 0xa6a   :  { %v4831_v32 = vadd.f32 %v2616_v39, %v2615_v38  ;;  %v2871_v38 = vld [vmem:[%s4910_s10] ss:$0 sm:$0xff] }
 0xa6b   :  { %2764 = vmatpush.msrb.mxu0 %v2729_v9 }
 0xa6c   :  { %2637 = vmatmul.f32.vlgmr.msra.gmra.mxu1 %v4831_v32  ;;  %2657 = vmatmul.f32.vlgmr.msra.gmra.mxu2 %v4831_v32 }
 0xa6d   :  { %2677 = vmatmul.f32.vlgmr.msrb.gmra.mxu3 %v4831_v32 }
 0xae9   :  { %v2638_v61 = vpop.f32.mrf.mxu1 }
 0xaea   :  { %v2681_v6 = vadd.f32 %v2638_v61, %v1681_v34 }
 0xaec   :  { %v2858_v37 = vmul.f32 -1.442695, %v2681_v6 }
 0xaee   :  { %3022 = vpow2.f32 %v2858_v37 }
 0xaef   :  { %v2658_v43 = vpop.f32.mrf.mxu2 }
 0xaf0   :  { %v2701_v47 = vadd.f32 %v2658_v43, %v1722_v5  ;;  %v2678_v22 = vpop.f32.mrf.mxu3 }
 0xaf1   :  { %v2721_v42 = vadd.f32 %v4818_v48, %v2678_v22 }
 0xaf2   :  { %v2859_v53 = vmul.f32 -1.442695, %v2701_v47 }
 0xaf4   :  { %v3023_v2 = vpop.eup %3022  ;;  %3024 = vpow2.f32 %v2859_v53 }
 0xaf5   :  { %v2685_v15 = vadd.f32 1.0, %v3023_v2 }
 0xaf7   :  { %3026 = vrcp.f32 %v2685_v15  ;;  %v2697_v50 = vand.u32 2147483648, %v2685_v15  ;;  %v2695_v40 = vand.u32 2147483647, %v2685_v15  ;;  %vm2691_vm2 = vweird.f32 %v2685_v15 }
 0xaf9   :  { %v2698_v45 = vor.u32 1.1754944e-38, %v2697_v50  ;;  %vm2696_vm4 = vcmp.eq.f32.partialorder %v2695_v40, 8.507059e+37 }
 0xafa   :  { %v3025_v58 = vpop.eup %3024 }
 0xafb   :  { %v2705_v25 = vadd.f32 1.0, %v3025_v58 }
 0xafd   :  { %v3027_v49 = vpop.eup %3026  ;;  %3028 = vrcp.f32 %v2705_v25  ;;  %v2717_v59 = vand.u32 2147483648, %v2705_v25  ;;  %v2715_v3 = vand.u32 2147483647, %v2705_v25  ;;  %vm2711_vm6 = vweird.f32 %v2705_v25 }
 0xafe   :  { %v2687_v62 = vmul.f32 %v3027_v49, %v2685_v15  ;;  %vm2692_vm1 = vweird.f32 %v3027_v49 }
 0xaff   :  { %vm2693_vm3 = vmor %vm2691_vm2, %vm2692_vm1  ;;  %v2718_v41 = vor.u32 1.1754944e-38, %v2717_v59  ;;  %vm2716_vm8 = vcmp.eq.f32.partialorder %v2715_v3, 8.507059e+37 }
 0xb00   :  { %v2688_v30 = vsub.f32 1.0, %v2687_v62 }
 0xb02   :  { %v2689_v31 = vmul.f32 %v3027_v49, %v2688_v30 }
 0xb03   :  { %v3029_v12 = vpop.eup %3028 }
 0xb04   :  { %v2707_v4 = vmul.f32 %v3029_v12, %v2705_v25  ;;  %v2690_v28 = vadd.f32 %v3027_v49, %v2689_v31  ;;  %vm2712_vm5 = vweird.f32 %v3029_v12 }
 0xb05   :  { %vm2713_vm7 = vmor %vm2711_vm6, %vm2712_vm5 }
 0xb06   :  { %v2708_v46 = vsub.f32 1.0, %v2707_v4  ;;  %v2694_v20 = vsel %vm2693_vm3, %v3027_v49, %v2690_v28 }
 0xb07   :  { %v2699_v1 = vsel %vm2696_vm4, %v2698_v45, %v2694_v20 }
 0xb08   :  { %v2709_v21 = vmul.f32 %v3029_v12, %v2708_v46  ;;  %v2722_v23 = vmul.f32 %v2721_v42, %v2699_v1 }
 0xb0a   :  { %v2710_v19 = vadd.f32 %v3029_v12, %v2709_v21  ;;  %v2723_v36 = vadd.f32 %v2722_v23, %v1763_v0 }
 0xb0c   :  { %v2714_v57 = vsel %vm2713_vm7, %v3029_v12, %v2710_v19  ;;  %3030 = vtanh.f32 %v2723_v36 }
 0xb0d   :  { %v2719_v7 = vsel %vm2716_vm8, %v2718_v41, %v2714_v57 }
 0xb0e   :  { %v2725_v35 = vsub.f32 1.0, %v2719_v7  ;;  %v2727_v51 = vmul.f32 %v2719_v7, %v4831_v32 }
 0xb12   :  { %v3031_v48 = vpop.eup %3030 }
 0xb13   :  { %v2726_v60 = vmul.f32 %v3031_v48, %v2725_v35 }
 0xb15   :  { %v2728_v33 = vadd.f32 %v2727_v51, %v2726_v60 }
 0xb17   :  { %2765 = vmatmul.f32.vlgmr.msrb.gmra.mxu0 %v2728_v33 }
 0xb94   :  { %v2766_v39 = vpop.f32.mrf.mxu0 }
 0xb95   :  { %v2767_v54 = vadd.f32 %v2871_v38, %v2766_v39 }
 0xb97   :  { %v2769_v55 = vmul.f32 %v2767_v54, %v2767_v54 }
 0xb99   :  { %v2770_v16 = vsel %vm108_vm0, %v2769_v55, 0.0 }
 0xb9a   :  { %2771 = vadd.xlane.f32.xlu0 %v2770_v16 }
 0xc0d   :  { %v2772_v56 = vpop.xlane.xlu0 %2771 }
 0xc0e   :  { %v2773_v17 = vmax.f32 %v2772_v56, 1e-12 }
 0xc10   :  { %3032 = vrsqrt.f32 %v2773_v17  ;;  %vm2780_vm10 = vweird.f32 %v2773_v17 }
 0xc16   :  { %v3033_v29 = vpop.eup %3032 }
 0xc17   :  { %v2775_v13 = vmul.f32 %v3033_v29, %v2773_v17  ;;  %vm2781_vm9 = vweird.f32 %v3033_v29 }
 0xc18   :  { %vm2782_vm11 = vmor %vm2780_vm10, %vm2781_vm9 }
 0xc19   :  { %v2776_v44 = vmul.f32 %v3033_v29, %v2775_v13 }
 0xc1b   :  { %v2777_v34 = vmul.f32 0.5, %v2776_v44 }
 0xc1d   :  { %v2778_v32 = vsub.f32 1.5, %v2777_v34 }
 0xc1f   :  { %v2779_v52 = vmul.f32 %v3033_v29, %v2778_v32 }
 0xc21   :  { %v2783_v61 = vsel %vm2782_vm11, %v3033_v29, %v2779_v52 }
 0xc22   :  { %v2784_v6 = vmul.f32 %v2783_v61, %v2767_v54 }
 0xc24   :  { %2785 = vst.msk [vmem:[#allocation10] sm:$0xff] %vm108_vm0, %v2784_v6 }
 0xc25   :  { %2796 = dma.vmem_to_hbm [thread:$0]  %s2792_s30, 128, %s2794_s5, [#allocation6]  }
 0xc26   :  { %3184 = dma.done.wait [#allocation6], 128  }
 0xc27   :  { %3185 = vsyncadd [#allocation6], 4294967168 }
 0xc28   :  { %2801 = vsyncpa [#allocation5], 1 }
 0xc29   :  { %2802 = vsyncpa [#allocation8], 1 }
 0xc2a   :  { %2803 = vsyncpa [#allocation6], 1 }

</bundles_post_ra>
